<compile_context>
chip_gen: v7x
topology: tpu7x:2x2x1
jax: 0.10.0
libtpu: 0.0.40
codegen_flags: <defaults>
</compile_context>

<pallas_src>
import numpy as np
import jax
import jax.numpy as jnp
from jax.experimental import pallas as pl
from jax.experimental.pallas import tpu as pltpu

LATENT_DIM = 100
IMG_SHAPE = (3, 25, 25)
OUT_DIM = int(np.prod(IMG_SHAPE))   # 1875
OUT_PAD = 1920                      # 15 * 128 -> lane-dense padded output width
TILE_N = 640                        # 5 * 128 ; 3 grid steps over the final layer
BN_EPS = 0.8
LEAKY_SLOPE = 0.2
HIDDEN = (128, 256, 512, 1024)


def _leaky_relu(x):
    return jnp.where(x > 0, x, LEAKY_SLOPE * x)


def _batchnorm_train(x, gamma, beta):
    # nn.BatchNorm1d(out_feat, 0.8) in training mode: batch mean, biased variance,
    # eps = 0.8.  Single-pass variance: E[x^2] - E[x]^2 (halves cross-sublane reduces).
    mean = jnp.mean(x, axis=0, keepdims=True)
    mean_sq = jnp.mean(x * x, axis=0, keepdims=True)
    var = jnp.maximum(mean_sq - mean * mean, 0.0)
    return (x - mean) * jax.lax.rsqrt(var + BN_EPS) * gamma + beta


def generator_kernel(z_ref,
                     w1_ref, b1_ref,
                     w2_ref, g2_ref, be2_ref,
                     w3_ref, g3_ref, be3_ref,
                     w4_ref, g4_ref, be4_ref,
                     w5_ref, b5_ref,
                     out_ref,
                     h4_ref):
    # Trunk (layers 1-4) computed once on the first grid step; result persists in
    # a VMEM scratch across the final-layer N tiles.
    @pl.when(pl.program_id(0) == 0)
    def _():
        # block(100 -> 128, normalize=False): bias + LeakyReLU.
        h = jnp.dot(z_ref[...].astype(jnp.bfloat16), w1_ref[...],
                    preferred_element_type=jnp.float32) + b1_ref[...]
        h = _leaky_relu(h)

        # block(128 -> 256): Linear (bias omitted: a per-feature constant cancels
        # exactly under training-mode BatchNorm) -> BN -> LeakyReLU.
        h = jnp.dot(h.astype(jnp.bfloat16), w2_ref[...],
                    preferred_element_type=jnp.float32)
        h = _leaky_relu(_batchnorm_train(h, g2_ref[...], be2_ref[...]))

        # block(256 -> 512)
        h = jnp.dot(h.astype(jnp.bfloat16), w3_ref[...],
                    preferred_element_type=jnp.float32)
        h = _leaky_relu(_batchnorm_train(h, g3_ref[...], be3_ref[...]))

        # block(512 -> 1024)
        h = jnp.dot(h.astype(jnp.bfloat16), w4_ref[...],
                    preferred_element_type=jnp.float32)
        h = _leaky_relu(_batchnorm_train(h, g4_ref[...], be4_ref[...]))

        h4_ref[...] = h.astype(jnp.bfloat16)

    # Final Linear(1024 -> 1920[= padded 1875]) tile + Tanh; one N tile per step.
    h5 = jnp.dot(h4_ref[...], w5_ref[...],
                 preferred_element_type=jnp.float32) + b5_ref[...]
    out_ref[...] = jnp.tanh(h5)


def init_params(key):
    """Deterministic synthetic parameters (PyTorch Linear-style uniform init).

    Weights are stored (in_features, out_features) in bf16; biases / BN affine
    params as (1, out_features) f32 rows.  The final layer is zero-padded along
    its output dim from 1875 to 1920.
    """
    dims = [LATENT_DIM, *HIDDEN, OUT_DIM]
    keys = jax.random.split(key, 2 * (len(dims) - 1))
    ws, bs = [], []
    for li in range(len(dims) - 1):
        fan_in, fan_out = dims[li], dims[li + 1]
        bound = 1.0 / np.sqrt(fan_in)
        w = jax.random.uniform(keys[2 * li], (fan_in, fan_out),
                               minval=-bound, maxval=bound, dtype=jnp.float32)
        b = jax.random.uniform(keys[2 * li + 1], (1, fan_out),
                               minval=-bound, maxval=bound, dtype=jnp.float32)
        ws.append(w)
        bs.append(b)

    # Pad the final layer's columns 1875 -> 1920 with zeros (lane-dense stores).
    w5 = jnp.pad(ws[4], ((0, 0), (0, OUT_PAD - OUT_DIM)))
    b5 = jnp.pad(bs[4], ((0, 0), (0, OUT_PAD - OUT_DIM)))

    # Weights live in HBM as bf16; MXU accumulates in f32.
    w1, w2, w3, w4 = (w.astype(jnp.bfloat16) for w in ws[:4])
    w5 = w5.astype(jnp.bfloat16)

    # BatchNorm affine params (gamma=1, beta=0 at init) for blocks 2..4.
    bn = [(jnp.ones((1, f), jnp.float32), jnp.zeros((1, f), jnp.float32))
          for f in HIDDEN[1:]]
    (g2, be2), (g3, be3), (g4, be4) = bn

    # Biases b2/b3/b4 dropped: they cancel exactly in training-mode BatchNorm.
    return (w1, bs[0],
            w2, g2, be2,
            w3, g3, be3,
            w4, g4, be4,
            w5, b5)


def generator_forward(z, params):
    B = z.shape[0]
    const = lambda j: (0, 0)    # resident across the final-layer grid axis
    tiled = lambda j: (0, j)    # walks the padded output columns

    grid_spec = pltpu.PrefetchScalarGridSpec(
        num_scalar_prefetch=0,
        grid=(OUT_PAD // TILE_N,),
        in_specs=[
            pl.BlockSpec((B, LATENT_DIM), const),        # z
            pl.BlockSpec((LATENT_DIM, 128), const),      # w1
            pl.BlockSpec((1, 128), const),               # b1
            pl.BlockSpec((128, 256), const),             # w2
            pl.BlockSpec((1, 256), const),               # gamma2
            pl.BlockSpec((1, 256), const),               # beta2
            pl.BlockSpec((256, 512), const),             # w3
            pl.BlockSpec((1, 512), const),               # gamma3
            pl.BlockSpec((1, 512), const),               # beta3
            pl.BlockSpec((512, 1024), const),            # w4
            pl.BlockSpec((1, 1024), const),              # gamma4
            pl.BlockSpec((1, 1024), const),              # beta4
            pl.BlockSpec((1024, TILE_N), tiled),         # w5 (double-buffered)
            pl.BlockSpec((1, TILE_N), tiled),            # b5
        ],
        out_specs=pl.BlockSpec((B, TILE_N), tiled),
        scratch_shapes=[pltpu.VMEM((B, HIDDEN[-1]), jnp.bfloat16)],  # h4 trunk output
    )

    flat = pl.pallas_call(
        generator_kernel,
        out_shape=jax.ShapeDtypeStruct((B, OUT_PAD), jnp.float32),
        grid_spec=grid_spec,
        compiler_params=pltpu.CompilerParams(
            dimension_semantics=("arbitrary",),      # sequential pipelining axis
            vmem_limit_bytes=32 * 1024 * 1024,       # fits v7x's 64 MiB physical VMEM
        ),
    )(z, *params)

    # Drop the zero-padded columns and reshape exactly like img.view(B, 3, 25, 25).
    return flat[:, :OUT_DIM].reshape(B, *IMG_SHAPE)


if __name__ == "__main__":
    key = jax.random.PRNGKey(0)
    k_z, k_p = jax.random.split(key)

    batch = 8  # BatchNorm (training-mode) needs batch > 1; 8 = one sublane tile
    z = jax.random.normal(k_z, (batch, LATENT_DIM), dtype=jnp.float32)
    params = init_params(k_p)

    img = generator_forward(z, params)
    img = jax.block_until_ready(img)

    assert img.shape == (batch, *IMG_SHAPE), img.shape
    assert bool(jnp.all(jnp.isfinite(img)))
    print("KERNEL_OK")
</pallas_src>

<mosaic_0001>
module attributes {stable_mosaic.version = 11 : i64} {
  func.func @generator_kernel(%arg0: i32, %arg1: memref<8x100xf32, #tpu.memory_space<vmem>>, %arg2: memref<100x128xbf16, #tpu.memory_space<vmem>>, %arg3: memref<1x128xf32, #tpu.memory_space<vmem>>, %arg4: memref<128x256xbf16, #tpu.memory_space<vmem>>, %arg5: memref<1x256xf32, #tpu.memory_space<vmem>>, %arg6: memref<1x256xf32, #tpu.memory_space<vmem>>, %arg7: memref<256x512xbf16, #tpu.memory_space<vmem>>, %arg8: memref<1x512xf32, #tpu.memory_space<vmem>>, %arg9: memref<1x512xf32, #tpu.memory_space<vmem>>, %arg10: memref<512x1024xbf16, #tpu.memory_space<vmem>>, %arg11: memref<1x1024xf32, #tpu.memory_space<vmem>>, %arg12: memref<1x1024xf32, #tpu.memory_space<vmem>>, %arg13: memref<1024x640xbf16, #tpu.memory_space<vmem>>, %arg14: memref<1x640xf32, #tpu.memory_space<vmem>>, %arg15: memref<8x640xf32, #tpu.memory_space<vmem>>, %arg16: memref<8x1024xbf16, #tpu.memory_space<vmem>>) attributes {dimension_semantics = [#tpu.dimension_semantics<arbitrary>], iteration_bounds = array<i64: 3>, scalar_prefetch = 0 : i64, scratch_operands = 1 : i64, tpu.core_type = #tpu.core_type<tc>, window_params = [{pipeline_mode = #tpu.pipeline_mode<synchronous>, transform_indices = @transform_0, window_bounds = array<i64: 8, 100>}, {pipeline_mode = #tpu.pipeline_mode<synchronous>, transform_indices = @transform_1, window_bounds = array<i64: 100, 128>}, {pipeline_mode = #tpu.pipeline_mode<synchronous>, transform_indices = @transform_2, window_bounds = array<i64: 1, 128>}, {pipeline_mode = #tpu.pipeline_mode<synchronous>, transform_indices = @transform_3, window_bounds = array<i64: 128, 256>}, {pipeline_mode = #tpu.pipeline_mode<synchronous>, transform_indices = @transform_4, window_bounds = array<i64: 1, 256>}, {pipeline_mode = #tpu.pipeline_mode<synchronous>, transform_indices = @transform_5, window_bounds = array<i64: 1, 256>}, {pipeline_mode = #tpu.pipeline_mode<synchronous>, transform_indices = @transform_6, window_bounds = array<i64: 256, 512>}, {pipeline_mode = #tpu.pipeline_mode<synchronous>, transform_indices = @transform_7, window_bounds = array<i64: 1, 512>}, {pipeline_mode = #tpu.pipeline_mode<synchronous>, transform_indices = @transform_8, window_bounds = array<i64: 1, 512>}, {pipeline_mode = #tpu.pipeline_mode<synchronous>, transform_indices = @transform_9, window_bounds = array<i64: 512, 1024>}, {pipeline_mode = #tpu.pipeline_mode<synchronous>, transform_indices = @transform_10, window_bounds = array<i64: 1, 1024>}, {pipeline_mode = #tpu.pipeline_mode<synchronous>, transform_indices = @transform_11, window_bounds = array<i64: 1, 1024>}, {transform_indices = @transform_12, window_bounds = array<i64: 1024, 640>}, {transform_indices = @transform_13, window_bounds = array<i64: 1, 640>}, {transform_indices = @transform_14, window_bounds = array<i64: 8, 640>}]} {
    %c0_i32 = arith.constant 0 : i32
    %0 = arith.cmpi eq, %arg0, %c0_i32 : i32
    %1 = arith.extui %0 : i1 to i32
    %c0_i32_0 = arith.constant 0 : i32
    %2 = arith.cmpi ne, %1, %c0_i32_0 : i32
    scf.if %2 {
      %c0_8 = arith.constant 0 : index
      %c0_9 = arith.constant 0 : index
      %11 = vector.load %arg1[%c0_8, %c0_9] : memref<8x100xf32, #tpu.memory_space<vmem>>, vector<8x100xf32>
      %12 = arith.truncf %11 : vector<8x100xf32> to vector<8x100xbf16>
      %c0_10 = arith.constant 0 : index
      %c0_11 = arith.constant 0 : index
      %13 = vector.load %arg2[%c0_10, %c0_11] : memref<100x128xbf16, #tpu.memory_space<vmem>>, vector<100x128xbf16>
      %cst_12 = arith.constant dense<0.000000e+00> : vector<8x128xf32>
      %14 = tpu.matmul %12, %13, %cst_12 {dimension_numbers = #tpu.dot_dimension_numbers<[1], [0], [0], [1], [0, 0, 1, 1], [], []>} : vector<8x100xbf16>, vector<100x128xbf16>, vector<8x128xf32> -> vector<8x128xf32>
      %c0_13 = arith.constant 0 : index
      %c0_14 = arith.constant 0 : index
      %15 = vector.load %arg3[%c0_13, %c0_14] : memref<1x128xf32, #tpu.memory_space<vmem>>, vector<1x128xf32>
      %16 = vector.broadcast %15 : vector<1x128xf32> to vector<8x128xf32>
      %17 = arith.addf %14, %16 : vector<8x128xf32>
      %cst_15 = arith.constant 0.000000e+00 : f32
      %18 = vector.broadcast %cst_15 : f32 to vector<8x128xf32>
      %19 = arith.cmpf ogt, %17, %18 : vector<8x128xf32>
      %cst_16 = arith.constant 2.000000e-01 : f32
      %20 = vector.broadcast %cst_16 : f32 to vector<8x128xf32>
      %21 = arith.mulf %20, %17 : vector<8x128xf32>
      %22 = arith.select %19, %17, %21 : vector<8x128xi1>, vector<8x128xf32>
      %23 = arith.truncf %22 : vector<8x128xf32> to vector<8x128xbf16>
      %c0_17 = arith.constant 0 : index
      %c0_18 = arith.constant 0 : index
      %24 = vector.load %arg4[%c0_17, %c0_18] : memref<128x256xbf16, #tpu.memory_space<vmem>>, vector<128x256xbf16>
      %cst_19 = arith.constant dense<0.000000e+00> : vector<8x256xf32>
      %25 = tpu.matmul %23, %24, %cst_19 {dimension_numbers = #tpu.dot_dimension_numbers<[1], [0], [0], [1], [0, 0, 1, 1], [], []>} : vector<8x128xbf16>, vector<128x256xbf16>, vector<8x256xf32> -> vector<8x256xf32>
      %c0_20 = arith.constant 0 : index
      %c0_21 = arith.constant 0 : index
      %26 = vector.load %arg5[%c0_20, %c0_21] : memref<1x256xf32, #tpu.memory_space<vmem>>, vector<1x256xf32>
      %c0_22 = arith.constant 0 : index
      %c0_23 = arith.constant 0 : index
      %27 = vector.load %arg6[%c0_22, %c0_23] : memref<1x256xf32, #tpu.memory_space<vmem>>, vector<1x256xf32>
      %cst_24 = arith.constant dense<0.000000e+00> : vector<256xf32>
      %28 = vector.multi_reduction <add>, %25, %cst_24 [0] : vector<8x256xf32> to vector<256xf32>
      %29 = vector.shape_cast %28 : vector<256xf32> to vector<1x256xf32>
      %cst_25 = arith.constant 8.000000e+00 : f32
      %30 = vector.broadcast %cst_25 : f32 to vector<1x256xf32>
      %31 = arith.divf %29, %30 : vector<1x256xf32>
      %32 = arith.mulf %25, %25 : vector<8x256xf32>
      %cst_26 = arith.constant dense<0.000000e+00> : vector<256xf32>
      %33 = vector.multi_reduction <add>, %32, %cst_26 [0] : vector<8x256xf32> to vector<256xf32>
      %34 = vector.shape_cast %33 : vector<256xf32> to vector<1x256xf32>
      %cst_27 = arith.constant 8.000000e+00 : f32
      %35 = vector.broadcast %cst_27 : f32 to vector<1x256xf32>
      %36 = arith.divf %34, %35 : vector<1x256xf32>
      %37 = arith.mulf %31, %31 : vector<1x256xf32>
      %38 = arith.subf %36, %37 : vector<1x256xf32>
      %cst_28 = arith.constant 0.000000e+00 : f32
      %39 = vector.broadcast %cst_28 : f32 to vector<1x256xf32>
      %40 = arith.maximumf %38, %39 : vector<1x256xf32>
      %41 = vector.broadcast %31 : vector<1x256xf32> to vector<8x256xf32>
      %42 = arith.subf %25, %41 : vector<8x256xf32>
      %cst_29 = arith.constant 8.000000e-01 : f32
      %43 = vector.broadcast %cst_29 : f32 to vector<1x256xf32>
      %44 = arith.addf %40, %43 : vector<1x256xf32>
      %45 = math.rsqrt %44 : vector<1x256xf32>
      %46 = vector.broadcast %45 : vector<1x256xf32> to vector<8x256xf32>
      %47 = arith.mulf %42, %46 : vector<8x256xf32>
      %48 = vector.broadcast %26 : vector<1x256xf32> to vector<8x256xf32>
      %49 = arith.mulf %47, %48 : vector<8x256xf32>
      %50 = vector.broadcast %27 : vector<1x256xf32> to vector<8x256xf32>
      %51 = arith.addf %49, %50 : vector<8x256xf32>
      %cst_30 = arith.constant 0.000000e+00 : f32
      %52 = vector.broadcast %cst_30 : f32 to vector<8x256xf32>
      %53 = arith.cmpf ogt, %51, %52 : vector<8x256xf32>
      %cst_31 = arith.constant 2.000000e-01 : f32
      %54 = vector.broadcast %cst_31 : f32 to vector<8x256xf32>
      %55 = arith.mulf %54, %51 : vector<8x256xf32>
      %56 = arith.select %53, %51, %55 : vector<8x256xi1>, vector<8x256xf32>
      %57 = arith.truncf %56 : vector<8x256xf32> to vector<8x256xbf16>
      %c0_32 = arith.constant 0 : index
      %c0_33 = arith.constant 0 : index
      %58 = vector.load %arg7[%c0_32, %c0_33] : memref<256x512xbf16, #tpu.memory_space<vmem>>, vector<256x512xbf16>
      %cst_34 = arith.constant dense<0.000000e+00> : vector<8x512xf32>
      %59 = tpu.matmul %57, %58, %cst_34 {dimension_numbers = #tpu.dot_dimension_numbers<[1], [0], [0], [1], [0, 0, 1, 1], [], []>} : vector<8x256xbf16>, vector<256x512xbf16>, vector<8x512xf32> -> vector<8x512xf32>
      %c0_35 = arith.constant 0 : index
      %c0_36 = arith.constant 0 : index
      %60 = vector.load %arg8[%c0_35, %c0_36] : memref<1x512xf32, #tpu.memory_space<vmem>>, vector<1x512xf32>
      %c0_37 = arith.constant 0 : index
      %c0_38 = arith.constant 0 : index
      %61 = vector.load %arg9[%c0_37, %c0_38] : memref<1x512xf32, #tpu.memory_space<vmem>>, vector<1x512xf32>
      %cst_39 = arith.constant dense<0.000000e+00> : vector<512xf32>
      %62 = vector.multi_reduction <add>, %59, %cst_39 [0] : vector<8x512xf32> to vector<512xf32>
      %63 = vector.shape_cast %62 : vector<512xf32> to vector<1x512xf32>
      %cst_40 = arith.constant 8.000000e+00 : f32
      %64 = vector.broadcast %cst_40 : f32 to vector<1x512xf32>
      %65 = arith.divf %63, %64 : vector<1x512xf32>
      %66 = arith.mulf %59, %59 : vector<8x512xf32>
      %cst_41 = arith.constant dense<0.000000e+00> : vector<512xf32>
      %67 = vector.multi_reduction <add>, %66, %cst_41 [0] : vector<8x512xf32> to vector<512xf32>
      %68 = vector.shape_cast %67 : vector<512xf32> to vector<1x512xf32>
      %cst_42 = arith.constant 8.000000e+00 : f32
      %69 = vector.broadcast %cst_42 : f32 to vector<1x512xf32>
      %70 = arith.divf %68, %69 : vector<1x512xf32>
      %71 = arith.mulf %65, %65 : vector<1x512xf32>
      %72 = arith.subf %70, %71 : vector<1x512xf32>
      %cst_43 = arith.constant 0.000000e+00 : f32
      %73 = vector.broadcast %cst_43 : f32 to vector<1x512xf32>
      %74 = arith.maximumf %72, %73 : vector<1x512xf32>
      %75 = vector.broadcast %65 : vector<1x512xf32> to vector<8x512xf32>
      %76 = arith.subf %59, %75 : vector<8x512xf32>
      %cst_44 = arith.constant 8.000000e-01 : f32
      %77 = vector.broadcast %cst_44 : f32 to vector<1x512xf32>
      %78 = arith.addf %74, %77 : vector<1x512xf32>
      %79 = math.rsqrt %78 : vector<1x512xf32>
      %80 = vector.broadcast %79 : vector<1x512xf32> to vector<8x512xf32>
      %81 = arith.mulf %76, %80 : vector<8x512xf32>
      %82 = vector.broadcast %60 : vector<1x512xf32> to vector<8x512xf32>
      %83 = arith.mulf %81, %82 : vector<8x512xf32>
      %84 = vector.broadcast %61 : vector<1x512xf32> to vector<8x512xf32>
      %85 = arith.addf %83, %84 : vector<8x512xf32>
      %cst_45 = arith.constant 0.000000e+00 : f32
      %86 = vector.broadcast %cst_45 : f32 to vector<8x512xf32>
      %87 = arith.cmpf ogt, %85, %86 : vector<8x512xf32>
      %cst_46 = arith.constant 2.000000e-01 : f32
      %88 = vector.broadcast %cst_46 : f32 to vector<8x512xf32>
      %89 = arith.mulf %88, %85 : vector<8x512xf32>
      %90 = arith.select %87, %85, %89 : vector<8x512xi1>, vector<8x512xf32>
      %91 = arith.truncf %90 : vector<8x512xf32> to vector<8x512xbf16>
      %c0_47 = arith.constant 0 : index
      %c0_48 = arith.constant 0 : index
      %92 = vector.load %arg10[%c0_47, %c0_48] : memref<512x1024xbf16, #tpu.memory_space<vmem>>, vector<512x1024xbf16>
      %cst_49 = arith.constant dense<0.000000e+00> : vector<8x1024xf32>
      %93 = tpu.matmul %91, %92, %cst_49 {dimension_numbers = #tpu.dot_dimension_numbers<[1], [0], [0], [1], [0, 0, 1, 1], [], []>} : vector<8x512xbf16>, vector<512x1024xbf16>, vector<8x1024xf32> -> vector<8x1024xf32>
      %c0_50 = arith.constant 0 : index
      %c0_51 = arith.constant 0 : index
      %94 = vector.load %arg11[%c0_50, %c0_51] : memref<1x1024xf32, #tpu.memory_space<vmem>>, vector<1x1024xf32>
      %c0_52 = arith.constant 0 : index
      %c0_53 = arith.constant 0 : index
      %95 = vector.load %arg12[%c0_52, %c0_53] : memref<1x1024xf32, #tpu.memory_space<vmem>>, vector<1x1024xf32>
      %cst_54 = arith.constant dense<0.000000e+00> : vector<1024xf32>
      %96 = vector.multi_reduction <add>, %93, %cst_54 [0] : vector<8x1024xf32> to vector<1024xf32>
      %97 = vector.shape_cast %96 : vector<1024xf32> to vector<1x1024xf32>
      %cst_55 = arith.constant 8.000000e+00 : f32
      %98 = vector.broadcast %cst_55 : f32 to vector<1x1024xf32>
      %99 = arith.divf %97, %98 : vector<1x1024xf32>
      %100 = arith.mulf %93, %93 : vector<8x1024xf32>
      %cst_56 = arith.constant dense<0.000000e+00> : vector<1024xf32>
      %101 = vector.multi_reduction <add>, %100, %cst_56 [0] : vector<8x1024xf32> to vector<1024xf32>
      %102 = vector.shape_cast %101 : vector<1024xf32> to vector<1x1024xf32>
      %cst_57 = arith.constant 8.000000e+00 : f32
      %103 = vector.broadcast %cst_57 : f32 to vector<1x1024xf32>
      %104 = arith.divf %102, %103 : vector<1x1024xf32>
      %105 = arith.mulf %99, %99 : vector<1x1024xf32>
      %106 = arith.subf %104, %105 : vector<1x1024xf32>
      %cst_58 = arith.constant 0.000000e+00 : f32
      %107 = vector.broadcast %cst_58 : f32 to vector<1x1024xf32>
      %108 = arith.maximumf %106, %107 : vector<1x1024xf32>
      %109 = vector.broadcast %99 : vector<1x1024xf32> to vector<8x1024xf32>
      %110 = arith.subf %93, %109 : vector<8x1024xf32>
      %cst_59 = arith.constant 8.000000e-01 : f32
      %111 = vector.broadcast %cst_59 : f32 to vector<1x1024xf32>
      %112 = arith.addf %108, %111 : vector<1x1024xf32>
      %113 = math.rsqrt %112 : vector<1x1024xf32>
      %114 = vector.broadcast %113 : vector<1x1024xf32> to vector<8x1024xf32>
      %115 = arith.mulf %110, %114 : vector<8x1024xf32>
      %116 = vector.broadcast %94 : vector<1x1024xf32> to vector<8x1024xf32>
      %117 = arith.mulf %115, %116 : vector<8x1024xf32>
      %118 = vector.broadcast %95 : vector<1x1024xf32> to vector<8x1024xf32>
      %119 = arith.addf %117, %118 : vector<8x1024xf32>
      %cst_60 = arith.constant 0.000000e+00 : f32
      %120 = vector.broadcast %cst_60 : f32 to vector<8x1024xf32>
      %121 = arith.cmpf ogt, %119, %120 : vector<8x1024xf32>
      %cst_61 = arith.constant 2.000000e-01 : f32
      %122 = vector.broadcast %cst_61 : f32 to vector<8x1024xf32>
      %123 = arith.mulf %122, %119 : vector<8x1024xf32>
      %124 = arith.select %121, %119, %123 : vector<8x1024xi1>, vector<8x1024xf32>
      %125 = arith.truncf %124 : vector<8x1024xf32> to vector<8x1024xbf16>
      %c0_62 = arith.constant 0 : index
      %c0_63 = arith.constant 0 : index
      %126 = vector.load %arg16[%c0_62, %c0_63] : memref<8x1024xbf16, #tpu.memory_space<vmem>>, vector<8x1024xbf16>
      tpu.vector_store %arg16[%c0_62, %c0_63], %125 {strides = array<i32>} : memref<8x1024xbf16, #tpu.memory_space<vmem>>, vector<8x1024xbf16>,
    } else {
    }
    %c0 = arith.constant 0 : index
    %c0_1 = arith.constant 0 : index
    %3 = vector.load %arg16[%c0, %c0_1] : memref<8x1024xbf16, #tpu.memory_space<vmem>>, vector<8x1024xbf16>
    %c0_2 = arith.constant 0 : index
    %c0_3 = arith.constant 0 : index
    %4 = vector.load %arg13[%c0_2, %c0_3] : memref<1024x640xbf16, #tpu.memory_space<vmem>>, vector<1024x640xbf16>
    %cst = arith.constant dense<0.000000e+00> : vector<8x640xf32>
    %5 = tpu.matmul %3, %4, %cst {dimension_numbers = #tpu.dot_dimension_numbers<[1], [0], [0], [1], [0, 0, 1, 1], [], []>} : vector<8x1024xbf16>, vector<1024x640xbf16>, vector<8x640xf32> -> vector<8x640xf32>
    %c0_4 = arith.constant 0 : index
    %c0_5 = arith.constant 0 : index
    %6 = vector.load %arg14[%c0_4, %c0_5] : memref<1x640xf32, #tpu.memory_space<vmem>>, vector<1x640xf32>
    %7 = vector.broadcast %6 : vector<1x640xf32> to vector<8x640xf32>
    %8 = arith.addf %5, %7 : vector<8x640xf32>
    %9 = math.tanh %8 : vector<8x640xf32>
    %c0_6 = arith.constant 0 : index
    %c0_7 = arith.constant 0 : index
    %10 = vector.load %arg15[%c0_6, %c0_7] : memref<8x640xf32, #tpu.memory_space<vmem>>, vector<8x640xf32>
    tpu.vector_store %arg15[%c0_6, %c0_7], %9 {strides = array<i32>} : memref<8x640xf32, #tpu.memory_space<vmem>>, vector<8x640xf32>,
    return
  }
  func.func @transform_0(%arg0: i32) -> (i32, i32) {
    %c0_i32 = arith.constant 0 : i32
    %c0_i32_0 = arith.constant 0 : i32
    %c0_i32_1 = arith.constant 0 : i32
    return %c0_i32, %c0_i32_0 : i32, i32
  }
  func.func @transform_1(%arg0: i32) -> (i32, i32) {
    %c0_i32 = arith.constant 0 : i32
    %c0_i32_0 = arith.constant 0 : i32
    %c0_i32_1 = arith.constant 0 : i32
    return %c0_i32, %c0_i32_0 : i32, i32
  }
  func.func @transform_2(%arg0: i32) -> (i32, i32) {
    %c0_i32 = arith.constant 0 : i32
    %c0_i32_0 = arith.constant 0 : i32
    %c0_i32_1 = arith.constant 0 : i32
    return %c0_i32, %c0_i32_0 : i32, i32
  }
  func.func @transform_3(%arg0: i32) -> (i32, i32) {
    %c0_i32 = arith.constant 0 : i32
    %c0_i32_0 = arith.constant 0 : i32
    %c0_i32_1 = arith.constant 0 : i32
    return %c0_i32, %c0_i32_0 : i32, i32
  }
  func.func @transform_4(%arg0: i32) -> (i32, i32) {
    %c0_i32 = arith.constant 0 : i32
    %c0_i32_0 = arith.constant 0 : i32
    %c0_i32_1 = arith.constant 0 : i32
    return %c0_i32, %c0_i32_0 : i32, i32
  }
  func.func @transform_5(%arg0: i32) -> (i32, i32) {
    %c0_i32 = arith.constant 0 : i32
    %c0_i32_0 = arith.constant 0 : i32
    %c0_i32_1 = arith.constant 0 : i32
    return %c0_i32, %c0_i32_0 : i32, i32
  }
  func.func @transform_6(%arg0: i32) -> (i32, i32) {
    %c0_i32 = arith.constant 0 : i32
    %c0_i32_0 = arith.constant 0 : i32
    %c0_i32_1 = arith.constant 0 : i32
    return %c0_i32, %c0_i32_0 : i32, i32
  }
  func.func @transform_7(%arg0: i32) -> (i32, i32) {
    %c0_i32 = arith.constant 0 : i32
    %c0_i32_0 = arith.constant 0 : i32
    %c0_i32_1 = arith.constant 0 : i32
    return %c0_i32, %c0_i32_0 : i32, i32
  }
  func.func @transform_8(%arg0: i32) -> (i32, i32) {
    %c0_i32 = arith.constant 0 : i32
    %c0_i32_0 = arith.constant 0 : i32
    %c0_i32_1 = arith.constant 0 : i32
    return %c0_i32, %c0_i32_0 : i32, i32
  }
  func.func @transform_9(%arg0: i32) -> (i32, i32) {
    %c0_i32 = arith.constant 0 : i32
    %c0_i32_0 = arith.constant 0 : i32
    %c0_i32_1 = arith.constant 0 : i32
    return %c0_i32, %c0_i32_0 : i32, i32
  }
  func.func @transform_10(%arg0: i32) -> (i32, i32) {
    %c0_i32 = arith.constant 0 : i32
    %c0_i32_0 = arith.constant 0 : i32
    %c0_i32_1 = arith.constant 0 : i32
    return %c0_i32, %c0_i32_0 : i32, i32
  }
  func.func @transform_11(%arg0: i32) -> (i32, i32) {
    %c0_i32 = arith.constant 0 : i32
    %c0_i32_0 = arith.constant 0 : i32
    %c0_i32_1 = arith.constant 0 : i32
    return %c0_i32, %c0_i32_0 : i32, i32
  }
  func.func @transform_12(%arg0: i32) -> (i32, i32) {
    %c0_i32 = arith.constant 0 : i32
    %c0_i32_0 = arith.constant 0 : i32
    return %c0_i32, %arg0 : i32, i32
  }
  func.func @transform_13(%arg0: i32) -> (i32, i32) {
    %c0_i32 = arith.constant 0 : i32
    %c0_i32_0 = arith.constant 0 : i32
    return %c0_i32, %arg0 : i32, i32
  }
  func.func @transform_14(%arg0: i32) -> (i32, i32) {
    %c0_i32 = arith.constant 0 : i32
    %c0_i32_0 = arith.constant 0 : i32
    return %c0_i32, %arg0 : i32, i32
  }
}

</mosaic_0001>

<bundles_post_ra>
// kernel: tpu_custom_call.1
= control target key start
LH: loop header
LB: loop body
LE: loop exit
PB: predicated region body
PF: predicated region fallthrough
CT: control target
= control target key end

     0   :  { %s10027_s0 = inlined_call_operand.hbm [shape: f32[8,100], index: 0, kind: input, shape index: {}]   ;;  %s10028_s1 = inlined_call_operand.hbm [shape: bf16[100,128], index: 1, kind: input, shape index: {}]   ;;  %s10029_s2 = inlined_call_operand.hbm [shape: f32[1,128], index: 2, kind: input, shape index: {}]   ;;  %s10030_s3 = inlined_call_operand.hbm [shape: bf16[128,256], index: 3, kind: input, shape index: {}]   ;;  %s10031_s4 = inlined_call_operand.hbm [shape: f32[1,256], index: 4, kind: input, shape index: {}]   ;;  %s10032_s5 = inlined_call_operand.hbm [shape: f32[1,256], index: 5, kind: input, shape index: {}]   ;;  %s10033_s6 = inlined_call_operand.hbm [shape: bf16[256,512], index: 6, kind: input, shape index: {}]   ;;  %s10034_s7 = inlined_call_operand.hbm [shape: f32[1,512], index: 7, kind: input, shape index: {}]   ;;  %s10035_s8 = inlined_call_operand.hbm [shape: f32[1,512], index: 8, kind: input, shape index: {}]   ;;  %s10036_s9 = inlined_call_operand.hbm [shape: bf16[512,1024], index: 9, kind: input, shape index: {}]   ;;  %s10037_s10 = inlined_call_operand.hbm [shape: f32[1,1024], index: 10, kind: input, shape index: {}]   ;;  %s10038_s11 = inlined_call_operand.hbm [shape: f32[1,1024], index: 11, kind: input, shape index: {}]   ;;  %s10039_s12 = inlined_call_operand.hbm [shape: bf16[1024,1920], index: 12, kind: input, shape index: {}]   ;;  %s10040_s13 = inlined_call_operand.hbm [shape: f32[1,1920], index: 13, kind: input, shape index: {}]   ;;  %s10041_s14 = inlined_call_operand.hbm [shape: f32[8,1920], index: 14, kind: output, shape index: {}]  }
   0x1   :  { %10060 = sst [smem:[#allocation38_spill]] %s10027_s0 }
   0x2   :  { %10061 = sst [smem:[#allocation39_spill]] %s10028_s1 }
   0x3   :  { %10062 = sst [smem:[#allocation40_spill]] %s10030_s3 }
   0x4   :  { %10063 = sst [smem:[#allocation41_spill]] %s10032_s5 }
   0x5   :  { %10064 = sst [smem:[#allocation42_spill]] %s10034_s7 }
   0x6   :  { %10065 = sst [smem:[#allocation43_spill]] %s10035_s8 }
   0x7   :  { %10066 = sst [smem:[#allocation44_spill]] %s10036_s9 }
   0x8   :  { %10067 = sst [smem:[#allocation45_spill]] %s10037_s10 }
   0x9   :  { %10068 = sst [smem:[#allocation46_spill]] %s10038_s11 }
   0xa   :  { %10069 = sst [smem:[#allocation47_spill]] %s10039_s12 }
   0xb   :  { %10070 = sst [smem:[#allocation48_spill]] %s10040_s13 }
   0xc   :  { %10071 = sst [smem:[#allocation49_spill]] %s10041_s14 }
   0xd   :  { %19 = vsyncpa [#allocation4], 0 }
   0xe   :  { %20 = vsyncpa [#allocation7], 0 }
   0xf   :  { %21 = vsyncpa [#allocation10], 0 }
  0x10   :  { %22 = vsyncpa [#allocation13], 0 }
  0x11   :  { %23 = vsyncpa [#allocation16], 0 }
  0x12   :  { %24 = vsyncpa [#allocation19], 0 }
  0x13   :  { %25 = vsyncpa [#allocation22], 0 }
  0x14   :  { %26 = vsyncpa [#allocation5], 0 }
  0x15   :  { %28 = vsyncpa [#allocation5 + $0x1], 0  ;;  %s8946_s29 = smov 0   ;;  %s8948_s30 = smov 0  }
  0x16   :  { %s8950_s15 = smov 0   ;;  %s8952_s16 = smov 0  }
  0x17 LB: > { %s8842_s17 = smov [#allocation3]   ;;  %s8967_s19 = sadd.s32 4294967295, %s8840_s16   ;;  %s8840_s16 = sphi %s8952_s16, %s10120_s16   ;;  %s8836_s15 = sphi %s8950_s15, %s10124_s15   ;;  %s8832_s30 = sphi %s8948_s30, %s10123_s30   ;;  %s8828_s29 = sphi %s8946_s29, %s10122_s29  }
  0x18   : > { %s382_s18 = sshll.u32 %s8842_s17, 4  ;;  %p6663_p0 = scmp.ge.s32.totalorder %s8840_s16, 1  ;;  %s383_s18 = int_to_ptr.vmem [resolvable:$true] %s382_s18 }
  0x19   : > { %p10044_p1 = scmp.eq.s32.totalorder %s8967_s19, 0  ;;  %p369_p2 = scmp.lt.s32.totalorder %s8840_s16, 4 }
  0x1a   : > { %s8843_s21 = smov [#allocation6]   ;;  %s8844_s24 = smov [#allocation9]  }
  0x1b   : > { %p8973_p4 = pnand %p6663_p0, %p369_p2  ;;  %s392_s22 = sshll.u32 %s8843_s21, 4  ;;  %s8979_s22 = int_to_ptr.vmem [resolvable:$true] %s392_s22 }
  0x1c   : > { %s416_s25 = sshll.u32 %s8844_s24, 4  ;;  %s10075_s0 = sld [smem:[#allocation38_spill]]  ;;  %s8987_s25 = int_to_ptr.vmem [resolvable:$true] %s416_s25 }
  0x1d   : > { %s10072_s20 = scalar_select %p8973_p4, 1, 0 }
  0x1e   : > { %p7597_p5 = pneg %p8973_p4 }
  0x1f   : > { %10073 = sst [smem:[#allocation35_spill]] %s10072_s20 }
  0x20   : > { %p8983_p6 = pnand %p7597_p5, %p10044_p1 }
  0x22   : > { %s10074_s23 = scalar_select %p8983_p6, 1, 0 }
  0x23   : > { %s8350_s28 = scalar_lea.hbm %s10075_s0, 128  ;;  %p8997_p8 = pneg %p8983_p6 }
  0x24   : > { %p8351_p7 = scmp.ne.s32.totalorder %s10075_s0, %s8350_s28  ;;  %p8357_p11 = scmp.lt.u32.totalorder %s8350_s28, %s10075_s0 }
  0x26   : > { %p8353_p9 = pnand %p8997_p8, %p8351_p7 }
  0x28   : > { %p8354_p10 = pneg %p8353_p9 }
  0x2a   : > { %p8359_p12 = pnand %p8357_p11, %p8354_p10 }
  0x2c   : > { %8362 = shalt.err (!%p8359_p12)
}
  0x2d   : > { %s8363_s26 = scalar_lea.vmem %s383_s18, 128  ;;  %p8371_p5 = scmp.lt.s32.totalorder %s383_s18, %s383_s18 }
  0x2e   : > { %p8364_p13 = scmp.ne.s32.totalorder %s383_s18, %s8363_s26  ;;  %p8372_p3 = scmp.lt.s32.totalorder %s8363_s26, %s8363_s26 }
  0x30   : > { %p8366_p0 = pnand %p8364_p13, %p8997_p8  ;;  %p8373_p1 = por %p8372_p3, %p8371_p5 }
  0x32   : > { %p8367_p2 = pneg %p8366_p0 }
  0x34   : > { %p8374_p4 = pnand %p8373_p1, %p8367_p2 }
  0x36   : > { %8377 = shalt.err (!%p8374_p4)
}
  0x37   : > { %7600 = dma.hbm_to_vmem [thread:$0]  (!%p8983_p6), %s10075_s0, 128, %s383_s18, [#allocation4]  }
  0x38   : > { %s10077_s1 = sld [smem:[#allocation39_spill]] }
  0x3e   : > { %s8378_s17 = scalar_lea.hbm %s10077_s1, 832 }
  0x3f   : > { %p8379_p7 = scmp.ne.s32.totalorder %s10077_s1, %s8378_s17  ;;  %p8385_p1 = scmp.lt.u32.totalorder %s8378_s17, %s10077_s1 }
  0x41   : > { %p8381_p9 = pnand %p8379_p7, %p8997_p8 }
  0x43   : > { %p8382_p3 = pneg %p8381_p9 }
  0x45   : > { %p8387_p4 = pnand %p8385_p1, %p8382_p3 }
  0x47   : > { %8390 = shalt.err (!%p8387_p4)
}
  0x48   : > { %s8391_s18 = scalar_lea.vmem %s8979_s22, 832  ;;  %p8399_p13 = scmp.lt.s32.totalorder %s8979_s22, %s8979_s22 }
  0x49   : > { %p8392_p10 = scmp.ne.s32.totalorder %s8979_s22, %s8391_s18  ;;  %p8400_p0 = scmp.lt.s32.totalorder %s8391_s18, %s8391_s18 }
  0x4b   : > { %p8394_p11 = pnand %p8392_p10, %p8997_p8  ;;  %p8401_p2 = por %p8400_p0, %p8399_p13 }
  0x4d   : > { %p8395_p12 = pneg %p8394_p11 }
  0x4f   : > { %p8402_p5 = pnand %p8401_p2, %p8395_p12 }
  0x51   : > { %8405 = shalt.err (!%p8402_p5)
}
  0x52   : > { %s8845_s13 = smov 64   ;;  %s8846_s11 = smov 4  }
  0x53   : > { %7603 = dma.hbm_to_vmem [thread:$0]  (!%p8983_p6), %s10077_s1, 832, %s8979_s22, [#allocation7], %s8845_s13, %s8845_s13, %s8846_s11  }
  0x54   : > { %s10078_s3 = sld [smem:[#allocation40_spill]] }
  0x5a   : > { %s8406_s17 = scalar_lea.hbm %s10078_s3, 2048 }
  0x5b   : > { %p8407_p7 = scmp.ne.s32.totalorder %s10078_s3, %s8406_s17  ;;  %p8413_p1 = scmp.lt.u32.totalorder %s8406_s17, %s10078_s3 }
  0x5d   : > { %p8409_p9 = pnand %p8407_p7, %p8997_p8 }
  0x5f   : > { %p8410_p3 = pneg %p8409_p9 }
  0x61   : > { %p8415_p4 = pnand %p8413_p1, %p8410_p3 }
  0x63   : > { %8418 = shalt.err (!%p8415_p4)
}
  0x64   : > { %s8419_s22 = scalar_lea.vmem %s8987_s25, 2048  ;;  %p8427_p13 = scmp.lt.s32.totalorder %s8987_s25, %s8987_s25 }
  0x65   : > { %p8420_p10 = scmp.ne.s32.totalorder %s8987_s25, %s8419_s22  ;;  %p8428_p0 = scmp.lt.s32.totalorder %s8419_s22, %s8419_s22 }
  0x67   : > { %p8422_p11 = pnand %p8420_p10, %p8997_p8  ;;  %p8429_p2 = por %p8428_p0, %p8427_p13 }
  0x69   : > { %p8423_p12 = pneg %p8422_p11 }
  0x6b   : > { %p8430_p5 = pnand %p8429_p2, %p8423_p12 }
  0x6d   : > { %8433 = shalt.err (!%p8430_p5)
}
  0x6e   : > { %s8847_s13 = smov 128   ;;  %s8848_s0 = smov 8  }
  0x6f   : > { %7609 = dma.hbm_to_vmem [thread:$0]  (!%p8983_p6), %s10078_s3, 2048, %s8987_s25, [#allocation10], %s8847_s13, %s8847_s13, %s8848_s0  }
  0x70   : > { %s8849_s27 = smov [#allocation12]   ;;  %s8850_s28 = smov [#allocation15]  }
  0x71   : > { %s441_s20 = sshll.u32 %s8849_s27, 4  ;;  %s465_s17 = sshll.u32 %s8850_s28, 4  ;;  %s442_s20 = int_to_ptr.vmem [resolvable:$true] %s441_s20  ;;  %s466_s17 = int_to_ptr.vmem [resolvable:$true] %s465_s17 }
  0x72   : > { %s10079_s5 = sld [smem:[#allocation41_spill]] }
  0x78   : > { %s8434_s18 = scalar_lea.hbm %s10079_s5, 32 }
  0x79   : > { %p8435_p7 = scmp.ne.s32.totalorder %s10079_s5, %s8434_s18  ;;  %p8441_p1 = scmp.lt.u32.totalorder %s8434_s18, %s10079_s5 }
  0x7b   : > { %p8437_p9 = pnand %p8435_p7, %p8997_p8 }
  0x7d   : > { %p8438_p3 = pneg %p8437_p9 }
  0x7f   : > { %p8443_p4 = pnand %p8441_p1, %p8438_p3 }
  0x81   : > { %8446 = shalt.err (!%p8443_p4)
}
  0x82   : > { %s8447_s25 = scalar_lea.vmem %s442_s20, 32  ;;  %p8455_p13 = scmp.lt.s32.totalorder %s442_s20, %s442_s20 }
  0x83   : > { %p8448_p10 = scmp.ne.s32.totalorder %s442_s20, %s8447_s25  ;;  %p8456_p0 = scmp.lt.s32.totalorder %s8447_s25, %s8447_s25 }
  0x85   : > { %p8450_p11 = pnand %p8448_p10, %p8997_p8  ;;  %p8457_p2 = por %p8456_p0, %p8455_p13 }
  0x87   : > { %p8451_p12 = pneg %p8450_p11 }
  0x89   : > { %p8458_p5 = pnand %p8457_p2, %p8451_p12 }
  0x8b   : > { %8461 = shalt.err (!%p8458_p5)
}
  0x8c   : > { %7615 = dma.hbm_to_vmem [thread:$0]  (!%p8983_p6), %s10079_s5, 32, %s442_s20, [#allocation13]  }
  0x8d   : > { %s10080_s7 = sld [smem:[#allocation42_spill]] }
  0x93   : > { %s8462_s0 = scalar_lea.hbm %s10080_s7, 64 }
  0x94   : > { %p8463_p7 = scmp.ne.s32.totalorder %s10080_s7, %s8462_s0  ;;  %p8469_p1 = scmp.lt.u32.totalorder %s8462_s0, %s10080_s7 }
  0x96   : > { %p8465_p9 = pnand %p8463_p7, %p8997_p8 }
  0x98   : > { %p8466_p3 = pneg %p8465_p9 }
  0x9a   : > { %p8471_p4 = pnand %p8469_p1, %p8466_p3 }
  0x9c   : > { %8474 = shalt.err (!%p8471_p4)
}
  0x9d   : > { %s8475_s24 = scalar_lea.vmem %s466_s17, 64  ;;  %p8483_p13 = scmp.lt.s32.totalorder %s466_s17, %s466_s17 }
  0x9e   : > { %p8476_p10 = scmp.ne.s32.totalorder %s466_s17, %s8475_s24  ;;  %p8484_p0 = scmp.lt.s32.totalorder %s8475_s24, %s8475_s24 }
  0xa0   : > { %p8478_p11 = pnand %p8476_p10, %p8997_p8  ;;  %p8485_p2 = por %p8484_p0, %p8483_p13 }
  0xa2   : > { %p8479_p12 = pneg %p8478_p11 }
  0xa4   : > { %p8486_p5 = pnand %p8485_p2, %p8479_p12 }
  0xa6   : > { %8489 = shalt.err (!%p8486_p5)
}
  0xa7   : > { %7621 = dma.hbm_to_vmem [thread:$0]  (!%p8983_p6), %s10080_s7, 64, %s466_s17, [#allocation16]  }
  0xa8   : > { %s8851_s18 = smov [#allocation18]   ;;  %s10081_s9 = sld [smem:[#allocation44_spill]] }
  0xa9   : > { %s486_s22 = sshll.u32 %s8851_s18, 4  ;;  %s487_s22 = int_to_ptr.vmem [resolvable:$true] %s486_s22 }
  0xae   : > { %s8490_s13 = scalar_lea.hbm %s10081_s9, 32768 }
  0xaf   : > { %p8491_p7 = scmp.ne.s32.totalorder %s10081_s9, %s8490_s13  ;;  %p8497_p1 = scmp.lt.u32.totalorder %s8490_s13, %s10081_s9 }
  0xb1   : > { %p8493_p9 = pnand %p8491_p7, %p8997_p8 }
  0xb3   : > { %p8494_p3 = pneg %p8493_p9 }
  0xb5   : > { %p8499_p4 = pnand %p8497_p1, %p8494_p3 }
  0xb7   : > { %8502 = shalt.err (!%p8499_p4)
}
  0xb8   : > { %s8503_s17 = scalar_lea.vmem %s487_s22, 32768  ;;  %p8511_p13 = scmp.lt.s32.totalorder %s487_s22, %s487_s22 }
  0xb9   : > { %p8504_p10 = scmp.ne.s32.totalorder %s487_s22, %s8503_s17  ;;  %p8512_p0 = scmp.lt.s32.totalorder %s8503_s17, %s8503_s17 }
  0xbb   : > { %p8506_p11 = pnand %p8504_p10, %p8997_p8  ;;  %p8513_p2 = por %p8512_p0, %p8511_p13 }
  0xbd   : > { %p8507_p12 = pneg %p8506_p11 }
  0xbf   : > { %p8514_p5 = pnand %p8513_p2, %p8507_p12 }
  0xc1   : > { %8517 = shalt.err (!%p8514_p5)
}
  0xc2   : > { %s8852_s14 = smov 512   ;;  %s8853_s27 = smov 32  }
  0xc3   : > { %7627 = dma.hbm_to_vmem [thread:$0]  (!%p8983_p6), %s10081_s9, 32768, %s487_s22, [#allocation19], %s8852_s14, %s8852_s14, %s8853_s27  }
  0xc4   : > { %s6662_s20 = sadd.s32 4294967294, %s8840_s16   ;;  %s9115_s26 = sadd.s32 1, %s8840_s16  }
  0xc5   : > { %10082 = sst [smem:[#allocation36_spill]] %s9115_s26  ;;  %s290_s18 = ssub.s32 %s8840_s16, %s9115_s26 }
  0xc6   : > { %s293_s25 = sadd.s32 1, %s8836_s15  ;;  %p291_p7 = scmp.eq.s32.totalorder %s290_s18, 0 }
  0xc7   : > { %p300_p9 = scmp.ne.s32.totalorder %s8836_s15, %s8832_s30  ;;  %p301_p3 = scmp.eq.s32.totalorder %s8840_s16, 0 }
  0xc8   : > { %p306_p1 = scmp.ne.s32.totalorder %s8832_s30, %s8828_s29  ;;  %p10084_p10 = scmp.eq.s32.totalorder %s8967_s19, 0 }
  0xc9   : > { %s9126_s1 = scalar_select %p291_p7, %s8836_s15, %s293_s25  }
  0xca   : > { %p302_p4 = por %p301_p3, %p300_p9  ;;  %p9130_p11 = por %p10084_p10, %p306_p1 }
  0xcb   : > { %10083 = sst [smem:[#allocation37_spill]] %s9126_s1  ;;  %p356_p12 = scmp.eq.s32.totalorder %s8967_s19, 2 }
  0xcc   : > { %s10085_s13 = scalar_select %p9130_p11, 1, 0 }
  0xcd   : > { %p362_p13 = scmp.eq.s32.totalorder %s6662_s20, 2  ;;  %p7657_p0 = scmp.lt.s32.totalorder %s8840_s16, 3 }
  0xce   : > { %s522_s22 = sand.u32 1, %s8840_s16   ;;  %p9137_p2 = por %p356_p12, %p300_p9 }
  0xcf   : > { %p9141_p5 = por %p362_p13, %p306_p1  ;;  %s10050_s0 = sand.u32 1, %s8836_s15  }
  0xd0   : > { %s10086_s8 = scalar_select %p9137_p2, 1, 0 }
  0xd1   : > { %s10087_s10 = scalar_select %p9141_p5, 1, 0 }
  0xd2   : > { %s7538_s11 = smul.u32 2560, %s10050_s0  ;;  %p9148_p7 = pnand %p7657_p0, %p302_p4 }
  0xd3   : > { %s7373_s14 = smul.u32 320, %s8840_s16  ;;  %s10089_s12 = sld [smem:[#allocation47_spill]] }
  0xd4   : > { %s10088_s17 = scalar_select %p9148_p7, 1, 0 }
  0xd5   : > { %s526_s20 = scalar_lea.vmem [#allocation23], %s7538_s11  ;;  %s9160_s25 = scalar_lea.sflag [#allocation4], %s522_s22 }
  0xd6   : > { %s533_s18 = sshll.u32 %s526_s20, 4  ;;  %p10057_p3 = pneg %p9148_p7  ;;  %s9158_s18 = int_to_ptr.vmem [resolvable:$true] %s533_s18 }
  0xd9   : > { %s9156_s24 = scalar_lea.hbm %s10089_s12, %s7373_s14  ;;  %s8523_s28 = scalar_lea.hbm %s10089_s12, 122880 }
  0xda   : > { %s8518_s0 = scalar_lea.hbm %s9156_s24, 40960  ;;  %p8524_p10 = scmp.lt.u32.totalorder %s9156_s24, %s10089_s12 }
  0xdb   : > { %p8519_p9 = scmp.ne.s32.totalorder %s9156_s24, %s8518_s0  ;;  %p8525_p12 = scmp.lt.u32.totalorder %s8523_s28, %s8518_s0 }
  0xdc   : > { %p8527_p0 = scmp.lt.u32.totalorder %s8518_s0, %s9156_s24 }
  0xdd   : > { %p8521_p1 = pnand %p10057_p3, %p8519_p9  ;;  %p8526_p13 = por %p8525_p12, %p8524_p10 }
  0xdf   : > { %p8522_p4 = pneg %p8521_p1  ;;  %p8528_p5 = por %p8527_p0, %p8526_p13 }
  0xe1   : > { %p8529_p2 = pnand %p8528_p5, %p8522_p4 }
  0xe3   : > { %8532 = shalt.err (!%p8529_p2)
}
  0xe4   : > { %s8533_s22 = scalar_lea.vmem %s9158_s18, 40960  ;;  %s8854_s11 = smov [#allocation23]  }
  0xe5   : > { %p8534_p9 = scmp.ne.s32.totalorder %s9158_s18, %s8533_s22  ;;  %s8538_s20 = sshll.u32 %s8854_s11, 4  ;;  %s8539_s20 = int_to_ptr.vmem [resolvable:$false] %s8538_s20 }
  0xe6   : > { %s8540_s3 = scalar_lea.vmem %s8539_s20, 81920  ;;  %p8541_p6 = scmp.lt.s32.totalorder %s9158_s18, %s8539_s20 }
  0xe7   : > { %p8536_p1 = pnand %p8534_p9, %p10057_p3  ;;  %p8542_p10 = scmp.lt.s32.totalorder %s8540_s3, %s8533_s22 }
  0xe9   : > { %p8537_p11 = pneg %p8536_p1  ;;  %p8543_p12 = por %p8542_p10, %p8541_p6 }
  0xeb   : > { %p8544_p13 = pnand %p8543_p12, %p8537_p11 }
  0xed   : > { %8547 = shalt.err (!%p8544_p13)
}
  0xee   : > { %s8855_s5 = smov 960   ;;  %s8856_s0 = smov 320  }
  0xef   : > { %s8857_s14 = smov 20   ;;  %s8858_s27 = smov [#allocation8]  }
  0xf0   : > { %7637 = dma.hbm_to_vmem [thread:$0]  (!%p9148_p7), %s9156_s24, 40960, %s9158_s18, %s9160_s25, %s8855_s5, %s8856_s0, %s8857_s14  }
  0xf1   : > { %s406_s28 = sshll.u32 %s8858_s27, 4  ;;  %s8859_s11 = smov [#allocation11]   ;;  %s407_s28 = int_to_ptr.vmem [resolvable:$true] %s406_s28 }
  0xf2   : > { %s430_s7 = sshll.u32 %s8859_s11, 4  ;;  %s8548_s3 = scalar_lea.hbm %s10029_s2, 16  ;;  %s431_s7 = int_to_ptr.vmem [resolvable:$true] %s430_s7 }
  0xf3   : > { %p8549_p6 = scmp.ne.s32.totalorder %s10029_s2, %s8548_s3  ;;  %p8555_p5 = scmp.lt.u32.totalorder %s8548_s3, %s10029_s2 }
  0xf5   : > { %p8551_p11 = pnand %p8549_p6, %p8997_p8 }
  0xf7   : > { %p8552_p2 = pneg %p8551_p11 }
  0xf9   : > { %p8557_p4 = pnand %p8555_p5, %p8552_p2 }
  0xfb   : > { %8560 = shalt.err (!%p8557_p4)
}
  0xfc   : > { %s8561_s24 = scalar_lea.vmem %s407_s28, 16  ;;  %s8568_s18 = scalar_lea.vmem %s407_s28, 32 }
  0xfd   : > { %p8562_p0 = scmp.ne.s32.totalorder %s407_s28, %s8561_s24  ;;  %p8569_p10 = scmp.lt.s32.totalorder %s407_s28, %s407_s28 }
  0xfe   : > { %p8570_p12 = scmp.lt.s32.totalorder %s8568_s18, %s8561_s24 }
  0xff   : > { %p8564_p9 = pnand %p8562_p0, %p8997_p8 }
 0x100   : > { %p8571_p13 = por %p8570_p12, %p8569_p10 }
 0x101   : > { %p8565_p1 = pneg %p8564_p9 }
 0x103   : > { %p8572_p3 = pnand %p8571_p13, %p8565_p1 }
 0x105   : > { %8575 = shalt.err (!%p8572_p3)
}
 0x106   : > { %p10090_p6 = scmp.ne.s32.totalorder %s10074_s23, 0  ;;  %s8576_s5 = scalar_lea.hbm %s10031_s4, 32 }
 0x107   : > { %p8577_p11 = scmp.ne.s32.totalorder %s10031_s4, %s8576_s5  ;;  %p8583_p3 = scmp.lt.u32.totalorder %s8576_s5, %s10031_s4 }
 0x108   : > { %7606 = dma.hbm_to_vmem [thread:$0]  (!%p10090_p6), %s10029_s2, 16, %s407_s28, [#allocation7]  }
 0x109   : > { %p8579_p2 = pnand %p8577_p11, %p8997_p8 }
 0x10b   : > { %p8580_p5 = pneg %p8579_p2 }
 0x10d   : > { %p8585_p4 = pnand %p8583_p3, %p8580_p5 }
 0x10f   : > { %8588 = shalt.err (!%p8585_p4)
}
 0x110   : > { %s8589_s20 = scalar_lea.vmem %s431_s7, 32  ;;  %p8597_p10 = scmp.lt.s32.totalorder %s431_s7, %s431_s7 }
 0x111   : > { %p8590_p0 = scmp.ne.s32.totalorder %s431_s7, %s8589_s20  ;;  %p8598_p12 = scmp.lt.s32.totalorder %s8589_s20, %s8589_s20 }
 0x113   : > { %p8592_p9 = pnand %p8590_p0, %p8997_p8  ;;  %p8599_p13 = por %p8598_p12, %p8597_p10 }
 0x115   : > { %p8593_p1 = pneg %p8592_p9 }
 0x117   : > { %p8600_p7 = pnand %p8599_p13, %p8593_p1 }
 0x119   : > { %8603 = shalt.err (!%p8600_p7)
}
 0x11a   : > { %7612 = dma.hbm_to_vmem [thread:$0]  (!%p10090_p6), %s10031_s4, 32, %s431_s7, [#allocation10]  }
 0x11b   : > { %s8860_s3 = smov [#allocation14]   ;;  %s8604_s12 = scalar_lea.hbm %s10033_s6, 8192 }
 0x11c   : > { %s451_s24 = sshll.u32 %s8860_s3, 4  ;;  %p8605_p11 = scmp.ne.s32.totalorder %s10033_s6, %s8604_s12  ;;  %s452_s24 = int_to_ptr.vmem [resolvable:$true] %s451_s24 }
 0x11d   : > { %p8611_p5 = scmp.lt.u32.totalorder %s8604_s12, %s10033_s6 }
 0x11e   : > { %p8607_p7 = pnand %p8605_p11, %p8997_p8 }
 0x120   : > { %p8608_p2 = pneg %p8607_p7 }
 0x122   : > { %p8613_p3 = pnand %p8611_p5, %p8608_p2 }
 0x124   : > { %8616 = shalt.err (!%p8613_p3)
}
 0x125   : > { %s8617_s7 = scalar_lea.vmem %s452_s24, 8192  ;;  %p8625_p1 = scmp.lt.s32.totalorder %s452_s24, %s452_s24 }
 0x126   : > { %p8618_p4 = scmp.ne.s32.totalorder %s452_s24, %s8617_s7  ;;  %p8626_p10 = scmp.lt.s32.totalorder %s8617_s7, %s8617_s7 }
 0x128   : > { %p8620_p0 = pnand %p8618_p4, %p8997_p8  ;;  %p8627_p12 = por %p8626_p10, %p8625_p1 }
 0x12a   : > { %p8621_p9 = pneg %p8620_p0 }
 0x12c   : > { %p8628_p13 = pnand %p8627_p12, %p8621_p9 }
 0x12e   : > { %8631 = shalt.err (!%p8628_p13)
}
 0x12f   : > { %s8861_s14 = smov 256   ;;  %s8862_s27 = smov 16  }
 0x130   : > { %7618 = dma.hbm_to_vmem [thread:$0]  (!%p10090_p6), %s10033_s6, 8192, %s452_s24, [#allocation13], %s8861_s14, %s8861_s14, %s8862_s27  }
 0x131   : > { %s8863_s28 = smov [#allocation17]   ;;  %s8864_s3 = smov [#allocation20]  }
 0x132   : > { %s476_s22 = sshll.u32 %s8863_s28, 4  ;;  %s500_s18 = sshll.u32 %s8864_s3, 4  ;;  %s477_s22 = int_to_ptr.vmem [resolvable:$true] %s476_s22  ;;  %s9242_s18 = int_to_ptr.vmem [resolvable:$true] %s500_s18 }
 0x133   : > { %s10091_s26 = sld [smem:[#allocation43_spill]] }
 0x139   : > { %s8632_s1 = scalar_lea.hbm %s10091_s26, 64 }
 0x13a   : > { %p8633_p11 = scmp.ne.s32.totalorder %s10091_s26, %s8632_s1  ;;  %p8639_p5 = scmp.lt.u32.totalorder %s8632_s1, %s10091_s26 }
 0x13c   : > { %p8635_p7 = pnand %p8633_p11, %p8997_p8 }
 0x13e   : > { %p8636_p2 = pneg %p8635_p7 }
 0x140   : > { %p8641_p3 = pnand %p8639_p5, %p8636_p2 }
 0x142   : > { %8644 = shalt.err (!%p8641_p3)
}
 0x143   : > { %s8645_s14 = scalar_lea.vmem %s477_s22, 64  ;;  %p8653_p1 = scmp.lt.s32.totalorder %s477_s22, %s477_s22 }
 0x144   : > { %p8646_p4 = scmp.ne.s32.totalorder %s477_s22, %s8645_s14  ;;  %p8654_p10 = scmp.lt.s32.totalorder %s8645_s14, %s8645_s14 }
 0x146   : > { %p8648_p0 = pnand %p8646_p4, %p8997_p8  ;;  %p8655_p12 = por %p8654_p10, %p8653_p1 }
 0x148   : > { %p8649_p9 = pneg %p8648_p0 }
 0x14a   : > { %p8656_p13 = pnand %p8655_p12, %p8649_p9 }
 0x14c   : > { %8659 = shalt.err (!%p8656_p13)
}
 0x14d   : > { %7624 = dma.hbm_to_vmem [thread:$0]  (!%p10090_p6), %s10091_s26, 64, %s477_s22, [#allocation16]  }
 0x14e   : > { %s10092_s3 = sld [smem:[#allocation45_spill]] }
 0x154   : > { %s8660_s9 = scalar_lea.hbm %s10092_s3, 128 }
 0x155   : > { %p8661_p11 = scmp.ne.s32.totalorder %s10092_s3, %s8660_s9  ;;  %p8667_p5 = scmp.lt.u32.totalorder %s8660_s9, %s10092_s3 }
 0x157   : > { %p8663_p7 = pnand %p8661_p11, %p8997_p8 }
 0x159   : > { %p8664_p2 = pneg %p8663_p7 }
 0x15b   : > { %p8669_p3 = pnand %p8667_p5, %p8664_p2 }
 0x15d   : > { %8672 = shalt.err (!%p8669_p3)
}
 0x15e   : > { %s8673_s22 = scalar_lea.vmem %s9242_s18, 128  ;;  %p8681_p1 = scmp.lt.s32.totalorder %s9242_s18, %s9242_s18 }
 0x15f   : > { %p8674_p4 = scmp.ne.s32.totalorder %s9242_s18, %s8673_s22  ;;  %p8682_p10 = scmp.lt.s32.totalorder %s8673_s22, %s8673_s22 }
 0x161   : > { %p8676_p0 = pnand %p8674_p4, %p8997_p8  ;;  %p8683_p12 = por %p8682_p10, %p8681_p1 }
 0x163   : > { %p8677_p9 = pneg %p8676_p0 }
 0x165   : > { %p8684_p13 = pnand %p8683_p12, %p8677_p9 }
 0x167   : > { %8687 = shalt.err (!%p8684_p13)
}
 0x168   : > { %7630 = dma.hbm_to_vmem [thread:$0]  (!%p10090_p6), %s10092_s3, 128, %s9242_s18, [#allocation19]  }
 0x169   : > { %s10093_s14 = sand.u32 1, %s8836_s15   ;;  %s8865_s11 = smov [#allocation21]  }
 0x16a   : > { %s7539_s27 = smul.u32 5, %s10093_s14  ;;  %s511_s20 = sshll.u32 %s8865_s11, 4  ;;  %s512_s20 = int_to_ptr.vmem [resolvable:$true] %s511_s20 }
 0x16b   : > { %s7374_s28 = smul.u32 80, %s8840_s16  ;;  %s10094_s1 = sld [smem:[#allocation46_spill]] }
 0x171   : > { %s8688_s5 = scalar_lea.hbm %s10094_s1, 128 }
 0x172   : > { %p8689_p11 = scmp.ne.s32.totalorder %s10094_s1, %s8688_s5  ;;  %p8695_p5 = scmp.lt.u32.totalorder %s8688_s5, %s10094_s1 }
 0x174   : > { %p8691_p7 = pnand %p8689_p11, %p8997_p8 }
 0x176   : > { %p8692_p2 = pneg %p8691_p7 }
 0x178   : > { %p8697_p3 = pnand %p8695_p5, %p8692_p2 }
 0x17a   : > { %8700 = shalt.err (!%p8697_p3)
}
 0x17b   : > { %s8701_s18 = scalar_lea.vmem %s512_s20, 128  ;;  %p8709_p1 = scmp.lt.s32.totalorder %s512_s20, %s512_s20 }
 0x17c   : > { %p8702_p4 = scmp.ne.s32.totalorder %s512_s20, %s8701_s18  ;;  %p8710_p10 = scmp.lt.s32.totalorder %s8701_s18, %s8701_s18 }
 0x17e   : > { %p8704_p0 = pnand %p8702_p4, %p8997_p8  ;;  %p8711_p12 = por %p8710_p10, %p8709_p1 }
 0x180   : > { %p8705_p9 = pneg %p8704_p0 }
 0x182   : > { %p8712_p13 = pnand %p8711_p12, %p8705_p9 }
 0x184   : > { %8715 = shalt.err (!%p8712_p13)
}
 0x185   : > { %7633 = dma.hbm_to_vmem [thread:$0]  (!%p10090_p6), %s10094_s1, 128, %s512_s20, [#allocation22]  }
 0x186   : > { %s10095_s5 = sld [smem:[#allocation48_spill]]  ;;  %s547_s21 = scalar_lea.vmem [#allocation24], %s7539_s27 }
 0x187   : > { %s555_s22 = sshll.u32 %s547_s21, 4  ;;  %p10096_p11 = scmp.ne.s32.totalorder %s10088_s17, 0  ;;  %s556_s22 = int_to_ptr.vmem [resolvable:$true] %s555_s22 }
 0x189   : > { %p10097_p7 = pneg %p10096_p11 }
 0x18c   : > { %s9309_s0 = scalar_lea.hbm %s10095_s5, %s7374_s28  ;;  %s8721_s24 = scalar_lea.hbm %s10095_s5, 240 }
 0x18d   : > { %s8716_s7 = scalar_lea.hbm %s9309_s0, 80  ;;  %p8722_p6 = scmp.lt.u32.totalorder %s9309_s0, %s10095_s5 }
 0x18e   : > { %p8717_p8 = scmp.ne.s32.totalorder %s9309_s0, %s8716_s7  ;;  %p8723_p3 = scmp.lt.u32.totalorder %s8721_s24, %s8716_s7 }
 0x18f   : > { %p8725_p0 = scmp.lt.u32.totalorder %s8716_s7, %s9309_s0 }
 0x190   : > { %p8719_p2 = pnand %p8717_p8, %p10097_p7  ;;  %p8724_p4 = por %p8723_p3, %p8722_p6 }
 0x192   : > { %p8720_p5 = pneg %p8719_p2  ;;  %p8726_p9 = por %p8725_p0, %p8724_p4 }
 0x194   : > { %p8727_p1 = pnand %p8726_p9, %p8720_p5 }
 0x196   : > { %8730 = shalt.err (!%p8727_p1)
}
 0x197   : > { %s8731_s27 = scalar_lea.vmem %s556_s22, 80  ;;  %p10098_p12 = pmov %p10097_p7 }
 0x198   : > { %p8732_p10 = scmp.ne.s32.totalorder %s556_s22, %s8731_s27  ;;  %s8866_s14 = smov [#allocation24]  }
 0x199   : > { %s8736_s11 = sshll.u32 %s8866_s14, 4  ;;  %s8737_s11 = int_to_ptr.vmem [resolvable:$false] %s8736_s11 }
 0x19a   : > { %p8734_p13 = pnand %p8732_p10, %p10098_p12  ;;  %s8738_s9 = scalar_lea.vmem %s8737_s11, 160 }
 0x19b   : > { %p8739_p7 = scmp.lt.s32.totalorder %s556_s22, %s8737_s11  ;;  %p8740_p2 = scmp.lt.s32.totalorder %s8738_s9, %s8731_s27 }
 0x19c   : > { %p8735_p8 = pneg %p8734_p13 }
 0x19d   : > { %p8741_p3 = por %p8740_p2, %p8739_p7 }
 0x19f   : > { %p8742_p6 = pnand %p8741_p3, %p8735_p8 }
 0x1a1   : > { %8745 = shalt.err (!%p8742_p6)
}
 0x1a2   : > { %7640 = dma.hbm_to_vmem [thread:$0]  (!%p10096_p11), %s9309_s0, 80, %s556_s22, %s9160_s25  }
 0x1a3   : > { %s10099_s12 = sld [smem:[#allocation35_spill]] }
 0x1a9   : > { %p10100_p5 = scmp.ne.s32.totalorder %s10099_s12, 0 }
 0x1aa   : > { %p10101_p4 = scmp.eq.s32.totalorder (!%p10100_p5), %s8967_s19, 0 }
 0x1ab   : > { %564 = sbr.rel (%p10100_p5) target bundleno = 2242 (0x8c2), region = 76 }
 0x1b2   : > { %8791 = dma.done.wait (%p10101_p4), [#allocation4], 128   ;;  %p10102_p0 = pmov %p10101_p4 }
 0x1b4   : > { %8793 = vsyncadd (%p10102_p0), [#allocation4], 4294967168  ;;  %p10103_p9 = pmov %p10102_p0 }
 0x1b5   : > { %p10104_p1 = pmov %p10102_p0 }
 0x1b6   : > { %8795 = dma.done.wait (%p10103_p9), [#allocation7], 848  }
 0x1b7   : > { %8797 = vsyncadd (%p10104_p1), [#allocation7], 4294966448  ;;  %p10105_p10 = pmov %p10102_p0 }
 0x1b8   : > { %p10106_p11 = pmov %p10102_p0 }
 0x1b9   : > { %8799 = dma.done.wait (%p10105_p10), [#allocation10], 2080  }
 0x1ba   : > { %8801 = vsyncadd (%p10106_p11), [#allocation10], 4294965216  ;;  %p10107_p12 = pmov %p10102_p0 }
 0x1bb   : > { %p10108_p13 = pmov %p10102_p0 }
 0x1bc   : > { %8803 = dma.done.wait (%p10107_p12), [#allocation13], 8224  }
 0x1bd   : > { %8805 = vsyncadd (%p10108_p13), [#allocation13], 4294959072  ;;  %p10109_p8 = pmov %p10102_p0 }
 0x1be   : > { %p10110_p7 = pmov %p10102_p0 }
 0x1bf   : > { %8807 = dma.done.wait (%p10109_p8), [#allocation16], 128  }
 0x1c0   : > { %8809 = vsyncadd (%p10110_p7), [#allocation16], 4294967168  ;;  %p10111_p2 = pmov %p10102_p0 }
 0x1c1   : > { %p10112_p3 = pmov %p10102_p0 }
 0x1c2   : > { %8811 = dma.done.wait (%p10111_p2), [#allocation19], 32896  }
 0x1c3   : > { %8813 = vsyncadd (%p10112_p3), [#allocation19], 4294934400  ;;  %p10113_p6 = pmov %p10102_p0 }
 0x1c4   : > { %p10114_p5 = pmov %p10102_p0 }
 0x1c5   : > { %8815 = dma.done.wait (%p10113_p6), [#allocation22], 128  }
 0x1c6   : > { %8817 = vsyncadd (%p10114_p5), [#allocation22], 4294967168  ;;  %s614_s17 = sand.u32 1, %s8967_s19   ;;  %s9363_s25 = sand.u32 1, %s8832_s30  }
 0x1c7   : > { %s7540_s0 = smul.u32 2560, %s9363_s25  ;;  %s615_s21 = scalar_lea.sflag [#allocation4], %s614_s17 }
 0x1c8   : > { %p10115_p4 = scmp.ne.s32.totalorder %s10085_s13, 0 }
 0x1c9   : > { %s9366_s22 = scalar_lea.vmem [#allocation23], %s7540_s0 }
 0x1ca   : > { %8819 = dma.done.wait (%p10115_p4), %s615_s21, 41040  }
 0x1cb   : > { %8821 = vsyncadd (%p10115_p4), %s615_s21, 4294926256  ;;  %s7541_s7 = smul.u32 5, %s9363_s25  ;;  %p10116_p0 = scmp.ne.s32.totalorder %s8967_s19, 0 }
 0x1cc   : > { %s7542_s23 = smul.u32 40, %s9363_s25  ;;  %v7729_v0 = vld [vmem:[#allocation6] sm:$0xff] (!%p10116_p0)   ;;  %v8867_v1 = vmov (!%p10116_p0), 0.0   ;;  %v7730_v2 = vld [vmem:[#allocation6 + $0x8] sm:$0xff] (!%p10116_p0)   ;;  %vm8868_vm0 = vmmov (!%p10116_p0), 0   ;;  %v7731_v3 = vld [vmem:[#allocation6 + $0x10] sm:$0xff] (!%p10116_p0)  }
 0x1cd   : > { %s9374_s20 = scalar_lea.vmem [#allocation24], %s7541_s7  ;;  %684 = sbr.rel (%p10116_p0) target bundleno = 1677 (0x68d), region = 136  ;;  %7476 = vmatprep.subr.bf16.mxu0 (!%p10116_p0), %v8867_v1  ;;  %7490 = vmatprep.mubr.msk.bf16.mxu0 (!%p10116_p0), %vm8868_vm0, %v8867_v1  ;;  %v7736_v4 = vld [vmem:[#allocation9 + $0x4] ss:$8 sps:$4 sm:$0xff] (!%p10116_p0)   ;;  %v7738_v5 = vld [vmem:[#allocation9] ss:$8 sps:$4 sm:$0xff] (!%p10116_p0)  }
 0x1ce   : > { %s9376_s24 = scalar_lea.vmem [#allocation25], %s7542_s23  ;;  %7477 = vmatpush3.bf16.msra.mxu0 (!%p10116_p0), %v7729_v0  ;;  %894 = vmatprep.subr.bf16.mxu1 (!%p10116_p0), %v7736_v4  ;;  %v7739_v6 = vld [vmem:[#allocation9 + $0x14] ss:$8 sps:$4 sm:$0xff] (!%p10116_p0)   ;;  %v7732_v7 = vld [vmem:[#allocation6 + $0x18] sm:$0xff] (!%p10116_p0)   ;;  %v7741_v8 = vld [vmem:[#allocation9 + $0x10] ss:$8 sps:$4 sm:$0xff] (!%p10116_p0)  }
 0x1cf   : > { %7478 = vmatprep.subr.bf16.mxu0 (!%p10116_p0), %v8867_v1  ;;  %895 = vmatpush1.bf16.msra.mxu1 (!%p10116_p0), %v7738_v5  ;;  %v7742_v9 = vld [vmem:[#allocation9 + $0x24] ss:$8 sps:$4 sm:$0xff] (!%p10116_p0)   ;;  %v7744_v11 = vld [vmem:[#allocation9 + $0x20] ss:$8 sps:$4 sm:$0xff] (!%p10116_p0)   ;;  %v7745_v12 = vld [vmem:[#allocation9 + $0x34] ss:$8 sps:$4 sm:$0xff] (!%p10116_p0)  }
 0x1d0   : > { %896 = vmatprep.subr.bf16.mxu1 (!%p10116_p0), %v7739_v6  ;;  %v7733_v10 = vld [vmem:[#allocation6 + $0x20] sm:$0xff] (!%p10116_p0)   ;;  %v7734_v13 = vld [vmem:[#allocation6 + $0x28] sm:$0xff] (!%p10116_p0)   ;;  %v7735_v15 = vld [vmem:[#allocation6 + $0x30] ss:$0 sps:$4 sm:$0x33] (!%p10116_p0)   ;;  %vm750_vm1 = vcmask (!%p10116_p0), 1041408  }
 0x1d1   : > { %v7747_v14 = vld [vmem:[#allocation9 + $0x30] ss:$8 sps:$4 sm:$0xff] (!%p10116_p0)   ;;  %v7748_v16 = vld [vmem:[#allocation9 + $0x44] ss:$8 sps:$4 sm:$0xff] (!%p10116_p0)   ;;  %v7750_v18 = vld [vmem:[#allocation9 + $0x40] ss:$8 sps:$4 sm:$0xff] (!%p10116_p0)  }
 0x1d2   : > { %7479 = vmatpush3.bf16.msra.mxu0 (!%p10116_p0), %v7730_v2  ;;  %v685_v17 = vld [vmem:[#allocation3] sm:$0xff] (!%p10116_p0)  ;;  %v7751_v19 = vld [vmem:[#allocation9 + $0x54] ss:$8 sps:$4 sm:$0xff] (!%p10116_p0)   ;;  %v752_v20 = vsel (!%p10116_p0), %vm750_vm1, %v7735_v15, 0  ;;  %v7753_v21 = vld [vmem:[#allocation9 + $0x50] ss:$8 sps:$4 sm:$0xff] (!%p10116_p0)  }
 0x1d3   : > { %7480 = vmatprep.subr.bf16.mxu0 (!%p10116_p0), %v8867_v1  ;;  %897 = vmatpush1.bf16.msra.mxu1 (!%p10116_p0), %v7741_v8  ;;  %v686_v22 = vpack.c.bf16 (!%p10116_p0), %v685_v17, %v685_v17  ;;  %vm746_vm2 = vcmask (!%p10116_p0), 818176   ;;  %v7754_v23 = vld [vmem:[#allocation9 + $0x64] ss:$8 sps:$4 sm:$0xff] (!%p10116_p0)   ;;  %v7756_v24 = vld [vmem:[#allocation9 + $0x60] ss:$8 sps:$4 sm:$0xff] (!%p10116_p0)   ;;  %v8869_v27 = vmov (!%p10116_p0), 0  }
 0x1d4   : > { %898 = vmatprep.subr.bf16.mxu1 %v7742_v9  ;;  %v7757_v25 = vld [vmem:[#allocation9 + $0x74] ss:$8 sps:$4 sm:$0xff]   ;;  %v7759_v26 = vld [vmem:[#allocation9 + $0x70] ss:$8 sps:$4 sm:$0xff]   ;;  %926 = vmatprep.mubr.bf16.mxu1 %v8869_v27 }
 0x1d5   : > { %v7760_v28 = vld [vmem:[#allocation14] ss:$16 sps:$4 sm:$0xff]   ;;  %v7762_v29 = vld [vmem:[#allocation14 + $0x4] ss:$16 sps:$4 sm:$0xff]   ;;  %v7765_v30 = vld [vmem:[#allocation14 + $0xc] ss:$16 sps:$4 sm:$0xff]  }
 0x1d6   : > { %7481 = vmatpush3.bf16.msra.mxu0 %v7731_v3  ;;  %v7768_v31 = vld [vmem:[#allocation14 + $0x24] ss:$16 sps:$4 sm:$0xff]   ;;  %v7766_v32 = vld [vmem:[#allocation14 + $0x20] ss:$16 sps:$4 sm:$0xff]   ;;  %v6693_v39 = vld [vmem:[#allocation8] ss:$0 sm:$0xff] }
 0x1d7   : > { %7482 = vmatprep.subr.bf16.mxu0 %v8867_v1  ;;  %899 = vmatpush1.bf16.msra.mxu1 %v7744_v11  ;;  %v7774_v33 = vld [vmem:[#allocation14 + $0x44] ss:$16 sps:$4 sm:$0xff]   ;;  %v7772_v34 = vld [vmem:[#allocation14 + $0x40] ss:$16 sps:$4 sm:$0xff]   ;;  %v7763_v47 = vld [vmem:[#allocation14 + $0x8] ss:$16 sps:$4 sm:$0xff]  }
 0x1d8   : > { %900 = vmatprep.subr.bf16.mxu1 %v7745_v12  ;;  %v7780_v35 = vld [vmem:[#allocation14 + $0x64] ss:$16 sps:$4 sm:$0xff]   ;;  %v7778_v36 = vld [vmem:[#allocation14 + $0x60] ss:$16 sps:$4 sm:$0xff]   ;;  %v7771_v49 = vld [vmem:[#allocation14 + $0x2c] ss:$16 sps:$4 sm:$0xff]  }
 0x1d9   : > { %v7786_v37 = vld [vmem:[#allocation14 + $0x84] ss:$16 sps:$4 sm:$0xff]   ;;  %v7784_v38 = vld [vmem:[#allocation14 + $0x80] ss:$16 sps:$4 sm:$0xff]   ;;  %v7769_v50 = vld [vmem:[#allocation14 + $0x28] ss:$16 sps:$4 sm:$0xff]  }
 0x1da   : > { %7483 = vmatpush3.bf16.msra.mxu0 %v7732_v7  ;;  %v7777_v51 = vld [vmem:[#allocation14 + $0x4c] ss:$16 sps:$4 sm:$0xff]   ;;  %v7775_v52 = vld [vmem:[#allocation14 + $0x48] ss:$16 sps:$4 sm:$0xff]   ;;  %v7792_v57 = vld [vmem:[#allocation14 + $0xa4] ss:$16 sps:$4 sm:$0xff]  }
 0x1db   : > { %7484 = vmatprep.subr.bf16.mxu0 %v8867_v1  ;;  %901 = vmatpush1.bf16.msra.mxu1 %v7747_v14  ;;  %v7783_v53 = vld [vmem:[#allocation14 + $0x6c] ss:$16 sps:$4 sm:$0xff]   ;;  %v7781_v54 = vld [vmem:[#allocation14 + $0x68] ss:$16 sps:$4 sm:$0xff]   ;;  %v7790_v59 = vld [vmem:[#allocation14 + $0xa0] ss:$16 sps:$4 sm:$0xff]  }
 0x1dc   : > { %902 = vmatprep.subr.bf16.mxu1 %v7748_v16  ;;  %v7789_v55 = vld [vmem:[#allocation14 + $0x8c] ss:$16 sps:$4 sm:$0xff]   ;;  %v7787_v56 = vld [vmem:[#allocation14 + $0x88] ss:$16 sps:$4 sm:$0xff]   ;;  %v7798_v61 = vld [vmem:[#allocation14 + $0xc4] ss:$16 sps:$4 sm:$0xff]  }
 0x1dd   : > { %v7795_v58 = vld [vmem:[#allocation14 + $0xac] ss:$16 sps:$4 sm:$0xff]   ;;  %v7793_v60 = vld [vmem:[#allocation14 + $0xa8] ss:$16 sps:$4 sm:$0xff]   ;;  %v7796_v63 = vld [vmem:[#allocation14 + $0xc0] ss:$16 sps:$4 sm:$0xff]  }
 0x1de   : > { %7485 = vmatpush3.bf16.msra.mxu0 %v7733_v10  ;;  %v7801_v62 = vld [vmem:[#allocation14 + $0xcc] ss:$16 sps:$4 sm:$0xff]   ;;  %v7799_v0 = vld [vmem:[#allocation14 + $0xc8] ss:$16 sps:$4 sm:$0xff]   ;;  %v7802_v3 = vld [vmem:[#allocation14 + $0xe0] ss:$16 sps:$4 sm:$0xff]  }
 0x1df   : > { %7486 = vmatprep.subr.bf16.mxu0 %v8867_v1  ;;  %903 = vmatpush1.bf16.msra.mxu1 %v7750_v18  ;;  %v7807_v2 = vld [vmem:[#allocation14 + $0xec] ss:$16 sps:$4 sm:$0xff]   ;;  %v7805_v4 = vld [vmem:[#allocation14 + $0xe8] ss:$16 sps:$4 sm:$0xff]   ;;  %v7810_v5 = vld [vmem:[#allocation14 + $0x104] ss:$16 sps:$4 sm:$0xff]  }
 0x1e0   : > { %904 = vmatprep.subr.bf16.mxu1 %v7751_v19  ;;  %v7813_v6 = vld [vmem:[#allocation14 + $0x10c] ss:$16 sps:$4 sm:$0xff]   ;;  %v7808_v7 = vld [vmem:[#allocation14 + $0x100] ss:$16 sps:$4 sm:$0xff]   ;;  %v7811_v8 = vld [vmem:[#allocation14 + $0x108] ss:$16 sps:$4 sm:$0xff]  }
 0x1e1   : > { %v7816_v9 = vld [vmem:[#allocation14 + $0x124] ss:$16 sps:$4 sm:$0xff]   ;;  %v7819_v10 = vld [vmem:[#allocation14 + $0x12c] ss:$16 sps:$4 sm:$0xff]   ;;  %v7814_v11 = vld [vmem:[#allocation14 + $0x120] ss:$16 sps:$4 sm:$0xff]  }
 0x1e2   : > { %7487 = vmatpush3.bf16.msra.mxu0 %v7734_v13  ;;  %v7817_v12 = vld [vmem:[#allocation14 + $0x128] ss:$16 sps:$4 sm:$0xff]   ;;  %v7822_v13 = vld [vmem:[#allocation14 + $0x144] ss:$16 sps:$4 sm:$0xff]   ;;  %v7825_v14 = vld [vmem:[#allocation14 + $0x14c] ss:$16 sps:$4 sm:$0xff]  }
 0x1e3   : > { %7488 = vmatprep.subr.bf16.mxu0 %v8867_v1  ;;  %905 = vmatpush1.bf16.msra.mxu1 %v7753_v21  ;;  %v7804_v1 = vld [vmem:[#allocation14 + $0xe4] ss:$16 sps:$4 sm:$0xff]   ;;  %v7820_v15 = vld [vmem:[#allocation14 + $0x140] ss:$16 sps:$4 sm:$0xff]   ;;  %v7823_v16 = vld [vmem:[#allocation14 + $0x148] ss:$16 sps:$4 sm:$0xff]  }
 0x1e4   : > { %906 = vmatprep.subr.bf16.mxu1 %v7754_v23  ;;  %v7828_v17 = vld [vmem:[#allocation14 + $0x164] ss:$16 sps:$4 sm:$0xff]   ;;  %v7831_v18 = vld [vmem:[#allocation14 + $0x16c] ss:$16 sps:$4 sm:$0xff]   ;;  %v7826_v19 = vld [vmem:[#allocation14 + $0x160] ss:$16 sps:$4 sm:$0xff]  }
 0x1e5   : > { %v7834_v21 = vld [vmem:[#allocation14 + $0x184] ss:$16 sps:$4 sm:$0xff]   ;;  %v7832_v23 = vld [vmem:[#allocation14 + $0x180] ss:$16 sps:$4 sm:$0xff]  }
 0x1e6   : > { %7489 = vmatpush3.bf16.msra.mxu0 %v752_v20  ;;  %v7829_v20 = vld [vmem:[#allocation14 + $0x168] ss:$16 sps:$4 sm:$0xff]   ;;  %v7838_v27 = vld [vmem:[#allocation14 + $0x1a0] ss:$16 sps:$4 sm:$0xff]  }
 0x1e7   : > { %907 = vmatpush1.bf16.msra.mxu1 %v7756_v24  ;;  %1400 = vmatprep.subr.bf16.mxu0 %v7762_v29  ;;  %v7835_v24 = vld [vmem:[#allocation14 + $0x188] ss:$16 sps:$4 sm:$0xff]   ;;  %v7846_v29 = vld [vmem:[#allocation14 + $0x1c4] ss:$16 sps:$4 sm:$0xff]  }
 0x1e8   : > { %908 = vmatprep.subr.bf16.mxu1 %v7757_v25  ;;  %v7840_v25 = vld [vmem:[#allocation14 + $0x1a4] ss:$16 sps:$4 sm:$0xff]  }
 0x1e9   : > { %7491 = vmatmul.mubr.msk.bf16.vlgmr.msra.gmra.mrb[0].mxu0 %vm746_vm2, %v686_v22  ;;  %v7837_v22 = vld [vmem:[#allocation14 + $0x18c] ss:$16 sps:$4 sm:$0xff]  }
 0x1ea   : > { %1401 = vmatpush1.bf16.msra.mxu0 %v7760_v28  ;;  %v7841_v28 = vld [vmem:[#allocation14 + $0x1a8] ss:$16 sps:$4 sm:$0xff]  }
 0x1eb   : > { %909 = vmatpush1.bf16.msra.mxu1 %v7759_v26  ;;  %1402 = vmatprep.subr.bf16.mxu0 %v7768_v31  ;;  %v7843_v26 = vld [vmem:[#allocation14 + $0x1ac] ss:$16 sps:$4 sm:$0xff]   ;;  %v7844_v31 = vld [vmem:[#allocation14 + $0x1c0] ss:$16 sps:$4 sm:$0xff]  }
 0x1ec   : > { %1441 = vmatprep.subr.bf16.mxu1 %v7765_v30  ;;  %v7849_v30 = vld [vmem:[#allocation14 + $0x1cc] ss:$16 sps:$4 sm:$0xff]  }
 0x1ee   : > { %1403 = vmatpush1.bf16.msra.mxu0 %v7766_v32  ;;  %v7847_v32 = vld [vmem:[#allocation14 + $0x1c8] ss:$16 sps:$4 sm:$0xff]  }
 0x1ef   : > { %1404 = vmatprep.subr.bf16.mxu0 %v7774_v33  ;;  %v7852_v33 = vld [vmem:[#allocation14 + $0x1e4] ss:$16 sps:$4 sm:$0xff]  }
 0x1f2   : > { %1405 = vmatpush1.bf16.msra.mxu0 %v7772_v34  ;;  %v7855_v34 = vld [vmem:[#allocation14 + $0x1ec] ss:$16 sps:$4 sm:$0xff]  }
 0x1f3   : > { %1406 = vmatprep.subr.bf16.mxu0 %v7780_v35  ;;  %v7850_v35 = vld [vmem:[#allocation14 + $0x1e0] ss:$16 sps:$4 sm:$0xff]  }
 0x1f6   : > { %1407 = vmatpush1.bf16.msra.mxu0 %v7778_v36  ;;  %v7853_v36 = vld [vmem:[#allocation14 + $0x1e8] ss:$16 sps:$4 sm:$0xff]  }
 0x1f7   : > { %1408 = vmatprep.subr.bf16.mxu0 %v7786_v37  ;;  %v9380_v37 = vld [vmem:[#allocation18] sm:$0xff] }
 0x1fa   : > { %1409 = vmatpush1.bf16.msra.mxu0 %v7784_v38  ;;  %v9382_v38 = vld [vmem:[#allocation18 + $0x20] sm:$0xff] }
 0x1fb   : > { %1410 = vmatprep.subr.bf16.mxu0 %v7792_v57 }
 0x1fe   : > { %1411 = vmatpush1.bf16.msra.mxu0 %v7790_v59 }
 0x1ff   : > { %1412 = vmatprep.subr.bf16.mxu0 %v7798_v61 }
 0x202   : > { %1413 = vmatpush1.bf16.msra.mxu0 %v7796_v63 }
 0x203   : > { %1414 = vmatprep.subr.bf16.mxu0 %v7804_v1 }
 0x206   : > { %1415 = vmatpush1.bf16.msra.mxu0 %v7802_v3 }
 0x207   : > { %1416 = vmatprep.subr.bf16.mxu0 %v7810_v5 }
 0x20a   : > { %1417 = vmatpush1.bf16.msra.mxu0 %v7808_v7 }
 0x20b   : > { %1418 = vmatprep.subr.bf16.mxu0 %v7816_v9 }
 0x20e   : > { %1419 = vmatpush1.bf16.msra.mxu0 %v7814_v11 }
 0x20f   : > { %1420 = vmatprep.subr.bf16.mxu0 %v7822_v13 }
 0x212   : > { %1421 = vmatpush1.bf16.msra.mxu0 %v7820_v15 }
 0x213   : > { %1422 = vmatprep.subr.bf16.mxu0 %v7828_v17 }
 0x216   : > { %1423 = vmatpush1.bf16.msra.mxu0 %v7826_v19 }
 0x217   : > { %1424 = vmatprep.subr.bf16.mxu0 %v7834_v21 }
 0x21a   : > { %1425 = vmatpush1.bf16.msra.mxu0 %v7832_v23 }
 0x21b   : > { %1426 = vmatprep.subr.bf16.mxu0 %v7840_v25 }
 0x21e   : > { %1427 = vmatpush1.bf16.msra.mxu0 %v7838_v27 }
 0x21f   : > { %1428 = vmatprep.subr.bf16.mxu0 %v7846_v29 }
 0x222   : > { %1429 = vmatpush1.bf16.msra.mxu0 %v7844_v31 }
 0x223   : > { %1430 = vmatprep.subr.bf16.mxu0 %v7852_v33 }
 0x226   : > { %1431 = vmatpush1.bf16.msra.mxu0 %v7850_v35 }
 0x2bc   : > { %v788_v40 = vpop.f32.mrb[0].mxu0 }
 0x2bd   : > { %v789_v41 = vadd.f32 %v6693_v39, %v788_v40  ;;  %v7492_v42 = vpop.f32.mrb[1].mxu0  ;;  %v9384_v39 = vld [vmem:[#allocation18 + $0x8] sm:$0xff]  ;;  %v6782_v40 = vcombine.low %v9380_v37, %v9382_v38 }
 0x2be   : > { %v791_v43 = vpop.f32.mrb[2].mxu0  ;;  %v9390_v42 = vld [vmem:[#allocation18 + $0x28] sm:$0xff] }
 0x2bf   : > { %vm794_vm3 = vcmp.gt.f32.partialorder %v789_v41, 0.0  ;;  %v795_v44 = vmul.f32 0.2, %v789_v41  ;;  %v7493_v45 = vpop.f32.mrb[3].mxu0  ;;  %v6784_v43 = vcombine.low %v9384_v39, %v9390_v42 }
 0x2c1   : > { %v796_v46 = vsel %vm794_vm3, %v789_v41, %v795_v44  ;;  %v6783_v41 = vcombine.high %v9380_v37, %v9382_v38  ;;  %v6785_v44 = vcombine.high %v9384_v39, %v9390_v42  ;;  %v1670_v39 = vld [vmem:[#allocation18 + $0x100] sm:$0xff]  ;;  %v1671_v42 = vld [vmem:[#allocation18 + $0x108] sm:$0xff] }
 0x2c2   : > { %v797_v48 = vpack.c.bf16 %v796_v46, %v796_v46 }
 0x2c3   : > { %3174 = vmatprep.subr.bf16.mxu0 %v6783_v41 }
 0x2c4   : > { %927 = vmatmul.mubr.bf16.vlgmr.msra.gmra.mrb[0].mxu1 %v797_v48 }
 0x2c5   : > { %1442 = vmatpush1.bf16.msra.mxu1 %v7763_v47 }
 0x2c6   : > { %1443 = vmatprep.subr.bf16.mxu1 %v7771_v49 }
 0x2c9   : > { %1444 = vmatpush1.bf16.msra.mxu1 %v7769_v50 }
 0x2ca   : > { %1445 = vmatprep.subr.bf16.mxu1 %v7777_v51 }
 0x2cd   : > { %1446 = vmatpush1.bf16.msra.mxu1 %v7775_v52 }
 0x2ce   : > { %1447 = vmatprep.subr.bf16.mxu1 %v7783_v53 }
 0x2d1   : > { %1448 = vmatpush1.bf16.msra.mxu1 %v7781_v54 }
 0x2d2   : > { %1449 = vmatprep.subr.bf16.mxu1 %v7789_v55 }
 0x2d5   : > { %1450 = vmatpush1.bf16.msra.mxu1 %v7787_v56 }
 0x2d6   : > { %1451 = vmatprep.subr.bf16.mxu1 %v7795_v58 }
 0x2d9   : > { %1452 = vmatpush1.bf16.msra.mxu1 %v7793_v60 }
 0x2da   : > { %1453 = vmatprep.subr.bf16.mxu1 %v7801_v62 }
 0x2dd   : > { %1454 = vmatpush1.bf16.msra.mxu1 %v7799_v0 }
 0x2de   : > { %1455 = vmatprep.subr.bf16.mxu1 %v7807_v2 }
 0x2e1   : > { %1456 = vmatpush1.bf16.msra.mxu1 %v7805_v4 }
 0x2e2   : > { %1457 = vmatprep.subr.bf16.mxu1 %v7813_v6 }
 0x2e5   : > { %1458 = vmatpush1.bf16.msra.mxu1 %v7811_v8 }
 0x2e6   : > { %1459 = vmatprep.subr.bf16.mxu1 %v7819_v10 }
 0x2e9   : > { %1460 = vmatpush1.bf16.msra.mxu1 %v7817_v12 }
 0x2ea   : > { %1461 = vmatprep.subr.bf16.mxu1 %v7825_v14 }
 0x2ed   : > { %1462 = vmatpush1.bf16.msra.mxu1 %v7823_v16 }
 0x2ee   : > { %1463 = vmatprep.subr.bf16.mxu1 %v7831_v18 }
 0x2f1   : > { %1464 = vmatpush1.bf16.msra.mxu1 %v7829_v20  ;;  %v983_v20 = vlaneseq }
 0x2f2   : > { %1465 = vmatprep.subr.bf16.mxu1 %v7837_v22 }
 0x2f5   : > { %1466 = vmatpush1.bf16.msra.mxu1 %v7835_v24  ;;  %v9396_v24 = vshrl.u32 %v983_v20, 7 }
 0x2f6   : > { %1467 = vmatprep.subr.bf16.mxu1 %v7843_v26  ;;  %v935_v26 = vld [vmem:[#allocation11] sm:$0x3] }
 0x2f7   : > { %v9399_v25 = vsub.s32 0, %v9396_v24  ;;  %v9402_v27 = vsub.s32 1, %v9396_v24 }
 0x2f9   : > { %1468 = vmatpush1.bf16.msra.mxu1 %v7841_v28  ;;  %v936_v28 = vld [vmem:[#allocation12] sm:$0x3]  ;;  %v990_v33 = vrot.slane %v935_v26, %v9402_v27 }
 0x2fa   : > { %1469 = vmatprep.subr.bf16.mxu1 %v7849_v30  ;;  %v986_v30 = vrot.slane %v935_v26, %v9399_v25 }
 0x2fd   : > { %1470 = vmatpush1.bf16.msra.mxu1 %v7847_v32 }
 0x2fe   : > { %1471 = vmatprep.subr.bf16.mxu1 %v7855_v34 }
 0x301   : > { %1472 = vmatpush1.bf16.msra.mxu1 %v7853_v36  ;;  %v999_v36 = vrot.slane %v936_v28, %v9399_v25 }
 0x302   : > { %3256 = vmatprep.subr.bf16.mxu1 %v6785_v44  ;;  %v1003_v44 = vrot.slane %v936_v28, %v9402_v27  ;;  %v1686_v28 = vld [vmem:[#allocation18 + $0x180] sm:$0xff] }
 0x397   : > { %v928_v45 = vpop.f32.mrb[0].mxu1 }
 0x398   : > { %v937_v46 = vrot.slane %v928_v45, 4  ;;  %v952_v47 = vmul.f32 %v928_v45, %v928_v45  ;;  %v930_v48 = vpop.f32.mrb[1].mxu1 }
 0x399   : > { %v943_v49 = vrot.slane %v930_v48, 4  ;;  %v953_v50 = vmul.f32 %v930_v48, %v930_v48  ;;  %v932_v51 = vpop.f32.mrb[2].mxu1 }
 0x39a   : > { %v938_v52 = vadd.f32 %v937_v46, %v928_v45  ;;  %v954_v53 = vrot.slane %v952_v47, 4  ;;  %v933_v54 = vpop.f32.mrb[3].mxu1 }
 0x39b   : > { %v944_v55 = vadd.f32 %v943_v49, %v930_v48  ;;  %v960_v56 = vrot.slane %v953_v50, 4  ;;  %v1647_v54 = vld [vmem:[#allocation18 + $0x48] sm:$0xff] }
 0x39c   : > { %v939_v57 = vrot.slane %v938_v52, 2  ;;  %v955_v58 = vadd.f32 %v954_v53, %v952_v47 }
 0x39d   : > { %v945_v59 = vrot.slane %v944_v55, 2  ;;  %v961_v60 = vadd.f32 %v960_v56, %v953_v50 }
 0x39e   : > { %v940_v61 = vadd.f32 %v939_v57, %v938_v52  ;;  %v956_v62 = vrot.slane %v955_v58, 2  ;;  %v1646_v52 = vld [vmem:[#allocation18 + $0x40] sm:$0xff] }
 0x39f   : > { %v946_v63 = vadd.f32 %v945_v59, %v944_v55  ;;  %v962_v0 = vrot.slane %v961_v60, 2  ;;  %v1651_v55 = vld [vmem:[#allocation18 + $0x68] sm:$0xff] }
 0x3a0   : > { %v941_v1 = vrot.slane %v940_v61, 1  ;;  %v957_v2 = vadd.f32 %v956_v62, %v955_v58  ;;  %v1658_v62 = vld [vmem:[#allocation18 + $0xa0] sm:$0xff] }
 0x3a1   : > { %v947_v3 = vrot.slane %v946_v63, 1  ;;  %v963_v4 = vadd.f32 %v962_v0, %v961_v60  ;;  %v6793_v60 = vcombine.high %v1647_v54, %v1651_v55  ;;  %v1659_v0 = vld [vmem:[#allocation18 + $0xa8] sm:$0xff] }
 0x3a2   : > { %v942_v5 = vadd.f32 %v941_v1, %v940_v61  ;;  %v958_v6 = vrot.slane %v957_v2, 1  ;;  %v1654_v61 = vld [vmem:[#allocation18 + $0x80] sm:$0xff] }
 0x3a3   : > { %v948_v7 = vadd.f32 %v947_v3, %v946_v63  ;;  %v964_v8 = vrot.slane %v963_v4, 1  ;;  %v1655_v63 = vld [vmem:[#allocation18 + $0x88] sm:$0xff]  ;;  %v6799_v3 = vcombine.high %v1654_v61, %v1658_v62 }
 0x3a4   : > { %v950_v9 = vmul.f32 0.125, %v942_v5  ;;  %v959_v10 = vadd.f32 %v958_v6, %v957_v2  ;;  %v6792_v2 = vcombine.low %v1647_v54, %v1651_v55  ;;  %v1662_v5 = vld [vmem:[#allocation18 + $0xc0] sm:$0xff]  ;;  %v1707_v54 = vld [vmem:[#allocation18 + $0x228] sm:$0xff] }
 0x3a5   : > { %v951_v11 = vmul.f32 0.125, %v948_v7  ;;  %v965_v12 = vadd.f32 %v964_v8, %v963_v4  ;;  %v6801_v4 = vcombine.high %v1655_v63, %v1659_v0  ;;  %v1666_v6 = vld [vmem:[#allocation18 + $0xe0] sm:$0xff]  ;;  %v1663_v7 = vld [vmem:[#allocation18 + $0xc8] sm:$0xff] }
 0x3a6   : > { %v966_v13 = vmul.f32 0.125, %v959_v10  ;;  %v968_v14 = vmul.f32 %v950_v9, %v950_v9  ;;  %v974_v29 = vsub.f32 %v928_v45, %v950_v9  ;;  %v1667_v8 = vld [vmem:[#allocation18 + $0xe8] sm:$0xff]  ;;  %v6798_v9 = vcombine.low %v1654_v61, %v1658_v62 }
 0x3a7   : > { %v967_v15 = vmul.f32 0.125, %v965_v12  ;;  %v969_v16 = vmul.f32 %v951_v11, %v951_v11  ;;  %v975_v32 = vsub.f32 %v930_v48, %v951_v11  ;;  %v1650_v48 = vld [vmem:[#allocation18 + $0x60] sm:$0xff]  ;;  %v6800_v10 = vcombine.low %v1655_v63, %v1659_v0  ;;  %v1715_v62 = vld [vmem:[#allocation18 + $0x268] sm:$0xff] }
 0x3a8   : > { %v970_v17 = vsub.f32 %v966_v13, %v968_v14  ;;  %v6791_v59 = vcombine.high %v1646_v52, %v1650_v48  ;;  %v6790_v1 = vcombine.low %v1646_v52, %v1650_v48  ;;  %v6807_v37 = vcombine.high %v1662_v5, %v1666_v6  ;;  %v1706_v52 = vld [vmem:[#allocation18 + $0x220] sm:$0xff] }
 0x3a9   : > { %v971_v18 = vsub.f32 %v967_v15, %v969_v16  ;;  %v6809_v38 = vcombine.high %v1663_v7, %v1667_v8  ;;  %v6806_v11 = vcombine.low %v1662_v5, %v1666_v6  ;;  %v6808_v12 = vcombine.low %v1663_v7, %v1667_v8  ;;  %v1723_v6 = vld [vmem:[#allocation18 + $0x2a8] sm:$0xff] }
 0x3aa   : > { %v972_v19 = vmax.f32 %v970_v17, 0.0  ;;  %v1678_v17 = vld [vmem:[#allocation18 + $0x140] sm:$0xff] }
 0x3ab   : > { %v973_v21 = vmax.f32 %v971_v18, 0.0  ;;  %v1682_v18 = vld [vmem:[#allocation18 + $0x160] sm:$0xff] }
 0x3ac   : > { %v976_v22 = vadd.f32 0.8, %v972_v19  ;;  %v1679_v19 = vld [vmem:[#allocation18 + $0x148] sm:$0xff]  ;;  %v6823_v20 = vcombine.high %v1678_v17, %v1682_v18 }
 0x3ad   : > { %v977_v23 = vadd.f32 0.8, %v973_v21  ;;  %v1683_v21 = vld [vmem:[#allocation18 + $0x168] sm:$0xff] }
 0x3ae   : > { %7856 = vrsqrt.f32 %v976_v22  ;;  %v6822_v22 = vcombine.low %v1678_v17, %v1682_v18  ;;  %v6825_v26 = vcombine.high %v1679_v19, %v1683_v21 }
 0x3af   : > { %7858 = vrsqrt.f32 %v977_v23  ;;  %v6824_v23 = vcombine.low %v1679_v19, %v1683_v21  ;;  %v1746_v21 = vld [vmem:[#allocation18 + $0x360] sm:$0xff] }
 0x3b8   : > { %v7857_v31 = vpop.eup %7856 }
 0x3b9   : > { %v7859_v34 = vpop.eup %7858  ;;  %v980_v35 = vmul.f32 %v7857_v31, %v974_v29  ;;  %v1690_v29 = vld [vmem:[#allocation18 + $0x1a0] sm:$0xff] }
 0x3ba   : > { %v981_v41 = vmul.f32 %v7859_v34, %v975_v32  ;;  %v6831_v31 = vcombine.high %v1686_v28, %v1690_v29  ;;  %v1691_v32 = vld [vmem:[#allocation18 + $0x1a8] sm:$0xff] }
 0x3bb   : > { %v993_v46 = vmul.f32 %v986_v30, %v980_v35  ;;  %v1687_v30 = vld [vmem:[#allocation18 + $0x188] sm:$0xff] }
 0x3bc   : > { %v994_v47 = vmul.f32 %v990_v33, %v981_v41  ;;  %v6830_v33 = vcombine.low %v1686_v28, %v1690_v29  ;;  %v6832_v34 = vcombine.low %v1687_v30, %v1691_v32  ;;  %v6833_v35 = vcombine.high %v1687_v30, %v1691_v32  ;;  %v1698_v41 = vld [vmem:[#allocation18 + $0x1e0] sm:$0xff] }
 0x3bd   : > { %v1006_v49 = vadd.f32 %v999_v36, %v993_v46  ;;  %v1694_v36 = vld [vmem:[#allocation18 + $0x1c0] sm:$0xff] }
 0x3be   : > { %v1007_v50 = vadd.f32 %v1003_v44, %v994_v47  ;;  %v1695_v44 = vld [vmem:[#allocation18 + $0x1c8] sm:$0xff]  ;;  %v6839_v46 = vcombine.high %v1694_v36, %v1698_v41  ;;  %v1754_v32 = vld [vmem:[#allocation18 + $0x3a0] sm:$0xff] }
 0x3bf   : > { %vm1008_vm4 = vcmp.gt.f32.partialorder %v1006_v49, 0.0  ;;  %v1010_v51 = vmul.f32 0.2, %v1006_v49  ;;  %v1699_v47 = vld [vmem:[#allocation18 + $0x1e8] sm:$0xff] }
 0x3c0   : > { %vm1009_vm5 = vcmp.gt.f32.partialorder %v1007_v50, 0.0  ;;  %v1011_v45 = vmul.f32 0.2, %v1007_v50 }
 0x3c1   : > { %v1012_v53 = vsel %vm1008_vm4, %v1006_v49, %v1010_v51  ;;  %v6838_v49 = vcombine.low %v1694_v36, %v1698_v41  ;;  %v6841_v51 = vcombine.high %v1695_v44, %v1699_v47 }
 0x3c2   : > { %v1013_v56 = vsel %vm1009_vm5, %v1007_v50, %v1011_v45  ;;  %v1014_v58 = vpack.c.bf16 %v1012_v53, %v1012_v53  ;;  %v6840_v50 = vcombine.low %v1695_v44, %v1699_v47  ;;  %v1702_v45 = vld [vmem:[#allocation18 + $0x200] sm:$0xff]  ;;  %v1703_v53 = vld [vmem:[#allocation18 + $0x208] sm:$0xff] }
 0x3c3   : > { %v1015_v57 = vpack.c.bf16 %v1013_v56, %v1013_v56  ;;  %v6847_v48 = vcombine.high %v1702_v45, %v1706_v52  ;;  %v6846_v55 = vcombine.low %v1702_v45, %v1706_v52  ;;  %v6848_v56 = vcombine.low %v1703_v53, %v1707_v54  ;;  %v1762_v47 = vld [vmem:[#allocation18 + $0x3e0] sm:$0xff]  ;;  %v1763_v45 = vld [vmem:[#allocation18 + $0x3e8] sm:$0xff] }
 0x3c5   : > { %1432 = vmatprep.mubr.bf16.mxu0 %v1015_v57  ;;  %1473 = vmatprep.mubr.bf16.mxu1 %v1015_v57  ;;  %v6849_v57 = vcombine.high %v1703_v53, %v1707_v54  ;;  %v9416_v54 = vld [vmem:[#allocation18 + $0x420] sm:$0xff] }
 0x3c6   : > { %1433 = vmatmul.mubr.bf16.vlgmr.msra.gmra.mrb[4].mxu0 %v1014_v58  ;;  %1474 = vmatmul.mubr.bf16.vlgmr.msra.gmra.mrb[4].mxu1 %v1014_v58  ;;  %v1710_v58 = vld [vmem:[#allocation18 + $0x240] sm:$0xff] }
 0x3c7   : > { %3175 = vmatpush1.bf16.msra.mxu0 %v6782_v40  ;;  %3257 = vmatpush1.bf16.msra.mxu1 %v6784_v43  ;;  %v1674_v40 = vld [vmem:[#allocation18 + $0x120] sm:$0xff]  ;;  %v1675_v43 = vld [vmem:[#allocation18 + $0x128] sm:$0xff] }
 0x3c8   : > { %3176 = vmatprep.subr.bf16.mxu0 %v6791_v59  ;;  %3258 = vmatprep.subr.bf16.mxu1 %v6793_v60  ;;  %v6815_v13 = vcombine.high %v1670_v39, %v1674_v40  ;;  %v6817_v14 = vcombine.high %v1671_v42, %v1675_v43  ;;  %v6814_v15 = vcombine.low %v1670_v39, %v1674_v40  ;;  %v1714_v59 = vld [vmem:[#allocation18 + $0x260] sm:$0xff]  ;;  %v1711_v60 = vld [vmem:[#allocation18 + $0x248] sm:$0xff] }
 0x3c9   : > { %v6816_v16 = vcombine.low %v1671_v42, %v1675_v43  ;;  %v6855_v61 = vcombine.high %v1710_v58, %v1714_v59  ;;  %v6854_v63 = vcombine.low %v1710_v58, %v1714_v59  ;;  %v6856_v0 = vcombine.low %v1711_v60, %v1715_v62  ;;  %v1731_v40 = vld [vmem:[#allocation18 + $0x2e8] sm:$0xff] }
 0x3cb   : > { %3177 = vmatpush1.bf16.msra.mxu0 %v6790_v1  ;;  %3259 = vmatpush1.bf16.msra.mxu1 %v6792_v2  ;;  %v6857_v1 = vcombine.high %v1711_v60, %v1715_v62  ;;  %v1718_v2 = vld [vmem:[#allocation18 + $0x280] sm:$0xff] }
 0x3cc   : > { %3178 = vmatprep.subr.bf16.mxu0 %v6799_v3  ;;  %3260 = vmatprep.subr.bf16.mxu1 %v6801_v4  ;;  %v1722_v3 = vld [vmem:[#allocation18 + $0x2a0] sm:$0xff]  ;;  %v1719_v4 = vld [vmem:[#allocation18 + $0x288] sm:$0xff] }
 0x3cd   : > { %v6863_v5 = vcombine.high %v1718_v2, %v1722_v3  ;;  %v6862_v7 = vcombine.low %v1718_v2, %v1722_v3  ;;  %v6864_v8 = vcombine.low %v1719_v4, %v1723_v6 }
 0x3cf   : > { %3179 = vmatpush1.bf16.msra.mxu0 %v6798_v9  ;;  %3261 = vmatpush1.bf16.msra.mxu1 %v6800_v10  ;;  %v6865_v9 = vcombine.high %v1719_v4, %v1723_v6  ;;  %v1726_v10 = vld [vmem:[#allocation18 + $0x2c0] sm:$0xff] }
 0x3d0   : > { %3180 = vmatprep.subr.bf16.mxu0 %v6807_v37  ;;  %3262 = vmatprep.subr.bf16.mxu1 %v6809_v38  ;;  %v1730_v37 = vld [vmem:[#allocation18 + $0x2e0] sm:$0xff]  ;;  %v1727_v38 = vld [vmem:[#allocation18 + $0x2c8] sm:$0xff] }
 0x3d1   : > { %v6871_v39 = vcombine.high %v1726_v10, %v1730_v37  ;;  %v6870_v42 = vcombine.low %v1726_v10, %v1730_v37  ;;  %v6872_v43 = vcombine.low %v1727_v38, %v1731_v40 }
 0x3d3   : > { %3181 = vmatpush1.bf16.msra.mxu0 %v6806_v11  ;;  %3263 = vmatpush1.bf16.msra.mxu1 %v6808_v12  ;;  %v6873_v11 = vcombine.high %v1727_v38, %v1731_v40  ;;  %v1734_v12 = vld [vmem:[#allocation18 + $0x300] sm:$0xff] }
 0x3d4   : > { %3182 = vmatprep.subr.bf16.mxu0 %v6815_v13  ;;  %3264 = vmatprep.subr.bf16.mxu1 %v6817_v14  ;;  %v1738_v13 = vld [vmem:[#allocation18 + $0x320] sm:$0xff]  ;;  %v1735_v14 = vld [vmem:[#allocation18 + $0x308] sm:$0xff] }
 0x3d5   : > { %v6878_v17 = vcombine.low %v1734_v12, %v1738_v13 }
 0x3d7   : > { %3183 = vmatpush1.bf16.msra.mxu0 %v6814_v15  ;;  %3265 = vmatpush1.bf16.msra.mxu1 %v6816_v16  ;;  %v6879_v15 = vcombine.high %v1734_v12, %v1738_v13  ;;  %v1739_v16 = vld [vmem:[#allocation18 + $0x328] sm:$0xff] }
 0x3d8   : > { %3184 = vmatprep.subr.bf16.mxu0 %v6823_v20  ;;  %3266 = vmatprep.subr.bf16.mxu1 %v6825_v26  ;;  %v6880_v18 = vcombine.low %v1735_v14, %v1739_v16  ;;  %v6881_v19 = vcombine.high %v1735_v14, %v1739_v16  ;;  %v1742_v20 = vld [vmem:[#allocation18 + $0x340] sm:$0xff]  ;;  %v1747_v26 = vld [vmem:[#allocation18 + $0x368] sm:$0xff] }
 0x3d9   : > { %v6886_v28 = vcombine.low %v1742_v20, %v1746_v21 }
 0x3db   : > { %3185 = vmatpush1.bf16.msra.mxu0 %v6822_v22  ;;  %3267 = vmatpush1.bf16.msra.mxu1 %v6824_v23  ;;  %v1743_v22 = vld [vmem:[#allocation18 + $0x348] sm:$0xff]  ;;  %v6887_v23 = vcombine.high %v1742_v20, %v1746_v21 }
 0x3dc   : > { %3186 = vmatprep.subr.bf16.mxu0 %v6831_v31  ;;  %3268 = vmatprep.subr.bf16.mxu1 %v6833_v35  ;;  %v6888_v29 = vcombine.low %v1743_v22, %v1747_v26  ;;  %v6889_v30 = vcombine.high %v1743_v22, %v1747_v26  ;;  %v1750_v31 = vld [vmem:[#allocation18 + $0x380] sm:$0xff]  ;;  %v1755_v35 = vld [vmem:[#allocation18 + $0x3a8] sm:$0xff] }
 0x3dd   : > { %v6894_v36 = vcombine.low %v1750_v31, %v1754_v32 }
 0x3df   : > { %3187 = vmatpush1.bf16.msra.mxu0 %v6830_v33  ;;  %3269 = vmatpush1.bf16.msra.mxu1 %v6832_v34  ;;  %v1751_v33 = vld [vmem:[#allocation18 + $0x388] sm:$0xff]  ;;  %v6895_v34 = vcombine.high %v1750_v31, %v1754_v32 }
 0x3e0   : > { %3188 = vmatprep.subr.bf16.mxu0 %v6839_v46  ;;  %3270 = vmatprep.subr.bf16.mxu1 %v6841_v51  ;;  %v6896_v41 = vcombine.low %v1751_v33, %v1755_v35  ;;  %v6897_v44 = vcombine.high %v1751_v33, %v1755_v35  ;;  %v1758_v46 = vld [vmem:[#allocation18 + $0x3c0] sm:$0xff] }
 0x3e1   : > { %v6903_v51 = vcombine.high %v1758_v46, %v1762_v47 }
 0x3e3   : > { %3189 = vmatpush1.bf16.msra.mxu0 %v6838_v49  ;;  %3271 = vmatpush1.bf16.msra.mxu1 %v6840_v50  ;;  %v1759_v49 = vld [vmem:[#allocation18 + $0x3c8] sm:$0xff]  ;;  %v6902_v50 = vcombine.low %v1758_v46, %v1762_v47 }
 0x3e4   : > { %3190 = vmatprep.subr.bf16.mxu0 %v6847_v48  ;;  %3272 = vmatprep.subr.bf16.mxu1 %v6849_v57  ;;  %v6904_v52 = vcombine.low %v1759_v49, %v1763_v45  ;;  %v6905_v53 = vcombine.high %v1759_v49, %v1763_v45  ;;  %v9414_v48 = vld [vmem:[#allocation18 + $0x400] sm:$0xff]  ;;  %v9422_v57 = vld [vmem:[#allocation18 + $0x428] sm:$0xff] }
 0x3e5   : > { %v6910_v58 = vcombine.low %v9414_v48, %v9416_v54 }
 0x3e7   : > { %3191 = vmatpush1.bf16.msra.mxu0 %v6846_v55  ;;  %3273 = vmatpush1.bf16.msra.mxu1 %v6848_v56  ;;  %v9418_v55 = vld [vmem:[#allocation18 + $0x408] sm:$0xff]  ;;  %v6911_v56 = vcombine.high %v9414_v48, %v9416_v54 }
 0x3e8   : > { %3192 = vmatprep.subr.bf16.mxu0 %v6855_v61  ;;  %3274 = vmatprep.subr.bf16.mxu1 %v6857_v1  ;;  %v6912_v59 = vcombine.low %v9418_v55, %v9422_v57  ;;  %v6913_v60 = vcombine.high %v9418_v55, %v9422_v57 }
 0x3eb   : > { %3193 = vmatpush1.bf16.msra.mxu0 %v6854_v63  ;;  %3275 = vmatpush1.bf16.msra.mxu1 %v6856_v0 }
 0x3ec   : > { %3194 = vmatprep.subr.bf16.mxu0 %v6863_v5  ;;  %3276 = vmatprep.subr.bf16.mxu1 %v6865_v9 }
 0x3ef   : > { %3195 = vmatpush1.bf16.msra.mxu0 %v6862_v7  ;;  %3277 = vmatpush1.bf16.msra.mxu1 %v6864_v8 }
 0x3f0   : > { %3196 = vmatprep.subr.bf16.mxu0 %v6871_v39  ;;  %3278 = vmatprep.subr.bf16.mxu1 %v6873_v11 }
 0x3f3   : > { %3197 = vmatpush1.bf16.msra.mxu0 %v6870_v42  ;;  %3279 = vmatpush1.bf16.msra.mxu1 %v6872_v43 }
 0x3f4   : > { %3198 = vmatprep.subr.bf16.mxu0 %v6879_v15  ;;  %3280 = vmatprep.subr.bf16.mxu1 %v6881_v19 }
 0x3f7   : > { %3199 = vmatpush1.bf16.msra.mxu0 %v6878_v17  ;;  %3281 = vmatpush1.bf16.msra.mxu1 %v6880_v18 }
 0x3f8   : > { %3200 = vmatprep.subr.bf16.mxu0 %v6887_v23  ;;  %3282 = vmatprep.subr.bf16.mxu1 %v6889_v30 }
 0x3fb   : > { %3201 = vmatpush1.bf16.msra.mxu0 %v6886_v28  ;;  %3283 = vmatpush1.bf16.msra.mxu1 %v6888_v29 }
 0x3fc   : > { %3202 = vmatprep.subr.bf16.mxu0 %v6895_v34  ;;  %3284 = vmatprep.subr.bf16.mxu1 %v6897_v44 }
 0x3ff   : > { %3203 = vmatpush1.bf16.msra.mxu0 %v6894_v36  ;;  %3285 = vmatpush1.bf16.msra.mxu1 %v6896_v41 }
 0x400   : > { %3204 = vmatprep.subr.bf16.mxu0 %v6903_v51  ;;  %3286 = vmatprep.subr.bf16.mxu1 %v6905_v53 }
 0x403   : > { %3205 = vmatpush1.bf16.msra.mxu0 %v6902_v50  ;;  %3287 = vmatpush1.bf16.msra.mxu1 %v6904_v52 }
 0x404   : > { %3215 = vmatprep.subr.bf16.mxu0 %v6911_v56  ;;  %3297 = vmatprep.subr.bf16.mxu1 %v6913_v60 }
 0x499   : > { %v9430_v61 = vpop.f32.mrb[4].mxu0  ;;  %v9432_v62 = vpop.f32.mrb[4].mxu1 }
 0x49a   : > { %v1484_v63 = vrot.slane %v9430_v61, 4  ;;  %v1512_v0 = vmul.f32 %v9430_v61, %v9430_v61  ;;  %v1496_v1 = vrot.slane %v9432_v62, 4  ;;  %v1514_v2 = vmul.f32 %v9432_v62, %v9432_v62  ;;  %v9440_v3 = vpop.f32.mrb[5].mxu0  ;;  %v9442_v4 = vpop.f32.mrb[5].mxu1 }
 0x49b   : > { %v1490_v5 = vrot.slane %v9440_v3, 4  ;;  %v1513_v6 = vmul.f32 %v9440_v3, %v9440_v3  ;;  %v1502_v7 = vrot.slane %v9442_v4, 4  ;;  %v1515_v8 = vmul.f32 %v9442_v4, %v9442_v4  ;;  %v1438_v9 = vpop.f32.mrb[6].mxu0  ;;  %v1479_v10 = vpop.f32.mrb[6].mxu1 }
 0x49c   : > { %v1485_v37 = vadd.f32 %v1484_v63, %v9430_v61  ;;  %v1516_v38 = vrot.slane %v1512_v0, 4  ;;  %v1497_v39 = vadd.f32 %v1496_v1, %v9432_v62  ;;  %v1528_v40 = vrot.slane %v1514_v2, 4  ;;  %v1439_v42 = vpop.f32.mrb[7].mxu0  ;;  %v1480_v43 = vpop.f32.mrb[7].mxu1 }
 0x49d   : > { %v1491_v11 = vadd.f32 %v1490_v5, %v9440_v3  ;;  %v1522_v12 = vrot.slane %v1513_v6, 4  ;;  %v1503_v13 = vadd.f32 %v1502_v7, %v9442_v4  ;;  %v1534_v14 = vrot.slane %v1515_v8, 4 }
 0x49e   : > { %v1486_v15 = vrot.slane %v1485_v37, 2  ;;  %v1517_v16 = vadd.f32 %v1516_v38, %v1512_v0  ;;  %v1498_v17 = vrot.slane %v1497_v39, 2  ;;  %v1529_v18 = vadd.f32 %v1528_v40, %v1514_v2 }
 0x49f   : > { %v1492_v19 = vrot.slane %v1491_v11, 2  ;;  %v1523_v20 = vadd.f32 %v1522_v12, %v1513_v6  ;;  %v1504_v21 = vrot.slane %v1503_v13, 2  ;;  %v1535_v22 = vadd.f32 %v1534_v14, %v1515_v8 }
 0x4a0   : > { %v1487_v23 = vadd.f32 %v1486_v15, %v1485_v37  ;;  %v1518_v26 = vrot.slane %v1517_v16, 2  ;;  %v1499_v28 = vadd.f32 %v1498_v17, %v1497_v39  ;;  %v1530_v29 = vrot.slane %v1529_v18, 2 }
 0x4a1   : > { %v1493_v30 = vadd.f32 %v1492_v19, %v1491_v11  ;;  %v1524_v31 = vrot.slane %v1523_v20, 2  ;;  %v1505_v32 = vadd.f32 %v1504_v21, %v1503_v13  ;;  %v1536_v33 = vrot.slane %v1535_v22, 2 }
 0x4a2   : > { %v1488_v34 = vrot.slane %v1487_v23, 1  ;;  %v1519_v35 = vadd.f32 %v1518_v26, %v1517_v16  ;;  %v1500_v36 = vrot.slane %v1499_v28, 1  ;;  %v1531_v41 = vadd.f32 %v1530_v29, %v1529_v18  ;;  %v1482_v26 = vld [vmem:[#allocation15] sm:$0xf]  ;;  %v1483_v29 = vld [vmem:[#allocation17] sm:$0xf] }
 0x4a3   : > { %v1494_v44 = vrot.slane %v1493_v30, 1  ;;  %v1525_v46 = vadd.f32 %v1524_v31, %v1523_v20  ;;  %v1506_v47 = vrot.slane %v1505_v32, 1  ;;  %v1537_v49 = vadd.f32 %v1536_v33, %v1535_v22 }
 0x4a4   : > { %v1489_v50 = vadd.f32 %v1488_v34, %v1487_v23  ;;  %v1520_v51 = vrot.slane %v1519_v35, 1  ;;  %v1501_v45 = vadd.f32 %v1500_v36, %v1499_v28  ;;  %v1532_v52 = vrot.slane %v1531_v41, 1 }
 0x4a5   : > { %v1495_v53 = vadd.f32 %v1494_v44, %v1493_v30  ;;  %v1526_v56 = vrot.slane %v1525_v46, 1  ;;  %v1507_v60 = vadd.f32 %v1506_v47, %v1505_v32  ;;  %v1538_v63 = vrot.slane %v1537_v49, 1 }
 0x4a6   : > { %v1508_v0 = vmul.f32 0.125, %v1489_v50  ;;  %v1521_v1 = vadd.f32 %v1520_v51, %v1519_v35  ;;  %v1510_v2 = vmul.f32 0.125, %v1501_v45  ;;  %v1533_v5 = vadd.f32 %v1532_v52, %v1531_v41 }
 0x4a7   : > { %v1509_v6 = vmul.f32 0.125, %v1495_v53  ;;  %v1527_v7 = vadd.f32 %v1526_v56, %v1525_v46  ;;  %v1511_v8 = vmul.f32 0.125, %v1507_v60  ;;  %v1539_v9 = vadd.f32 %v1538_v63, %v1537_v49 }
 0x4a8   : > { %v1540_v10 = vmul.f32 0.125, %v1521_v1  ;;  %v1544_v37 = vmul.f32 %v1508_v0, %v1508_v0  ;;  %v1542_v38 = vmul.f32 0.125, %v1533_v5  ;;  %v1546_v39 = vmul.f32 %v1510_v2, %v1510_v2 }
 0x4a9   : > { %v1541_v40 = vmul.f32 0.125, %v1527_v7  ;;  %v1545_v42 = vmul.f32 %v1509_v6, %v1509_v6  ;;  %v1543_v11 = vmul.f32 0.125, %v1539_v9  ;;  %v1547_v12 = vmul.f32 %v1511_v8, %v1511_v8 }
 0x4aa   : > { %v1548_v43 = vsub.f32 %v1540_v10, %v1544_v37  ;;  %v1550_v13 = vsub.f32 %v1542_v38, %v1546_v39  ;;  %v9455_v28 = vsub.s32 2, %v9396_v24  ;;  %v9458_v30 = vsub.s32 3, %v9396_v24  ;;  %v1774_v37 = vld [vmem:[#allocation18 + $0x440] sm:$0xff] }
 0x4ab   : > { %v1549_v14 = vsub.f32 %v1541_v40, %v1545_v42  ;;  %v1551_v16 = vsub.f32 %v1543_v11, %v1547_v12  ;;  %v1556_v31 = vsub.f32 %v9430_v61, %v1508_v0  ;;  %v1576_v32 = vrot.slane %v1482_v26, %v9399_v25  ;;  %v1778_v39 = vld [vmem:[#allocation18 + $0x460] sm:$0xff]  ;;  %v1775_v40 = vld [vmem:[#allocation18 + $0x448] sm:$0xff] }
 0x4ac   : > { %v1552_v15 = vmax.f32 %v1548_v43, 0.0  ;;  %v1554_v17 = vmax.f32 %v1550_v13, 0.0  ;;  %v1558_v34 = vsub.f32 %v9432_v62, %v1510_v2  ;;  %v1584_v35 = vrot.slane %v1482_v26, %v9455_v28  ;;  %v1779_v42 = vld [vmem:[#allocation18 + $0x468] sm:$0xff]  ;;  %v1782_v13 = vld [vmem:[#allocation18 + $0x480] sm:$0xff] }
 0x4ad   : > { %v1553_v18 = vmax.f32 %v1549_v14, 0.0  ;;  %v1555_v20 = vmax.f32 %v1551_v16, 0.0  ;;  %v1601_v44 = vrot.slane %v1483_v29, %v9399_v25  ;;  %v1557_v46 = vsub.f32 %v9440_v3, %v1509_v6  ;;  %v1786_v16 = vld [vmem:[#allocation18 + $0x4a0] sm:$0xff] }
 0x4ae   : > { %v1560_v19 = vadd.f32 0.8, %v1552_v15  ;;  %v1562_v21 = vadd.f32 0.8, %v1554_v17  ;;  %v1580_v47 = vrot.slane %v1482_v26, %v9402_v27  ;;  %v1609_v51 = vrot.slane %v1483_v29, %v9455_v28  ;;  %v1783_v17 = vld [vmem:[#allocation18 + $0x488] sm:$0xff] }
 0x4af   : > { %v1561_v22 = vadd.f32 0.8, %v1553_v18  ;;  %v1563_v23 = vadd.f32 0.8, %v1555_v20  ;;  %v1559_v61 = vsub.f32 %v9442_v4, %v1511_v8  ;;  %v1588_v45 = vrot.slane %v1482_v26, %v9458_v30  ;;  %v1787_v18 = vld [vmem:[#allocation18 + $0x4a8] sm:$0xff]  ;;  %v1790_v26 = vld [vmem:[#allocation18 + $0x4c0] sm:$0xff] }
 0x4b0   : > { %7860 = vrsqrt.f32 %v1560_v19  ;;  %v1605_v56 = vrot.slane %v1483_v29, %v9402_v27  ;;  %v1613_v0 = vrot.slane %v1483_v29, %v9458_v30  ;;  %v6919_v14 = vcombine.high %v1774_v37, %v1778_v39  ;;  %v1794_v29 = vld [vmem:[#allocation18 + $0x4e0] sm:$0xff] }
 0x4b1   : > { %7862 = vrsqrt.f32 %v1562_v21  ;;  %v6921_v15 = vcombine.high %v1775_v40, %v1779_v42  ;;  %v6918_v20 = vcombine.low %v1774_v37, %v1778_v39  ;;  %v6920_v21 = vcombine.low %v1775_v40, %v1779_v42  ;;  %v1834_v39 = vld [vmem:[#allocation18 + $0x620] sm:$0xff]  ;;  %v1831_v40 = vld [vmem:[#allocation18 + $0x608] sm:$0xff] }
 0x4b2   : > { %7864 = vrsqrt.f32 %v1561_v22  ;;  %v6927_v22 = vcombine.high %v1782_v13, %v1786_v16  ;;  %v6926_v48 = vcombine.low %v1782_v13, %v1786_v16  ;;  %v6928_v54 = vcombine.low %v1783_v17, %v1787_v18  ;;  %v1835_v42 = vld [vmem:[#allocation18 + $0x628] sm:$0xff]  ;;  %v1838_v16 = vld [vmem:[#allocation18 + $0x640] sm:$0xff] }
 0x4b3   : > { %7866 = vrsqrt.f32 %v1563_v23  ;;  %v6929_v23 = vcombine.high %v1783_v17, %v1787_v18  ;;  %v6935_v55 = vcombine.high %v1790_v26, %v1794_v29  ;;  %v1842_v17 = vld [vmem:[#allocation18 + $0x660] sm:$0xff]  ;;  %v1839_v18 = vld [vmem:[#allocation18 + $0x648] sm:$0xff] }
 0x4ba   : > { %v7861_v33 = vpop.eup %7860 }
 0x4bb   : > { %v7863_v36 = vpop.eup %7862  ;;  %v1568_v41 = vmul.f32 %v7861_v33, %v1556_v31  ;;  %v1791_v31 = vld [vmem:[#allocation18 + $0x4c8] sm:$0xff] }
 0x4bc   : > { %v7865_v49 = vpop.eup %7864  ;;  %v1570_v50 = vmul.f32 %v7863_v36, %v1558_v34  ;;  %v1799_v33 = vld [vmem:[#allocation18 + $0x508] sm:$0xff] }
 0x4bd   : > { %v7867_v52 = vpop.eup %7866  ;;  %v1593_v62 = vmul.f32 %v1576_v32, %v1568_v41  ;;  %v1569_v53 = vmul.f32 %v7865_v49, %v1557_v46  ;;  %v1795_v32 = vld [vmem:[#allocation18 + $0x4e8] sm:$0xff]  ;;  %v1806_v46 = vld [vmem:[#allocation18 + $0x540] sm:$0xff] }
 0x4be   : > { %v1595_v60 = vmul.f32 %v1584_v35, %v1570_v50  ;;  %v1571_v63 = vmul.f32 %v7867_v52, %v1559_v61  ;;  %v6937_v57 = vcombine.high %v1791_v31, %v1795_v32  ;;  %v1803_v34 = vld [vmem:[#allocation18 + $0x528] sm:$0xff]  ;;  %v6934_v35 = vcombine.low %v1790_v26, %v1794_v29  ;;  %v1846_v29 = vld [vmem:[#allocation18 + $0x680] sm:$0xff] }
 0x4bf   : > { %v1618_v3 = vadd.f32 %v1601_v44, %v1593_v62  ;;  %v1594_v1 = vmul.f32 %v1580_v47, %v1569_v53  ;;  %v6936_v36 = vcombine.low %v1791_v31, %v1795_v32  ;;  %v6945_v44 = vcombine.high %v1799_v33, %v1803_v34  ;;  %v1810_v47 = vld [vmem:[#allocation18 + $0x560] sm:$0xff]  ;;  %v1807_v49 = vld [vmem:[#allocation18 + $0x548] sm:$0xff] }
 0x4c0   : > { %v9472_v2 = vadd.f32 %v1609_v51, %v1595_v60  ;;  %v1596_v5 = vmul.f32 %v1588_v45, %v1571_v63  ;;  %v1811_v50 = vld [vmem:[#allocation18 + $0x568] sm:$0xff]  ;;  %v6944_v61 = vcombine.low %v1799_v33, %v1803_v34  ;;  %v6951_v45 = vcombine.high %v1806_v46, %v1810_v47  ;;  %v1814_v62 = vld [vmem:[#allocation18 + $0x580] sm:$0xff] }
 0x4c1   : > { %v1619_v6 = vadd.f32 %v1605_v56, %v1594_v1  ;;  %vm1622_vm6 = vcmp.gt.f32.partialorder %v1618_v3, 0.0  ;;  %v1626_v7 = vmul.f32 0.2, %v1618_v3  ;;  %v6953_v52 = vcombine.high %v1807_v49, %v1811_v50  ;;  %v1818_v53 = vld [vmem:[#allocation18 + $0x5a0] sm:$0xff]  ;;  %v1815_v56 = vld [vmem:[#allocation18 + $0x588] sm:$0xff] }
 0x4c2   : > { %v1621_v4 = vadd.f32 %v1613_v0, %v1596_v5  ;;  %v1819_v60 = vld [vmem:[#allocation18 + $0x5a8] sm:$0xff]  ;;  %v6950_v63 = vcombine.low %v1806_v46, %v1810_v47  ;;  %v6952_v0 = vcombine.low %v1807_v49, %v1811_v50  ;;  %v1822_v5 = vld [vmem:[#allocation18 + $0x5c0] sm:$0xff]  ;;  %vm1624_vm9 = vcmp.gt.f32.partialorder %v9472_v2, 0.0 }
 0x4c3   : > { %vm1623_vm7 = vcmp.gt.f32.partialorder %v1619_v6, 0.0  ;;  %v1627_v8 = vmul.f32 0.2, %v1619_v6  ;;  %v1630_v9 = vsel %vm1622_vm6, %v1618_v3, %v1626_v7  ;;  %v6959_v3 = vcombine.high %v1814_v62, %v1818_v53  ;;  %v1823_v7 = vld [vmem:[#allocation18 + $0x5c8] sm:$0xff]  ;;  %v1850_v31 = vld [vmem:[#allocation18 + $0x6a0] sm:$0xff] }
 0x4c4   : > { %vm1625_vm8 = vcmp.gt.f32.partialorder %v1621_v4, 0.0  ;;  %v1629_v10 = vmul.f32 0.2, %v1621_v4  ;;  %v9476_v12 = vpack.c.bf16 %v1630_v9, %v1630_v9  ;;  %v6961_v1 = vcombine.high %v1815_v56, %v1819_v60  ;;  %v1847_v32 = vld [vmem:[#allocation18 + $0x688] sm:$0xff]  ;;  %v1858_v33 = vld [vmem:[#allocation18 + $0x6e0] sm:$0xff] }
 0x4c5   : > { %v1631_v38 = vsel %vm1623_vm7, %v1619_v6, %v1627_v8  ;;  %v1826_v6 = vld [vmem:[#allocation18 + $0x5e0] sm:$0xff]  ;;  %v6958_v8 = vcombine.low %v1814_v62, %v1818_v53  ;;  %v6960_v9 = vcombine.low %v1815_v56, %v1819_v60  ;;  %v1855_v34 = vld [vmem:[#allocation18 + $0x6c8] sm:$0xff] }
 0x4c6   : > { %v9474_v43 = vpack.c.bf16 %v1631_v38, %v1631_v38  ;;  %v1633_v11 = vsel %vm1625_vm8, %v1621_v4, %v1629_v10  ;;  %v1827_v4 = vld [vmem:[#allocation18 + $0x5e8] sm:$0xff]  ;;  %v6967_v10 = vcombine.high %v1822_v5, %v1826_v6  ;;  %v1830_v38 = vld [vmem:[#allocation18 + $0x600] sm:$0xff] }
 0x4c7   : > { %v9482_v19 = vpack.c.bf16 %v1633_v11, %v1633_v11  ;;  %v6969_v37 = vcombine.high %v1823_v7, %v1827_v4  ;;  %v6966_v11 = vcombine.low %v1822_v5, %v1826_v6  ;;  %v6968_v13 = vcombine.low %v1823_v7, %v1827_v4  ;;  %v1862_v47 = vld [vmem:[#allocation18 + $0x700] sm:$0xff]  ;;  %v1863_v50 = vld [vmem:[#allocation18 + $0x708] sm:$0xff] }
 0x4c8   : > { %3206 = vmatprep.mubr.bf16.mxu0 %v9474_v43  ;;  %3288 = vmatprep.mubr.bf16.mxu1 %v9474_v43  ;;  %v1866_v49 = vld [vmem:[#allocation18 + $0x720] sm:$0xff]  ;;  %v1871_v60 = vld [vmem:[#allocation18 + $0x748] sm:$0xff] }
 0x4c9   : > { %3207 = vmatmul.mubr.bf16.vlgmr.msra.gmra.mrb[8].mxu0 %v9476_v12  ;;  %3289 = vmatmul.mubr.bf16.vlgmr.msra.gmra.mrb[8].mxu1 %v9476_v12  ;;  %v1870_v53 = vld [vmem:[#allocation18 + $0x740] sm:$0xff]  ;;  %v1879_v4 = vld [vmem:[#allocation18 + $0x788] sm:$0xff] }
 0x4ca   : > { %3216 = vmatpush1.bf16.msra.mxu0 %v6910_v58  ;;  %3298 = vmatpush1.bf16.msra.mxu1 %v6912_v59  ;;  %v1798_v58 = vld [vmem:[#allocation18 + $0x500] sm:$0xff] }
 0x4cb   : > { %3247 = vmatprep.mubr.bf16.mxu0 %v9482_v19  ;;  %3329 = vmatprep.mubr.bf16.mxu1 %v9482_v19  ;;  %v1802_v59 = vld [vmem:[#allocation18 + $0x520] sm:$0xff] }
 0x4cc   : > { %3217 = vmatprep.subr.bf16.mxu0 %v6919_v14  ;;  %3299 = vmatprep.subr.bf16.mxu1 %v6921_v15  ;;  %v6943_v41 = vcombine.high %v1798_v58, %v1802_v59  ;;  %v6942_v51 = vcombine.low %v1798_v58, %v1802_v59  ;;  %v6975_v14 = vcombine.high %v1830_v38, %v1834_v39  ;;  %v1854_v59 = vld [vmem:[#allocation18 + $0x6c0] sm:$0xff] }
 0x4cd   : > { %v6977_v15 = vcombine.high %v1831_v40, %v1835_v42  ;;  %v1874_v56 = vld [vmem:[#allocation18 + $0x760] sm:$0xff] }
 0x4ce   : > { %3218 = vmatpush1.bf16.msra.mxu0 %v6918_v20  ;;  %3300 = vmatpush1.bf16.msra.mxu1 %v6920_v21  ;;  %v1843_v20 = vld [vmem:[#allocation18 + $0x668] sm:$0xff]  ;;  %v6974_v21 = vcombine.low %v1830_v38, %v1834_v39  ;;  %v1878_v6 = vld [vmem:[#allocation18 + $0x780] sm:$0xff] }
 0x4cf   : > { %3219 = vmatprep.subr.bf16.mxu0 %v6927_v22  ;;  %3301 = vmatprep.subr.bf16.mxu1 %v6929_v23  ;;  %v6976_v22 = vcombine.low %v1831_v40, %v1835_v42  ;;  %v6983_v23 = vcombine.high %v1838_v16, %v1842_v17  ;;  %v6985_v26 = vcombine.high %v1839_v18, %v1843_v20  ;;  %v1882_v7 = vld [vmem:[#allocation18 + $0x7a0] sm:$0xff]  ;;  %v1887_v42 = vld [vmem:[#allocation18 + $0x7c8] sm:$0xff] }
 0x4d0   : > { %v1886_v39 = vld [vmem:[#allocation18 + $0x7c0] sm:$0xff] }
 0x4d1   : > { %v1890_v40 = vld [vmem:[#allocation18 + $0x7e0] sm:$0xff] }
 0x4d2   : > { %3220 = vmatpush1.bf16.msra.mxu0 %v6926_v48  ;;  %3302 = vmatpush1.bf16.msra.mxu1 %v6928_v54  ;;  %v1851_v48 = vld [vmem:[#allocation18 + $0x6a8] sm:$0xff]  ;;  %v6982_v54 = vcombine.low %v1838_v16, %v1842_v17  ;;  %v1640_v17 = vld [vmem:[#allocation18 + $0x10] sm:$0xff] }
 0x4d3   : > { %3221 = vmatprep.subr.bf16.mxu0 %v6935_v55  ;;  %3303 = vmatprep.subr.bf16.mxu1 %v6937_v57  ;;  %v6984_v55 = vcombine.low %v1839_v18, %v1843_v20  ;;  %v6991_v57 = vcombine.high %v1846_v29, %v1850_v31  ;;  %v6993_v58 = vcombine.high %v1847_v32, %v1851_v48  ;;  %v1628_v18 = vmul.f32 0.2, %v9472_v2  ;;  %v1644_v20 = vld [vmem:[#allocation18 + $0x30] sm:$0xff] }
 0x4d6   : > { %3222 = vmatpush1.bf16.msra.mxu0 %v6934_v35  ;;  %3304 = vmatpush1.bf16.msra.mxu1 %v6936_v36  ;;  %v1859_v35 = vld [vmem:[#allocation18 + $0x6e8] sm:$0xff]  ;;  %v6990_v36 = vcombine.low %v1846_v29, %v1850_v31  ;;  %v6787_v29 = vcombine.high %v1640_v17, %v1644_v20 }
 0x4d7   : > { %3223 = vmatprep.subr.bf16.mxu0 %v6943_v41  ;;  %3305 = vmatprep.subr.bf16.mxu1 %v6945_v44  ;;  %v6992_v41 = vcombine.low %v1847_v32, %v1851_v48  ;;  %v6999_v44 = vcombine.high %v1854_v59, %v1858_v33  ;;  %v7001_v46 = vcombine.high %v1855_v34, %v1859_v35  ;;  %v1648_v48 = vld [vmem:[#allocation18 + $0x50] sm:$0xff] }
 0x4d8   : > { %v1632_v32 = vsel %vm1624_vm9, %v9472_v2, %v1628_v18  ;;  %v1657_v2 = vld [vmem:[#allocation18 + $0x98] sm:$0xff] }
 0x4da   : > { %3224 = vmatpush1.bf16.msra.mxu0 %v6942_v51  ;;  %3306 = vmatpush1.bf16.msra.mxu1 %v6944_v61  ;;  %v1867_v51 = vld [vmem:[#allocation18 + $0x728] sm:$0xff]  ;;  %v6998_v61 = vcombine.low %v1854_v59, %v1858_v33  ;;  %v9495_v59 = vpack.c.bf16 %v1632_v32, %v1632_v32 }
 0x4db   : > { %3225 = vmatprep.subr.bf16.mxu0 %v6951_v45  ;;  %3307 = vmatprep.subr.bf16.mxu1 %v6953_v52  ;;  %v7000_v45 = vcombine.low %v1855_v34, %v1859_v35  ;;  %v7007_v52 = vcombine.high %v1862_v47, %v1866_v49  ;;  %v7009_v62 = vcombine.high %v1863_v50, %v1867_v51 }
 0x4de   : > { %3226 = vmatpush1.bf16.msra.mxu0 %v6950_v63  ;;  %3308 = vmatpush1.bf16.msra.mxu1 %v6952_v0  ;;  %v1875_v63 = vld [vmem:[#allocation18 + $0x768] sm:$0xff]  ;;  %v7006_v0 = vcombine.low %v1862_v47, %v1866_v49 }
 0x4df   : > { %3227 = vmatprep.subr.bf16.mxu0 %v6959_v3  ;;  %3309 = vmatprep.subr.bf16.mxu1 %v6961_v1  ;;  %v7008_v3 = vcombine.low %v1863_v50, %v1867_v51  ;;  %v7015_v1 = vcombine.high %v1870_v53, %v1874_v56  ;;  %v7017_v5 = vcombine.high %v1871_v60, %v1875_v63  ;;  %v1664_v51 = vld [vmem:[#allocation18 + $0xd0] sm:$0xff] }
 0x4e2   : > { %3228 = vmatpush1.bf16.msra.mxu0 %v6958_v8  ;;  %3310 = vmatpush1.bf16.msra.mxu1 %v6960_v9  ;;  %v1883_v8 = vld [vmem:[#allocation18 + $0x7a8] sm:$0xff]  ;;  %v7014_v9 = vcombine.low %v1870_v53, %v1874_v56 }
 0x4e3   : > { %3229 = vmatprep.subr.bf16.mxu0 %v6967_v10  ;;  %3311 = vmatprep.subr.bf16.mxu1 %v6969_v37  ;;  %v7016_v10 = vcombine.low %v1871_v60, %v1875_v63  ;;  %v7023_v37 = vcombine.high %v1878_v6, %v1882_v7  ;;  %v7025_v38 = vcombine.high %v1879_v4, %v1883_v8  ;;  %v1672_v63 = vld [vmem:[#allocation18 + $0x110] sm:$0xff] }
 0x4e6   : > { %3230 = vmatpush1.bf16.msra.mxu0 %v6966_v11  ;;  %3312 = vmatpush1.bf16.msra.mxu1 %v6968_v13  ;;  %v1891_v11 = vld [vmem:[#allocation18 + $0x7e8] sm:$0xff]  ;;  %v7022_v13 = vcombine.low %v1878_v6, %v1882_v7 }
 0x4e7   : > { %3231 = vmatprep.subr.bf16.mxu0 %v6975_v14  ;;  %3313 = vmatprep.subr.bf16.mxu1 %v6977_v15  ;;  %v7024_v14 = vcombine.low %v1879_v4, %v1883_v8  ;;  %v7031_v15 = vcombine.high %v1886_v39, %v1890_v40  ;;  %v7033_v16 = vcombine.high %v1887_v42, %v1891_v11  ;;  %v1680_v4 = vld [vmem:[#allocation18 + $0x150] sm:$0xff] }
 0x4e8   : > { %v1684_v8 = vld [vmem:[#allocation18 + $0x170] sm:$0xff] }
 0x4ea   : > { %3232 = vmatpush1.bf16.msra.mxu0 %v6974_v21  ;;  %3314 = vmatpush1.bf16.msra.mxu1 %v6976_v22  ;;  %v1641_v21 = vld [vmem:[#allocation18 + $0x18] sm:$0xff] }
 0x4eb   : > { %3233 = vmatprep.subr.bf16.mxu0 %v6983_v23  ;;  %3315 = vmatprep.subr.bf16.mxu1 %v6985_v26  ;;  %v1645_v22 = vld [vmem:[#allocation18 + $0x38] sm:$0xff]  ;;  %v7030_v23 = vcombine.low %v1886_v39, %v1890_v40  ;;  %v7032_v26 = vcombine.low %v1887_v42, %v1891_v11  ;;  %v6827_v39 = vcombine.high %v1680_v4, %v1684_v8  ;;  %v1688_v42 = vld [vmem:[#allocation18 + $0x190] sm:$0xff] }
 0x4ec   : > { %v6789_v31 = vcombine.high %v1641_v21, %v1645_v22  ;;  %v6788_v33 = vcombine.low %v1641_v21, %v1645_v22  ;;  %v1692_v11 = vld [vmem:[#allocation18 + $0x1b0] sm:$0xff]  ;;  %v1697_v22 = vld [vmem:[#allocation18 + $0x1d8] sm:$0xff] }
 0x4ed   : > { %v1700_v21 = vld [vmem:[#allocation18 + $0x1f0] sm:$0xff] }
 0x4ee   : > { %3234 = vmatpush1.bf16.msra.mxu0 %v6982_v54  ;;  %3316 = vmatpush1.bf16.msra.mxu1 %v6984_v55  ;;  %v1652_v54 = vld [vmem:[#allocation18 + $0x70] sm:$0xff]  ;;  %v1649_v55 = vld [vmem:[#allocation18 + $0x58] sm:$0xff] }
 0x4ef   : > { %3235 = vmatprep.subr.bf16.mxu0 %v6991_v57  ;;  %3317 = vmatprep.subr.bf16.mxu1 %v6993_v58  ;;  %v1653_v57 = vld [vmem:[#allocation18 + $0x78] sm:$0xff]  ;;  %v6786_v58 = vcombine.low %v1640_v17, %v1644_v20  ;;  %v6795_v34 = vcombine.high %v1648_v48, %v1652_v54  ;;  %v6835_v17 = vcombine.high %v1688_v42, %v1692_v11  ;;  %v1696_v20 = vld [vmem:[#allocation18 + $0x1d0] sm:$0xff] }
 0x4f0   : > { %v6797_v35 = vcombine.high %v1649_v55, %v1653_v57  ;;  %v6796_v47 = vcombine.low %v1649_v55, %v1653_v57  ;;  %v1705_v55 = vld [vmem:[#allocation18 + $0x218] sm:$0xff] }
 0x4f1   : > { %v1709_v57 = vld [vmem:[#allocation18 + $0x238] sm:$0xff] }
 0x4f2   : > { %3236 = vmatpush1.bf16.msra.mxu0 %v6990_v36  ;;  %3318 = vmatpush1.bf16.msra.mxu1 %v6992_v41  ;;  %v1656_v36 = vld [vmem:[#allocation18 + $0x90] sm:$0xff] }
 0x4f3   : > { %3237 = vmatprep.subr.bf16.mxu0 %v6999_v44  ;;  %3319 = vmatprep.subr.bf16.mxu1 %v7001_v46  ;;  %v1660_v41 = vld [vmem:[#allocation18 + $0xb0] sm:$0xff]  ;;  %v1661_v44 = vld [vmem:[#allocation18 + $0xb8] sm:$0xff]  ;;  %v6794_v46 = vcombine.low %v1648_v48, %v1652_v54 }
 0x4f4   : > { %v6803_v49 = vcombine.high %v1656_v36, %v1660_v41  ;;  %v6805_v50 = vcombine.high %v1657_v2, %v1661_v44  ;;  %v6804_v53 = vcombine.low %v1657_v2, %v1661_v44  ;;  %v1704_v48 = vld [vmem:[#allocation18 + $0x210] sm:$0xff]  ;;  %v1713_v2 = vld [vmem:[#allocation18 + $0x258] sm:$0xff] }
 0x4f5   : > { %v1708_v54 = vld [vmem:[#allocation18 + $0x230] sm:$0xff]  ;;  %v1717_v44 = vld [vmem:[#allocation18 + $0x278] sm:$0xff] }
 0x4f6   : > { %3238 = vmatpush1.bf16.msra.mxu0 %v6998_v61  ;;  %3320 = vmatpush1.bf16.msra.mxu1 %v7000_v45  ;;  %v1668_v61 = vld [vmem:[#allocation18 + $0xf0] sm:$0xff]  ;;  %v1665_v45 = vld [vmem:[#allocation18 + $0xd8] sm:$0xff] }
 0x4f7   : > { %3239 = vmatprep.subr.bf16.mxu0 %v7007_v52  ;;  %3321 = vmatprep.subr.bf16.mxu1 %v7009_v62  ;;  %v1669_v52 = vld [vmem:[#allocation18 + $0xf8] sm:$0xff]  ;;  %v6802_v62 = vcombine.low %v1656_v36, %v1660_v41  ;;  %v6811_v56 = vcombine.high %v1664_v51, %v1668_v61  ;;  %v1712_v36 = vld [vmem:[#allocation18 + $0x250] sm:$0xff] }
 0x4f8   : > { %v6813_v60 = vcombine.high %v1665_v45, %v1669_v52  ;;  %v1716_v41 = vld [vmem:[#allocation18 + $0x270] sm:$0xff] }
 0x4fa   : > { %3240 = vmatpush1.bf16.msra.mxu0 %v7006_v0  ;;  %3322 = vmatpush1.bf16.msra.mxu1 %v7008_v3  ;;  %v1676_v0 = vld [vmem:[#allocation18 + $0x130] sm:$0xff]  ;;  %v1677_v3 = vld [vmem:[#allocation18 + $0x138] sm:$0xff] }
 0x4fb   : > { %3241 = vmatprep.subr.bf16.mxu0 %v7015_v1  ;;  %3323 = vmatprep.subr.bf16.mxu1 %v7017_v5  ;;  %v6810_v1 = vcombine.low %v1664_v51, %v1668_v61  ;;  %v6812_v5 = vcombine.low %v1665_v45, %v1669_v52  ;;  %v6819_v6 = vcombine.high %v1672_v63, %v1676_v0  ;;  %v1720_v51 = vld [vmem:[#allocation18 + $0x290] sm:$0xff]  ;;  %v1721_v45 = vld [vmem:[#allocation18 + $0x298] sm:$0xff] }
 0x4fc   : > { %v1724_v61 = vld [vmem:[#allocation18 + $0x2b0] sm:$0xff]  ;;  %v1725_v52 = vld [vmem:[#allocation18 + $0x2b8] sm:$0xff] }
 0x4fe   : > { %3242 = vmatpush1.bf16.msra.mxu0 %v7014_v9  ;;  %3324 = vmatpush1.bf16.msra.mxu1 %v7016_v10  ;;  %v1681_v9 = vld [vmem:[#allocation18 + $0x158] sm:$0xff] }
 0x4ff   : > { %3243 = vmatprep.subr.bf16.mxu0 %v7023_v37  ;;  %3325 = vmatprep.subr.bf16.mxu1 %v7025_v38  ;;  %v1685_v10 = vld [vmem:[#allocation18 + $0x178] sm:$0xff]  ;;  %v6818_v37 = vcombine.low %v1672_v63, %v1676_v0  ;;  %v1728_v63 = vld [vmem:[#allocation18 + $0x2d0] sm:$0xff] }
 0x500   : > { %v6829_v40 = vcombine.high %v1681_v9, %v1685_v10  ;;  %v1732_v0 = vld [vmem:[#allocation18 + $0x2f0] sm:$0xff] }
 0x502   : > { %3244 = vmatpush1.bf16.msra.mxu0 %v7022_v13  ;;  %3326 = vmatpush1.bf16.msra.mxu1 %v7024_v14  ;;  %v1689_v13 = vld [vmem:[#allocation18 + $0x198] sm:$0xff] }
 0x503   : > { %3245 = vmatprep.subr.bf16.mxu0 %v7031_v15  ;;  %3327 = vmatprep.subr.bf16.mxu1 %v7033_v16  ;;  %v1693_v14 = vld [vmem:[#allocation18 + $0x1b8] sm:$0xff]  ;;  %v6826_v15 = vcombine.low %v1680_v4, %v1684_v8  ;;  %v6828_v16 = vcombine.low %v1681_v9, %v1685_v10  ;;  %v1736_v4 = vld [vmem:[#allocation18 + $0x310] sm:$0xff] }
 0x504   : > { %v6837_v18 = vcombine.high %v1689_v13, %v1693_v14  ;;  %v1740_v8 = vld [vmem:[#allocation18 + $0x330] sm:$0xff]  ;;  %v1737_v9 = vld [vmem:[#allocation18 + $0x318] sm:$0xff] }
 0x505   : > { %v1741_v10 = vld [vmem:[#allocation18 + $0x338] sm:$0xff] }
 0x506   : > { %3246 = vmatpush1.bf16.msra.mxu0 %v7030_v23  ;;  %3328 = vmatpush1.bf16.msra.mxu1 %v7032_v26  ;;  %v1701_v23 = vld [vmem:[#allocation18 + $0x1f8] sm:$0xff]  ;;  %v6834_v26 = vcombine.low %v1688_v42, %v1692_v11  ;;  %v1744_v42 = vld [vmem:[#allocation18 + $0x350] sm:$0xff] }
 0x507   : > { %3338 = vmatprep.subr.bf16.mxu0 %v6787_v29  ;;  %3420 = vmatprep.subr.bf16.mxu1 %v6789_v31  ;;  %v6836_v29 = vcombine.low %v1689_v13, %v1693_v14  ;;  %v6843_v31 = vcombine.high %v1696_v20, %v1700_v21  ;;  %v6845_v32 = vcombine.high %v1697_v22, %v1701_v23  ;;  %v1748_v11 = vld [vmem:[#allocation18 + $0x370] sm:$0xff]  ;;  %v1745_v13 = vld [vmem:[#allocation18 + $0x358] sm:$0xff] }
 0x508   : > { %v1749_v14 = vld [vmem:[#allocation18 + $0x378] sm:$0xff] }
 0x509   : > { %3248 = vmatmul.mubr.bf16.vlgmr.msra.gmra.mrb[8].mxu0 %v9495_v59  ;;  %3330 = vmatmul.mubr.bf16.vlgmr.msra.gmra.mrb[8].mxu1 %v9495_v59 }
 0x50a   : > { %3339 = vmatpush1.bf16.msra.mxu0 %v6786_v58  ;;  %3370 = vmatprep.mubr.bf16.mxu0 %v9474_v43  ;;  %v6842_v58 = vcombine.low %v1696_v20, %v1700_v21  ;;  %v1752_v20 = vld [vmem:[#allocation18 + $0x390] sm:$0xff] }
 0x50b   : > { %3421 = vmatpush1.bf16.msra.mxu1 %v6788_v33  ;;  %3452 = vmatprep.mubr.bf16.mxu1 %v9474_v43  ;;  %v1673_v43 = vld [vmem:[#allocation18 + $0x118] sm:$0xff]  ;;  %v6844_v33 = vcombine.low %v1697_v22, %v1701_v23  ;;  %v1756_v21 = vld [vmem:[#allocation18 + $0x3b0] sm:$0xff] }
 0x50c   : > { %3340 = vmatprep.subr.bf16.mxu0 %v6795_v34  ;;  %3422 = vmatprep.subr.bf16.mxu1 %v6797_v35  ;;  %v6821_v7 = vcombine.high %v1673_v43, %v1677_v3  ;;  %v6820_v38 = vcombine.low %v1673_v43, %v1677_v3  ;;  %v6851_v34 = vcombine.high %v1704_v48, %v1708_v54  ;;  %v1729_v43 = vld [vmem:[#allocation18 + $0x2d8] sm:$0xff] }
 0x50d   : > { %v6853_v35 = vcombine.high %v1705_v55, %v1709_v57  ;;  %v1733_v3 = vld [vmem:[#allocation18 + $0x2f8] sm:$0xff] }
 0x50e   : > { %3341 = vmatpush1.bf16.msra.mxu0 %v6794_v46  ;;  %v6850_v46 = vcombine.low %v1704_v48, %v1708_v54  ;;  %v1753_v22 = vld [vmem:[#allocation18 + $0x398] sm:$0xff]  ;;  %v1760_v48 = vld [vmem:[#allocation18 + $0x3d0] sm:$0xff] }
 0x50f   : > { %3423 = vmatpush1.bf16.msra.mxu1 %v6796_v47  ;;  %3342 = vmatprep.subr.bf16.mxu0 %v6803_v49  ;;  %v6852_v47 = vcombine.low %v1705_v55, %v1709_v57  ;;  %v6859_v49 = vcombine.high %v1712_v36, %v1716_v41  ;;  %v1757_v23 = vld [vmem:[#allocation18 + $0x3b8] sm:$0xff]  ;;  %v1764_v54 = vld [vmem:[#allocation18 + $0x3f0] sm:$0xff] }
 0x510   : > { %3424 = vmatprep.subr.bf16.mxu1 %v6805_v50  ;;  %v6861_v50 = vcombine.high %v1713_v2, %v1717_v44  ;;  %v1761_v55 = vld [vmem:[#allocation18 + $0x3d8] sm:$0xff] }
 0x511   : > { %v1765_v57 = vld [vmem:[#allocation18 + $0x3f8] sm:$0xff] }
 0x512   : > { %3343 = vmatpush1.bf16.msra.mxu0 %v6802_v62  ;;  %v6858_v62 = vcombine.low %v1712_v36, %v1716_v41  ;;  %v1768_v36 = vld [vmem:[#allocation18 + $0x410] sm:$0xff] }
 0x513   : > { %3425 = vmatpush1.bf16.msra.mxu1 %v6804_v53  ;;  %3344 = vmatprep.subr.bf16.mxu0 %v6811_v56  ;;  %v6860_v53 = vcombine.low %v1713_v2, %v1717_v44  ;;  %v6867_v56 = vcombine.high %v1720_v51, %v1724_v61  ;;  %v1772_v41 = vld [vmem:[#allocation18 + $0x430] sm:$0xff]  ;;  %v1769_v2 = vld [vmem:[#allocation18 + $0x418] sm:$0xff] }
 0x514   : > { %3426 = vmatprep.subr.bf16.mxu1 %v6813_v60  ;;  %v6869_v60 = vcombine.high %v1721_v45, %v1725_v52  ;;  %v1773_v44 = vld [vmem:[#allocation18 + $0x438] sm:$0xff] }
 0x516   : > { %3345 = vmatpush1.bf16.msra.mxu0 %v6810_v1  ;;  %v6866_v1 = vcombine.low %v1720_v51, %v1724_v61  ;;  %v1776_v51 = vld [vmem:[#allocation18 + $0x450] sm:$0xff] }
 0x517   : > { %3427 = vmatpush1.bf16.msra.mxu1 %v6812_v5  ;;  %3346 = vmatprep.subr.bf16.mxu0 %v6819_v6  ;;  %v6868_v5 = vcombine.low %v1721_v45, %v1725_v52  ;;  %v6875_v6 = vcombine.high %v1728_v63, %v1732_v0  ;;  %v1780_v61 = vld [vmem:[#allocation18 + $0x470] sm:$0xff]  ;;  %v6914_v45 = vcombine.low %v1768_v36, %v1772_v41  ;;  %v1777_v52 = vld [vmem:[#allocation18 + $0x458] sm:$0xff] }
 0x518   : > { %3428 = vmatprep.subr.bf16.mxu1 %v6821_v7  ;;  %v6877_v7 = vcombine.high %v1729_v43, %v1733_v3 }
 0x51a   : > { %3347 = vmatpush1.bf16.msra.mxu0 %v6818_v37  ;;  %v6874_v37 = vcombine.low %v1728_v63, %v1732_v0  ;;  %v1788_v63 = vld [vmem:[#allocation18 + $0x4b0] sm:$0xff] }
 0x51b   : > { %3429 = vmatpush1.bf16.msra.mxu1 %v6820_v38  ;;  %3348 = vmatprep.subr.bf16.mxu0 %v6827_v39  ;;  %v6876_v38 = vcombine.low %v1729_v43, %v1733_v3  ;;  %v6883_v39 = vcombine.high %v1736_v4, %v1740_v8  ;;  %v1785_v43 = vld [vmem:[#allocation18 + $0x498] sm:$0xff] }
 0x51c   : > { %3430 = vmatprep.subr.bf16.mxu1 %v6829_v40  ;;  %v6885_v40 = vcombine.high %v1737_v9, %v1741_v10  ;;  %v1789_v3 = vld [vmem:[#allocation18 + $0x4b8] sm:$0xff] }
 0x51e   : > { %3349 = vmatpush1.bf16.msra.mxu0 %v6826_v15  ;;  %v6882_v15 = vcombine.low %v1736_v4, %v1740_v8  ;;  %v1792_v4 = vld [vmem:[#allocation18 + $0x4d0] sm:$0xff] }
 0x51f   : > { %3431 = vmatpush1.bf16.msra.mxu1 %v6828_v16  ;;  %3350 = vmatprep.subr.bf16.mxu0 %v6835_v17  ;;  %v6884_v16 = vcombine.low %v1737_v9, %v1741_v10  ;;  %v6891_v17 = vcombine.high %v1744_v42, %v1748_v11  ;;  %v1796_v8 = vld [vmem:[#allocation18 + $0x4f0] sm:$0xff]  ;;  %v1793_v9 = vld [vmem:[#allocation18 + $0x4d8] sm:$0xff] }
 0x520   : > { %3432 = vmatprep.subr.bf16.mxu1 %v6837_v18  ;;  %v6893_v18 = vcombine.high %v1745_v13, %v1749_v14  ;;  %v1797_v10 = vld [vmem:[#allocation18 + $0x4f8] sm:$0xff] }
 0x522   : > { %3351 = vmatpush1.bf16.msra.mxu0 %v6834_v26  ;;  %v6890_v26 = vcombine.low %v1744_v42, %v1748_v11  ;;  %v1804_v42 = vld [vmem:[#allocation18 + $0x530] sm:$0xff]  ;;  %v1801_v11 = vld [vmem:[#allocation18 + $0x518] sm:$0xff] }
 0x523   : > { %3433 = vmatpush1.bf16.msra.mxu1 %v6836_v29  ;;  %3352 = vmatprep.subr.bf16.mxu0 %v6843_v31  ;;  %v6892_v29 = vcombine.low %v1745_v13, %v1749_v14  ;;  %v6899_v31 = vcombine.high %v1752_v20, %v1756_v21  ;;  %v1805_v13 = vld [vmem:[#allocation18 + $0x538] sm:$0xff]  ;;  %v6940_v14 = vcombine.low %v1793_v9, %v1797_v10 }
 0x524   : > { %3434 = vmatprep.subr.bf16.mxu1 %v6845_v32  ;;  %v6901_v32 = vcombine.high %v1753_v22, %v1757_v23 }
 0x526   : > { %3353 = vmatpush1.bf16.msra.mxu0 %v6842_v58  ;;  %v6898_v58 = vcombine.low %v1752_v20, %v1756_v21  ;;  %v1809_v20 = vld [vmem:[#allocation18 + $0x558] sm:$0xff] }
 0x527   : > { %3435 = vmatpush1.bf16.msra.mxu1 %v6844_v33  ;;  %3354 = vmatprep.subr.bf16.mxu0 %v6851_v34  ;;  %v6900_v33 = vcombine.low %v1753_v22, %v1757_v23  ;;  %v6907_v34 = vcombine.high %v1760_v48, %v1764_v54  ;;  %v1813_v21 = vld [vmem:[#allocation18 + $0x578] sm:$0xff]  ;;  %v6948_v23 = vcombine.low %v1801_v11, %v1805_v13 }
 0x528   : > { %3436 = vmatprep.subr.bf16.mxu1 %v6853_v35  ;;  %v6909_v35 = vcombine.high %v1761_v55, %v1765_v57 }
 0x52a   : > { %3355 = vmatpush1.bf16.msra.mxu0 %v6850_v46  ;;  %v6906_v46 = vcombine.low %v1760_v48, %v1764_v54  ;;  %v1817_v48 = vld [vmem:[#allocation18 + $0x598] sm:$0xff] }
 0x52b   : > { %3437 = vmatpush1.bf16.msra.mxu1 %v6852_v47  ;;  %3356 = vmatprep.subr.bf16.mxu0 %v6859_v49  ;;  %v6908_v47 = vcombine.low %v1761_v55, %v1765_v57  ;;  %v6915_v49 = vcombine.high %v1768_v36, %v1772_v41  ;;  %v1821_v54 = vld [vmem:[#allocation18 + $0x5b8] sm:$0xff]  ;;  %v6956_v57 = vcombine.low %v1809_v20, %v1813_v21 }
 0x52c   : > { %3438 = vmatprep.subr.bf16.mxu1 %v6861_v50  ;;  %v6917_v50 = vcombine.high %v1769_v2, %v1773_v44  ;;  %v1825_v36 = vld [vmem:[#allocation18 + $0x5d8] sm:$0xff] }
 0x52d   : > { %v1829_v41 = vld [vmem:[#allocation18 + $0x5f8] sm:$0xff] }
 0x52e   : > { %3357 = vmatpush1.bf16.msra.mxu0 %v6858_v62  ;;  %v1781_v62 = vld [vmem:[#allocation18 + $0x478] sm:$0xff] }
 0x52f   : > { %3439 = vmatpush1.bf16.msra.mxu1 %v6860_v53  ;;  %3358 = vmatprep.subr.bf16.mxu0 %v6867_v56  ;;  %v6916_v53 = vcombine.low %v1769_v2, %v1773_v44  ;;  %v6923_v56 = vcombine.high %v1776_v51, %v1780_v61  ;;  %v6925_v0 = vcombine.high %v1777_v52, %v1781_v62 }
 0x530   : > { %3440 = vmatprep.subr.bf16.mxu1 %v6869_v60  ;;  %v1784_v60 = vld [vmem:[#allocation18 + $0x490] sm:$0xff]  ;;  %v6964_v44 = vcombine.low %v1817_v48, %v1821_v54 }
 0x532   : > { %3359 = vmatpush1.bf16.msra.mxu0 %v6866_v1  ;;  %v6922_v1 = vcombine.low %v1776_v51, %v1780_v61  ;;  %v1833_v51 = vld [vmem:[#allocation18 + $0x618] sm:$0xff] }
 0x533   : > { %3441 = vmatpush1.bf16.msra.mxu1 %v6868_v5  ;;  %3360 = vmatprep.subr.bf16.mxu0 %v6875_v6  ;;  %v6924_v5 = vcombine.low %v1777_v52, %v1781_v62  ;;  %v6931_v6 = vcombine.high %v1784_v60, %v1788_v63  ;;  %v1837_v61 = vld [vmem:[#allocation18 + $0x638] sm:$0xff]  ;;  %v6972_v52 = vcombine.low %v1825_v36, %v1829_v41 }
 0x534   : > { %3442 = vmatprep.subr.bf16.mxu1 %v6877_v7  ;;  %v6933_v7 = vcombine.high %v1785_v43, %v1789_v3 }
 0x536   : > { %3361 = vmatpush1.bf16.msra.mxu0 %v6874_v37  ;;  %v6930_v37 = vcombine.low %v1784_v60, %v1788_v63  ;;  %v1844_v60 = vld [vmem:[#allocation18 + $0x670] sm:$0xff]  ;;  %v1841_v63 = vld [vmem:[#allocation18 + $0x658] sm:$0xff] }
 0x537   : > { %3443 = vmatpush1.bf16.msra.mxu1 %v6876_v38  ;;  %3362 = vmatprep.subr.bf16.mxu0 %v6883_v39  ;;  %v6939_v38 = vcombine.high %v1792_v4, %v1796_v8  ;;  %v6941_v39 = vcombine.high %v1793_v9, %v1797_v10 }
 0x538   : > { %3444 = vmatprep.subr.bf16.mxu1 %v6885_v40  ;;  %v1800_v40 = vld [vmem:[#allocation18 + $0x510] sm:$0xff] }
 0x539   : > { %v6946_v22 = vcombine.low %v1800_v40, %v1804_v42 }
 0x53a   : > { %3363 = vmatpush1.bf16.msra.mxu0 %v6882_v15  ;;  %v6947_v15 = vcombine.high %v1800_v40, %v1804_v42  ;;  %v1857_v40 = vld [vmem:[#allocation18 + $0x6d8] sm:$0xff] }
 0x53b   : > { %3445 = vmatpush1.bf16.msra.mxu1 %v6884_v16  ;;  %3364 = vmatprep.subr.bf16.mxu0 %v6891_v17  ;;  %v6949_v16 = vcombine.high %v1801_v11, %v1805_v13  ;;  %v1808_v17 = vld [vmem:[#allocation18 + $0x550] sm:$0xff]  ;;  %v1861_v42 = vld [vmem:[#allocation18 + $0x6f8] sm:$0xff] }
 0x53c   : > { %3446 = vmatprep.subr.bf16.mxu1 %v6893_v18  ;;  %v1812_v18 = vld [vmem:[#allocation18 + $0x570] sm:$0xff] }
 0x53d   : > { %v6954_v55 = vcombine.low %v1808_v17, %v1812_v18 }
 0x53e   : > { %3365 = vmatpush1.bf16.msra.mxu0 %v6890_v26  ;;  %v6955_v26 = vcombine.high %v1808_v17, %v1812_v18  ;;  %v1865_v17 = vld [vmem:[#allocation18 + $0x718] sm:$0xff] }
 0x53f   : > { %3447 = vmatpush1.bf16.msra.mxu1 %v6892_v29  ;;  %3366 = vmatprep.subr.bf16.mxu0 %v6899_v31  ;;  %v6957_v29 = vcombine.high %v1809_v20, %v1813_v21  ;;  %v1816_v31 = vld [vmem:[#allocation18 + $0x590] sm:$0xff]  ;;  %v1869_v18 = vld [vmem:[#allocation18 + $0x738] sm:$0xff]  ;;  %v7004_v21 = vcombine.low %v1857_v40, %v1861_v42 }
 0x540   : > { %3448 = vmatprep.subr.bf16.mxu1 %v6901_v32  ;;  %v1820_v32 = vld [vmem:[#allocation18 + $0x5b0] sm:$0xff] }
 0x541   : > { %v6962_v2 = vcombine.low %v1816_v31, %v1820_v32 }
 0x542   : > { %3367 = vmatpush1.bf16.msra.mxu0 %v6898_v58  ;;  %v6963_v58 = vcombine.high %v1816_v31, %v1820_v32  ;;  %v1873_v31 = vld [vmem:[#allocation18 + $0x758] sm:$0xff] }
 0x543   : > { %3449 = vmatpush1.bf16.msra.mxu1 %v6900_v33  ;;  %3368 = vmatprep.subr.bf16.mxu0 %v6907_v34  ;;  %v6965_v33 = vcombine.high %v1817_v48, %v1821_v54  ;;  %v1824_v34 = vld [vmem:[#allocation18 + $0x5d0] sm:$0xff]  ;;  %v1877_v32 = vld [vmem:[#allocation18 + $0x778] sm:$0xff]  ;;  %v7012_v54 = vcombine.low %v1865_v17, %v1869_v18 }
 0x544   : > { %3450 = vmatprep.subr.bf16.mxu1 %v6909_v35  ;;  %v1828_v35 = vld [vmem:[#allocation18 + $0x5f0] sm:$0xff] }
 0x546   : > { %3369 = vmatpush1.bf16.msra.mxu0 %v6906_v46  ;;  %v6971_v46 = vcombine.high %v1824_v34, %v1828_v35 }
 0x547   : > { %3451 = vmatpush1.bf16.msra.mxu1 %v6908_v47  ;;  %3379 = vmatprep.subr.bf16.mxu0 %v6915_v49  ;;  %v6973_v47 = vcombine.high %v1825_v36, %v1829_v41  ;;  %v1832_v49 = vld [vmem:[#allocation18 + $0x610] sm:$0xff]  ;;  %v7020_v41 = vcombine.low %v1873_v31, %v1877_v32 }
 0x548   : > { %3461 = vmatprep.subr.bf16.mxu1 %v6917_v50  ;;  %v1836_v50 = vld [vmem:[#allocation18 + $0x630] sm:$0xff] }
 0x549   : > { %3371 = vmatmul.mubr.bf16.vlgmr.msra.gmra.mrb[12].mxu0 %v9476_v12  ;;  %v6979_v62 = vcombine.high %v1832_v49, %v1836_v50 }
 0x54a   : > { %3453 = vmatmul.mubr.bf16.vlgmr.msra.gmra.mrb[12].mxu1 %v9476_v12  ;;  %3380 = vmatpush1.bf16.msra.mxu0 %v6914_v45  ;;  %v6932_v12 = vcombine.low %v1785_v43, %v1789_v3  ;;  %v6970_v45 = vcombine.low %v1824_v34, %v1828_v35  ;;  %v6978_v43 = vcombine.low %v1832_v49, %v1836_v50  ;;  %v1881_v34 = vld [vmem:[#allocation18 + $0x798] sm:$0xff] }
 0x54b   : > { %3411 = vmatprep.mubr.bf16.mxu0 %v9482_v19  ;;  %3462 = vmatpush1.bf16.msra.mxu1 %v6916_v53  ;;  %v6981_v53 = vcombine.high %v1833_v51, %v1837_v61  ;;  %v6980_v3 = vcombine.low %v1833_v51, %v1837_v61  ;;  %v1885_v35 = vld [vmem:[#allocation18 + $0x7b8] sm:$0xff] }
 0x54c   : > { %3493 = vmatprep.mubr.bf16.mxu1 %v9482_v19  ;;  %3381 = vmatprep.subr.bf16.mxu0 %v6923_v56  ;;  %v6938_v19 = vcombine.low %v1792_v4, %v1796_v8  ;;  %v1840_v56 = vld [vmem:[#allocation18 + $0x650] sm:$0xff]  ;;  %v1849_v4 = vld [vmem:[#allocation18 + $0x698] sm:$0xff]  ;;  %v7028_v61 = vcombine.low %v1881_v34, %v1885_v35 }
 0x54d   : > { %3463 = vmatprep.subr.bf16.mxu1 %v6925_v0  ;;  %v1845_v0 = vld [vmem:[#allocation18 + $0x678] sm:$0xff]  ;;  %v6986_v9 = vcombine.low %v1840_v56, %v1844_v60 }
 0x54e   : > { %3382 = vmatpush1.bf16.msra.mxu0 %v6922_v1  ;;  %v6987_v1 = vcombine.high %v1840_v56, %v1844_v60  ;;  %v1853_v8 = vld [vmem:[#allocation18 + $0x6b8] sm:$0xff]  ;;  %v6988_v10 = vcombine.low %v1841_v63, %v1845_v0 }
 0x54f   : > { %3464 = vmatpush1.bf16.msra.mxu1 %v6924_v5  ;;  %3383 = vmatprep.subr.bf16.mxu0 %v6931_v6  ;;  %v6989_v5 = vcombine.high %v1841_v63, %v1845_v0  ;;  %v1848_v6 = vld [vmem:[#allocation18 + $0x690] sm:$0xff]  ;;  %v6996_v13 = vcombine.low %v1849_v4, %v1853_v8  ;;  %v1889_v49 = vld [vmem:[#allocation18 + $0x7d8] sm:$0xff] }
 0x550   : > { %3465 = vmatprep.subr.bf16.mxu1 %v6933_v7  ;;  %v1852_v7 = vld [vmem:[#allocation18 + $0x6b0] sm:$0xff]  ;;  %v1893_v50 = vld [vmem:[#allocation18 + $0x7f8] sm:$0xff] }
 0x551   : > { %v6994_v11 = vcombine.low %v1848_v6, %v1852_v7 }
 0x552   : > { %3384 = vmatpush1.bf16.msra.mxu0 %v6930_v37  ;;  %v6995_v37 = vcombine.high %v1848_v6, %v1852_v7 }
 0x553   : > { %3466 = vmatpush1.bf16.msra.mxu1 %v6932_v12  ;;  %3385 = vmatprep.subr.bf16.mxu0 %v6939_v38  ;;  %v6997_v12 = vcombine.high %v1849_v4, %v1853_v8  ;;  %v1856_v38 = vld [vmem:[#allocation18 + $0x6d0] sm:$0xff] }
 0x554   : > { %3467 = vmatprep.subr.bf16.mxu1 %v6941_v39  ;;  %v1860_v39 = vld [vmem:[#allocation18 + $0x6f0] sm:$0xff] }
 0x555   : > { %v7002_v20 = vcombine.low %v1856_v38, %v1860_v39 }
 0x556   : > { %3386 = vmatpush1.bf16.msra.mxu0 %v6938_v19  ;;  %v7003_v19 = vcombine.high %v1856_v38, %v1860_v39 }
 0x557   : > { %3468 = vmatpush1.bf16.msra.mxu1 %v6940_v14  ;;  %3387 = vmatprep.subr.bf16.mxu0 %v6947_v15  ;;  %v7005_v14 = vcombine.high %v1857_v40, %v1861_v42  ;;  %v1864_v15 = vld [vmem:[#allocation18 + $0x710] sm:$0xff] }
 0x558   : > { %3469 = vmatprep.subr.bf16.mxu1 %v6949_v16  ;;  %v1868_v16 = vld [vmem:[#allocation18 + $0x730] sm:$0xff] }
 0x559   : > { %v7010_v48 = vcombine.low %v1864_v15, %v1868_v16 }
 0x55a   : > { %3388 = vmatpush1.bf16.msra.mxu0 %v6946_v22  ;;  %v7011_v22 = vcombine.high %v1864_v15, %v1868_v16 }
 0x55b   : > { %3470 = vmatpush1.bf16.msra.mxu1 %v6948_v23  ;;  %3389 = vmatprep.subr.bf16.mxu0 %v6955_v26  ;;  %v7013_v23 = vcombine.high %v1865_v17, %v1869_v18  ;;  %v1872_v26 = vld [vmem:[#allocation18 + $0x750] sm:$0xff] }
 0x55c   : > { %3471 = vmatprep.subr.bf16.mxu1 %v6957_v29  ;;  %v1876_v29 = vld [vmem:[#allocation18 + $0x770] sm:$0xff] }
 0x55d   : > { %v7018_v36 = vcombine.low %v1872_v26, %v1876_v29 }
 0x55e   : > { %3390 = vmatpush1.bf16.msra.mxu0 %v6954_v55  ;;  %v7019_v55 = vcombine.high %v1872_v26, %v1876_v29 }
 0x55f   : > { %3472 = vmatpush1.bf16.msra.mxu1 %v6956_v57  ;;  %3391 = vmatprep.subr.bf16.mxu0 %v6963_v58  ;;  %v7021_v57 = vcombine.high %v1873_v31, %v1877_v32  ;;  %v1880_v58 = vld [vmem:[#allocation18 + $0x790] sm:$0xff] }
 0x560   : > { %3473 = vmatprep.subr.bf16.mxu1 %v6965_v33  ;;  %v1884_v33 = vld [vmem:[#allocation18 + $0x7b0] sm:$0xff] }
 0x561   : > { %v7026_v51 = vcombine.low %v1880_v58, %v1884_v33 }
 0x562   : > { %3392 = vmatpush1.bf16.msra.mxu0 %v6962_v2  ;;  %v7027_v2 = vcombine.high %v1880_v58, %v1884_v33 }
 0x563   : > { %3474 = vmatpush1.bf16.msra.mxu1 %v6964_v44  ;;  %3393 = vmatprep.subr.bf16.mxu0 %v6971_v46  ;;  %v7029_v44 = vcombine.high %v1881_v34, %v1885_v35  ;;  %v1888_v46 = vld [vmem:[#allocation18 + $0x7d0] sm:$0xff] }
 0x564   : > { %3475 = vmatprep.subr.bf16.mxu1 %v6973_v47  ;;  %v1892_v47 = vld [vmem:[#allocation18 + $0x7f0] sm:$0xff] }
 0x566   : > { %3394 = vmatpush1.bf16.msra.mxu0 %v6970_v45  ;;  %v7035_v45 = vcombine.high %v1888_v46, %v1892_v47 }
 0x567   : > { %3476 = vmatpush1.bf16.msra.mxu1 %v6972_v52  ;;  %3395 = vmatprep.subr.bf16.mxu0 %v6979_v62  ;;  %v7037_v52 = vcombine.high %v1889_v49, %v1893_v50  ;;  %v7034_v62 = vcombine.low %v1888_v46, %v1892_v47 }
 0x568   : > { %3477 = vmatprep.subr.bf16.mxu1 %v6981_v53  ;;  %v7036_v53 = vcombine.low %v1889_v49, %v1893_v50 }
 0x56a   : > { %3396 = vmatpush1.bf16.msra.mxu0 %v6978_v43 }
 0x56b   : > { %3478 = vmatpush1.bf16.msra.mxu1 %v6980_v3  ;;  %3397 = vmatprep.subr.bf16.mxu0 %v6987_v1 }
 0x56c   : > { %3479 = vmatprep.subr.bf16.mxu1 %v6989_v5 }
 0x56e   : > { %3398 = vmatpush1.bf16.msra.mxu0 %v6986_v9 }
 0x56f   : > { %3480 = vmatpush1.bf16.msra.mxu1 %v6988_v10  ;;  %3399 = vmatprep.subr.bf16.mxu0 %v6995_v37 }
 0x570   : > { %3481 = vmatprep.subr.bf16.mxu1 %v6997_v12 }
 0x572   : > { %3400 = vmatpush1.bf16.msra.mxu0 %v6994_v11 }
 0x573   : > { %3482 = vmatpush1.bf16.msra.mxu1 %v6996_v13  ;;  %3401 = vmatprep.subr.bf16.mxu0 %v7003_v19 }
 0x574   : > { %3483 = vmatprep.subr.bf16.mxu1 %v7005_v14 }
 0x576   : > { %3402 = vmatpush1.bf16.msra.mxu0 %v7002_v20 }
 0x577   : > { %3484 = vmatpush1.bf16.msra.mxu1 %v7004_v21  ;;  %3403 = vmatprep.subr.bf16.mxu0 %v7011_v22 }
 0x578   : > { %3485 = vmatprep.subr.bf16.mxu1 %v7013_v23 }
 0x57a   : > { %3404 = vmatpush1.bf16.msra.mxu0 %v7010_v48 }
 0x57b   : > { %3486 = vmatpush1.bf16.msra.mxu1 %v7012_v54  ;;  %3405 = vmatprep.subr.bf16.mxu0 %v7019_v55 }
 0x57c   : > { %3487 = vmatprep.subr.bf16.mxu1 %v7021_v57 }
 0x57e   : > { %3406 = vmatpush1.bf16.msra.mxu0 %v7018_v36 }
 0x57f   : > { %3488 = vmatpush1.bf16.msra.mxu1 %v7020_v41  ;;  %3407 = vmatprep.subr.bf16.mxu0 %v7027_v2 }
 0x580   : > { %3489 = vmatprep.subr.bf16.mxu1 %v7029_v44 }
 0x582   : > { %3408 = vmatpush1.bf16.msra.mxu0 %v7026_v51 }
 0x583   : > { %3490 = vmatpush1.bf16.msra.mxu1 %v7028_v61  ;;  %3409 = vmatprep.subr.bf16.mxu0 %v7035_v45 }
 0x584   : > { %3491 = vmatprep.subr.bf16.mxu1 %v7037_v52 }
 0x586   : > { %3410 = vmatpush1.bf16.msra.mxu0 %v7034_v62 }
 0x587   : > { %3492 = vmatpush1.bf16.msra.mxu1 %v7036_v53 }
 0x589   : > { %3412 = vmatmul.mubr.bf16.vlgmr.msra.gmra.mrb[12].mxu0 %v9495_v59 }
 0x58a   : > { %3494 = vmatmul.mubr.bf16.vlgmr.msra.gmra.mrb[12].mxu1 %v9495_v59 }
 0x5dc   : > { %v9507_v56 = vpop.f32.mrb[8].mxu0  ;;  %v9509_v60 = vpop.f32.mrb[8].mxu1 }
 0x5dd   : > { %v3504_v63 = vrot.slane %v9507_v56, 4  ;;  %v3560_v0 = vmul.f32 %v9507_v56, %v9507_v56  ;;  %v3516_v43 = vrot.slane %v9509_v60, 4  ;;  %v3562_v3 = vmul.f32 %v9509_v60, %v9509_v60  ;;  %v9517_v1 = vpop.f32.mrb[9].mxu0  ;;  %v9519_v5 = vpop.f32.mrb[9].mxu1 }
 0x5de   : > { %v3510_v59 = vrot.slane %v9517_v1, 4  ;;  %v3561_v6 = vmul.f32 %v9517_v1, %v9517_v1  ;;  %v3522_v7 = vrot.slane %v9519_v5, 4  ;;  %v3563_v4 = vmul.f32 %v9519_v5, %v9519_v5  ;;  %v3253_v8 = vpop.f32.mrb[10].mxu0  ;;  %v3335_v9 = vpop.f32.mrb[10].mxu1 }
 0x5df   : > { %v3505_v10 = vadd.f32 %v3504_v63, %v9507_v56  ;;  %v3568_v37 = vrot.slane %v3560_v0, 4  ;;  %v3517_v12 = vadd.f32 %v3516_v43, %v9509_v60  ;;  %v3580_v38 = vrot.slane %v3562_v3, 4  ;;  %v3254_v39 = vpop.f32.mrb[11].mxu0  ;;  %v3336_v40 = vpop.f32.mrb[11].mxu1 }
 0x5e0   : > { %v3511_v42 = vadd.f32 %v3510_v59, %v9517_v1  ;;  %v3574_v11 = vrot.slane %v3561_v6, 4  ;;  %v3523_v13 = vadd.f32 %v3522_v7, %v9519_v5  ;;  %v3586_v19 = vrot.slane %v3563_v4, 4 }
 0x5e1   : > { %v3506_v14 = vrot.slane %v3505_v10, 2  ;;  %v3569_v15 = vadd.f32 %v3568_v37, %v3560_v0  ;;  %v3518_v16 = vrot.slane %v3517_v12, 2  ;;  %v3581_v17 = vadd.f32 %v3580_v38, %v3562_v3 }
 0x5e2   : > { %v3512_v18 = vrot.slane %v3511_v42, 2  ;;  %v3575_v20 = vadd.f32 %v3574_v11, %v3561_v6  ;;  %v3524_v21 = vrot.slane %v3523_v13, 2  ;;  %v3587_v22 = vadd.f32 %v3586_v19, %v3563_v4 }
 0x5e3   : > { %v3507_v23 = vadd.f32 %v3506_v14, %v3505_v10  ;;  %v3570_v26 = vrot.slane %v3569_v15, 2  ;;  %v3519_v29 = vadd.f32 %v3518_v16, %v3517_v12  ;;  %v3582_v31 = vrot.slane %v3581_v17, 2 }
 0x5e4   : > { %v3513_v32 = vadd.f32 %v3512_v18, %v3511_v42  ;;  %v3576_v48 = vrot.slane %v3575_v20, 2  ;;  %v3525_v54 = vadd.f32 %v3524_v21, %v3523_v13  ;;  %v3588_v55 = vrot.slane %v3587_v22, 2  ;;  %v9533_v21 = vld [vmem:[#allocation21] sm:$0xff] }
 0x5e5   : > { %v3508_v57 = vrot.slane %v3507_v23, 1  ;;  %v3571_v58 = vadd.f32 %v3570_v26, %v3569_v15  ;;  %v3520_v33 = vrot.slane %v3519_v29, 1  ;;  %v3583_v34 = vadd.f32 %v3582_v31, %v3581_v17 }
 0x5e6   : > { %v3514_v35 = vrot.slane %v3513_v32, 1  ;;  %v3577_v36 = vadd.f32 %v3576_v48, %v3575_v20  ;;  %v3526_v41 = vrot.slane %v3525_v54, 1  ;;  %v3589_v2 = vadd.f32 %v3588_v55, %v3587_v22  ;;  %v9531_v20 = vld [vmem:[#allocation20] sm:$0xff] }
 0x5e7   : > { %v3509_v44 = vadd.f32 %v3508_v57, %v3507_v23  ;;  %v3572_v46 = vrot.slane %v3571_v58, 1  ;;  %v3521_v47 = vadd.f32 %v3520_v33, %v3519_v29  ;;  %v3584_v49 = vrot.slane %v3583_v34, 1 }
 0x5e8   : > { %v3515_v50 = vadd.f32 %v3514_v35, %v3513_v32  ;;  %v3578_v51 = vrot.slane %v3577_v36, 1  ;;  %v3527_v61 = vadd.f32 %v3526_v41, %v3525_v54  ;;  %v3590_v45 = vrot.slane %v3589_v2, 1 }
 0x5e9   : > { %v3552_v52 = vmul.f32 0.125, %v3509_v44  ;;  %v3573_v62 = vadd.f32 %v3572_v46, %v3571_v58  ;;  %v3554_v53 = vmul.f32 0.125, %v3521_v47  ;;  %v3585_v63 = vadd.f32 %v3584_v49, %v3583_v34 }
 0x5ea   : > { %v3553_v0 = vmul.f32 0.125, %v3515_v50  ;;  %v3579_v43 = vadd.f32 %v3578_v51, %v3577_v36  ;;  %v3555_v3 = vmul.f32 0.125, %v3527_v61  ;;  %v3591_v59 = vadd.f32 %v3590_v45, %v3589_v2 }
 0x5eb   : > { %v3616_v6 = vmul.f32 0.125, %v3573_v62  ;;  %v3624_v7 = vmul.f32 %v3552_v52, %v3552_v52  ;;  %v3618_v4 = vmul.f32 0.125, %v3585_v63  ;;  %v3626_v8 = vmul.f32 %v3554_v53, %v3554_v53 }
 0x5ec   : > { %v3617_v9 = vmul.f32 0.125, %v3579_v43  ;;  %v3625_v10 = vmul.f32 %v3553_v0, %v3553_v0  ;;  %v3619_v12 = vmul.f32 0.125, %v3591_v59  ;;  %v3627_v38 = vmul.f32 %v3555_v3, %v3555_v3 }
 0x5ed   : > { %v3632_v37 = vsub.f32 %v3616_v6, %v3624_v7  ;;  %v3634_v39 = vsub.f32 %v3618_v4, %v3626_v8  ;;  %v3648_v22 = vsub.f32 %v9507_v56, %v3552_v52  ;;  %v3684_v23 = vrot.slane %v9531_v20, %v9399_v25 }
 0x5ee   : > { %v3633_v40 = vsub.f32 %v3617_v9, %v3625_v10  ;;  %v3635_v11 = vsub.f32 %v3619_v12, %v3627_v38  ;;  %v3650_v29 = vsub.f32 %v9509_v60, %v3554_v53  ;;  %v3692_v31 = vrot.slane %v9531_v20, %v9455_v28 }
 0x5ef   : > { %v3640_v42 = vmax.f32 %v3632_v37, 0.0  ;;  %v3642_v13 = vmax.f32 %v3634_v39, 0.0  ;;  %v3733_v54 = vrot.slane %v9533_v21, %v9399_v25  ;;  %v3649_v55 = vsub.f32 %v9517_v1, %v3553_v0 }
 0x5f0   : > { %v3641_v19 = vmax.f32 %v3633_v40, 0.0  ;;  %v3643_v15 = vmax.f32 %v3635_v11, 0.0  ;;  %v3688_v57 = vrot.slane %v9531_v20, %v9402_v27  ;;  %v3741_v33 = vrot.slane %v9533_v21, %v9455_v28 }
 0x5f1   : > { %v3656_v14 = vadd.f32 0.8, %v3640_v42  ;;  %v3658_v16 = vadd.f32 0.8, %v3642_v13  ;;  %v3651_v60 = vsub.f32 %v9519_v5, %v3555_v3  ;;  %v3696_v34 = vrot.slane %v9531_v20, %v9458_v30 }
 0x5f2   : > { %v3657_v17 = vadd.f32 0.8, %v3641_v19  ;;  %v3659_v18 = vadd.f32 0.8, %v3643_v15  ;;  %v3737_v25 = vrot.slane %v9533_v21, %v9402_v27  ;;  %v3745_v44 = vrot.slane %v9533_v21, %v9458_v30 }
 0x5f3   : > { %7868 = vrsqrt.f32 %v3656_v14 }
 0x5f4   : > { %7870 = vrsqrt.f32 %v3658_v16 }
 0x5f5   : > { %7872 = vrsqrt.f32 %v3657_v17 }
 0x5f6   : > { %7874 = vrsqrt.f32 %v3659_v18 }
 0x5fd   : > { %v7869_v26 = vpop.eup %7868 }
 0x5fe   : > { %v7871_v32 = vpop.eup %7870  ;;  %v3672_v48 = vmul.f32 %v7869_v26, %v3648_v22 }
 0x5ff   : > { %v7873_v56 = vpop.eup %7872  ;;  %v3674_v58 = vmul.f32 %v7871_v32, %v3650_v29 }
 0x600   : > { %v7875_v35 = vpop.eup %7874  ;;  %v3721_v36 = vmul.f32 %v3684_v23, %v3672_v48  ;;  %v3673_v41 = vmul.f32 %v7873_v56, %v3649_v55 }
 0x601   : > { %v3723_v1 = vmul.f32 %v3692_v31, %v3674_v58  ;;  %v3675_v2 = vmul.f32 %v7875_v35, %v3651_v60 }
 0x602   : > { %v3770_v46 = vadd.f32 %v3733_v54, %v3721_v36  ;;  %v3722_v47 = vmul.f32 %v3688_v57, %v3673_v41 }
 0x603   : > { %v3772_v49 = vadd.f32 %v3741_v33, %v3723_v1  ;;  %v3724_v28 = vmul.f32 %v3696_v34, %v3675_v2 }
 0x604   : > { %vm3778_vm10 = vcmp.gt.f32.partialorder %v3770_v46, 0.0  ;;  %v3786_v5 = vmul.f32 0.2, %v3770_v46  ;;  %v3771_v50 = vadd.f32 %v3737_v25, %v3722_v47 }
 0x605   : > { %vm3780_vm11 = vcmp.gt.f32.partialorder %v3772_v49, 0.0  ;;  %v3788_v51 = vmul.f32 0.2, %v3772_v49  ;;  %v3773_v61 = vadd.f32 %v3745_v44, %v3724_v28 }
 0x606   : > { %v3794_v45 = vsel %vm3778_vm10, %v3770_v46, %v3786_v5  ;;  %vm3779_vm12 = vcmp.gt.f32.partialorder %v3771_v50, 0.0  ;;  %v3787_v52 = vmul.f32 0.2, %v3771_v50 }
 0x607   : > { %v3796_v62 = vsel %vm3780_vm11, %v3772_v49, %v3788_v51  ;;  %vm3781_vm13 = vcmp.gt.f32.partialorder %v3773_v61, 0.0  ;;  %v3789_v27 = vmul.f32 0.2, %v3773_v61 }
 0x608   : > { %v3795_v53 = vsel %vm3779_vm12, %v3771_v50, %v3787_v52 }
 0x609   : > { %v7375_v63 = vpack.c.bf16 %v3795_v53, %v3794_v45  ;;  %v3797_v0 = vsel %vm3781_vm13, %v3773_v61, %v3789_v27 }
 0x60a   : > { %v7376_v30 = vpack.c.bf16 %v3797_v0, %v3796_v62 }
 0x60b   : > { %3834 = vst [vmem:[#allocation2] sm:$0xff] %v7375_v63 }
 0x60c   : > { %3835 = vst [vmem:[#allocation2 + $0x8] sm:$0xff] %v7376_v30 }
 0x65c   : > { %v9555_v43 = vpop.f32.mrb[12].mxu0 }
 0x65d   : > { %v3528_v3 = vrot.slane %v9555_v43, 4  ;;  %v3564_v59 = vmul.f32 %v9555_v43, %v9555_v43  ;;  %v9560_v6 = vpop.f32.mrb[12].mxu1  ;;  %v9562_v7 = vpop.f32.mrb[13].mxu0 }
 0x65e   : > { %v3540_v4 = vrot.slane %v9560_v6, 4  ;;  %v3566_v8 = vmul.f32 %v9560_v6, %v9560_v6  ;;  %v3534_v9 = vrot.slane %v9562_v7, 4  ;;  %v3565_v10 = vmul.f32 %v9562_v7, %v9562_v7  ;;  %v9570_v37 = vpop.f32.mrb[13].mxu1  ;;  %v3417_v12 = vpop.f32.mrb[14].mxu0 }
 0x65f   : > { %v3529_v38 = vadd.f32 %v3528_v3, %v9555_v43  ;;  %v3592_v39 = vrot.slane %v3564_v59, 4  ;;  %v3546_v40 = vrot.slane %v9570_v37, 4  ;;  %v3567_v42 = vmul.f32 %v9570_v37, %v9570_v37  ;;  %v3499_v11 = vpop.f32.mrb[14].mxu1  ;;  %v3418_v13 = vpop.f32.mrb[15].mxu0 }
 0x660   : > { %v3541_v19 = vadd.f32 %v3540_v4, %v9560_v6  ;;  %v3604_v14 = vrot.slane %v3566_v8, 4  ;;  %v3535_v15 = vadd.f32 %v3534_v9, %v9562_v7  ;;  %v3598_v16 = vrot.slane %v3565_v10, 4  ;;  %v3500_v17 = vpop.f32.mrb[15].mxu1 }
 0x661   : > { %v3530_v18 = vrot.slane %v3529_v38, 2  ;;  %v3593_v22 = vadd.f32 %v3592_v39, %v3564_v59  ;;  %v3547_v23 = vadd.f32 %v3546_v40, %v9570_v37  ;;  %v3610_v26 = vrot.slane %v3567_v42, 4 }
 0x662   : > { %v3542_v29 = vrot.slane %v3541_v19, 2  ;;  %v3605_v31 = vadd.f32 %v3604_v14, %v3566_v8  ;;  %v3536_v32 = vrot.slane %v3535_v15, 2  ;;  %v3599_v48 = vadd.f32 %v3598_v16, %v3565_v10 }
 0x663   : > { %v3531_v54 = vadd.f32 %v3530_v18, %v3529_v38  ;;  %v3594_v55 = vrot.slane %v3593_v22, 2  ;;  %v3548_v57 = vrot.slane %v3547_v23, 2  ;;  %v3611_v56 = vadd.f32 %v3610_v26, %v3567_v42 }
 0x664   : > { %v3543_v58 = vadd.f32 %v3542_v29, %v3541_v19  ;;  %v3606_v33 = vrot.slane %v3605_v31, 2  ;;  %v3537_v60 = vadd.f32 %v3536_v32, %v3535_v15  ;;  %v3600_v34 = vrot.slane %v3599_v48, 2 }
 0x665   : > { %v3532_v35 = vrot.slane %v3531_v54, 1  ;;  %v3595_v36 = vadd.f32 %v3594_v55, %v3593_v22  ;;  %v3549_v41 = vadd.f32 %v3548_v57, %v3547_v23  ;;  %v3612_v25 = vrot.slane %v3611_v56, 2 }
 0x666   : > { %v3544_v1 = vrot.slane %v3543_v58, 1  ;;  %v3607_v2 = vadd.f32 %v3606_v33, %v3605_v31  ;;  %v3538_v44 = vrot.slane %v3537_v60, 1  ;;  %v3601_v46 = vadd.f32 %v3600_v34, %v3599_v48 }
 0x667   : > { %v3533_v47 = vadd.f32 %v3532_v35, %v3531_v54  ;;  %v3596_v49 = vrot.slane %v3595_v36, 1  ;;  %v3550_v28 = vrot.slane %v3549_v41, 1  ;;  %v3613_v5 = vadd.f32 %v3612_v25, %v3611_v56 }
 0x668   : > { %v3545_v50 = vadd.f32 %v3544_v1, %v3543_v58  ;;  %v3608_v51 = vrot.slane %v3607_v2, 1  ;;  %v3539_v61 = vadd.f32 %v3538_v44, %v3537_v60  ;;  %v3602_v45 = vrot.slane %v3601_v46, 1 }
 0x669   : > { %v3556_v52 = vmul.f32 0.125, %v3533_v47  ;;  %v3597_v62 = vadd.f32 %v3596_v49, %v3595_v36  ;;  %v3551_v27 = vadd.f32 %v3550_v28, %v3549_v41  ;;  %v3614_v53 = vrot.slane %v3613_v5, 1 }
 0x66a   : > { %v3558_v63 = vmul.f32 0.125, %v3545_v50  ;;  %v3609_v0 = vadd.f32 %v3608_v51, %v3607_v2  ;;  %v3557_v30 = vmul.f32 0.125, %v3539_v61  ;;  %v3603_v3 = vadd.f32 %v3602_v45, %v3601_v46 }
 0x66b   : > { %v3620_v59 = vmul.f32 0.125, %v3597_v62  ;;  %v3628_v4 = vmul.f32 %v3556_v52, %v3556_v52  ;;  %v3559_v8 = vmul.f32 0.125, %v3551_v27  ;;  %v3615_v40 = vadd.f32 %v3614_v53, %v3613_v5 }
 0x66c   : > { %v3622_v9 = vmul.f32 0.125, %v3609_v0  ;;  %v3630_v10 = vmul.f32 %v3558_v63, %v3558_v63  ;;  %v3621_v12 = vmul.f32 0.125, %v3603_v3  ;;  %v3629_v39 = vmul.f32 %v3557_v30, %v3557_v30 }
 0x66d   : > { %v3636_v38 = vsub.f32 %v3620_v59, %v3628_v4  ;;  %v3631_v11 = vmul.f32 %v3559_v8, %v3559_v8  ;;  %v3623_v14 = vmul.f32 0.125, %v3615_v40  ;;  %v3699_v31 = vsub.s32 4, %v9396_v24 }
 0x66e   : > { %v3638_v42 = vsub.f32 %v3622_v9, %v3630_v10  ;;  %v3637_v19 = vsub.f32 %v3621_v12, %v3629_v39  ;;  %v3707_v32 = vsub.s32 6, %v9396_v24  ;;  %v3703_v48 = vsub.s32 5, %v9396_v24 }
 0x66f   : > { %v3644_v13 = vmax.f32 %v3636_v38, 0.0  ;;  %v3639_v18 = vsub.f32 %v3623_v14, %v3631_v11  ;;  %v3652_v54 = vsub.f32 %v9555_v43, %v3556_v52  ;;  %v3700_v55 = vrot.slane %v9531_v20, %v3699_v31 }
 0x670   : > { %v3646_v15 = vmax.f32 %v3638_v42, 0.0  ;;  %v3645_v17 = vmax.f32 %v3637_v19, 0.0  ;;  %v3711_v57 = vsub.s32 7, %v9396_v24  ;;  %v3654_v58 = vsub.f32 %v9560_v6, %v3558_v63 }
 0x671   : > { %v3660_v16 = vadd.f32 0.8, %v3644_v13  ;;  %v3647_v26 = vmax.f32 %v3639_v18, 0.0  ;;  %v3708_v33 = vrot.slane %v9531_v20, %v3707_v32  ;;  %v3749_v35 = vrot.slane %v9533_v21, %v3699_v31 }
 0x672   : > { %v3662_v22 = vadd.f32 0.8, %v3646_v15  ;;  %v3661_v23 = vadd.f32 0.8, %v3645_v17  ;;  %v3653_v36 = vsub.f32 %v9562_v7, %v3557_v30  ;;  %v3704_v41 = vrot.slane %v9531_v20, %v3703_v48 }
 0x673   : > { %7876 = vrsqrt.f32 %v3660_v16  ;;  %v3663_v29 = vadd.f32 0.8, %v3647_v26  ;;  %v3757_v43 = vrot.slane %v9533_v21, %v3707_v32  ;;  %v3753_v2 = vrot.slane %v9533_v21, %v3703_v48 }
 0x674   : > { %7878 = vrsqrt.f32 %v3662_v22  ;;  %v3655_v6 = vsub.f32 %v9570_v37, %v3559_v8  ;;  %v3712_v46 = vrot.slane %v9531_v20, %v3711_v57  ;;  %v3761_v7 = vrot.slane %v9533_v21, %v3711_v57 }
 0x675   : > { %7880 = vrsqrt.f32 %v3661_v23 }
 0x676   : > { %7882 = vrsqrt.f32 %v3663_v29 }
 0x67d   : > { %v7877_v56 = vpop.eup %7876 }
 0x67e   : > { %v7879_v60 = vpop.eup %7878  ;;  %v3676_v34 = vmul.f32 %v7877_v56, %v3652_v54 }
 0x67f   : > { %v7881_v25 = vpop.eup %7880  ;;  %v3678_v1 = vmul.f32 %v7879_v60, %v3654_v58 }
 0x680   : > { %v3725_v24 = vmul.f32 %v3700_v55, %v3676_v34  ;;  %v3677_v44 = vmul.f32 %v7881_v25, %v3653_v36  ;;  %v7883_v47 = vpop.eup %7882 }
 0x681   : > { %v3727_v49 = vmul.f32 %v3708_v33, %v3678_v1  ;;  %v3679_v50 = vmul.f32 %v7883_v47, %v3655_v6 }
 0x682   : > { %v3774_v28 = vadd.f32 %v3749_v35, %v3725_v24  ;;  %v3726_v5 = vmul.f32 %v3704_v41, %v3677_v44 }
 0x683   : > { %v3776_v51 = vadd.f32 %v3757_v43, %v3727_v49  ;;  %v3728_v52 = vmul.f32 %v3712_v46, %v3679_v50 }
 0x684   : > { %vm3782_vm14 = vcmp.gt.f32.partialorder %v3774_v28, 0.0  ;;  %v3790_v61 = vmul.f32 0.2, %v3774_v28  ;;  %v3775_v45 = vadd.f32 %v3753_v2, %v3726_v5 }
 0x685   : > { %vm3784_vm15 = vcmp.gt.f32.partialorder %v3776_v51, 0.0  ;;  %v3792_v62 = vmul.f32 0.2, %v3776_v51  ;;  %v3777_v37 = vadd.f32 %v3761_v7, %v3728_v52 }
 0x686   : > { %v3798_v27 = vsel %vm3782_vm14, %v3774_v28, %v3790_v61  ;;  %vm3783_vm0 = vcmp.gt.f32.partialorder %v3775_v45, 0.0  ;;  %v3791_v53 = vmul.f32 0.2, %v3775_v45 }
 0x687   : > { %v3800_v63 = vsel %vm3784_vm15, %v3776_v51, %v3792_v62  ;;  %vm3785_vm1 = vcmp.gt.f32.partialorder %v3777_v37, 0.0  ;;  %v3793_v0 = vmul.f32 0.2, %v3777_v37 }
 0x688   : > { %v3799_v20 = vsel %vm3783_vm0, %v3775_v45, %v3791_v53 }
 0x689   : > { %v7377_v30 = vpack.c.bf16 %v3799_v20, %v3798_v27  ;;  %v3801_v3 = vsel %vm3785_vm1, %v3777_v37, %v3793_v0 }
 0x68a   : > { %v7378_v59 = vpack.c.bf16 %v3801_v3, %v3800_v63 }
 0x68b   : > { %3836 = vst [vmem:[#allocation2 + $0x10] sm:$0xff] %v7377_v30 }
 0x68c   : > { %3837 = vst [vmem:[#allocation2 + $0x18] sm:$0xff] %v7378_v59 }
 0x68d PF: > { %v7884_v21 = vld [vmem:[%s9366_s22 + $0x4] ss:$20 sps:$4 sm:$0xff]   ;;  %v7886_v4 = vld [vmem:[%s9366_s22 + $0xc] ss:$20 sps:$4 sm:$0xff]   ;;  %v7889_v9 = vld [vmem:[%s9366_s22 + $0x8] ss:$20 sps:$4 sm:$0xff]  }
 0x68e   : > { %5945 = vmatprep.subr.bf16.mxu0 %v7884_v21  ;;  %v7888_v8 = vld [vmem:[%s9366_s22] ss:$20 sps:$4 sm:$0xff]   ;;  %6109 = vmatprep.subr.bf16.mxu1 %v7886_v4  ;;  %v7894_v38 = vld [vmem:[%s9366_s22 + $0x28] ss:$20 sps:$4 sm:$0xff]   ;;  %v7895_v39 = vld [vmem:[%s9366_s22 + $0x30] ss:$20 sps:$4 sm:$0xff]  }
 0x68f   : > { %v7890_v10 = vld [vmem:[%s9366_s22 + $0x2c] ss:$20 sps:$4 sm:$0xff]   ;;  %5946 = vmatpush1.bf16.msra.mxu0 %v7888_v8  ;;  %6110 = vmatpush1.bf16.msra.mxu1 %v7889_v9  ;;  %v7892_v12 = vld [vmem:[%s9366_s22 + $0x34] ss:$20 sps:$4 sm:$0xff]   ;;  %v7898_v42 = vld [vmem:[%s9366_s22 + $0x5c] ss:$20 sps:$4 sm:$0xff]  }
 0x690   : > { %5947 = vmatprep.subr.bf16.mxu0 %v7890_v10  ;;  %6111 = vmatprep.subr.bf16.mxu1 %v7892_v12  ;;  %v7896_v40 = vld [vmem:[%s9366_s22 + $0x54] ss:$20 sps:$4 sm:$0xff]   ;;  %v7900_v11 = vld [vmem:[%s9366_s22 + $0x50] ss:$20 sps:$4 sm:$0xff]   ;;  %v7901_v13 = vld [vmem:[%s9366_s22 + $0x58] ss:$20 sps:$4 sm:$0xff]  }
 0x691   : > { %v7902_v19 = vld [vmem:[%s9366_s22 + $0x7c] ss:$20 sps:$4 sm:$0xff]   ;;  %v7904_v14 = vld [vmem:[%s9366_s22 + $0x84] ss:$20 sps:$4 sm:$0xff]   ;;  %v7907_v16 = vld [vmem:[%s9366_s22 + $0x80] ss:$20 sps:$4 sm:$0xff]  }
 0x692   : > { %v7906_v15 = vld [vmem:[%s9366_s22 + $0x78] ss:$20 sps:$4 sm:$0xff]   ;;  %v7912_v22 = vld [vmem:[%s9366_s22 + $0xa0] ss:$20 sps:$4 sm:$0xff]   ;;  %v7913_v23 = vld [vmem:[%s9366_s22 + $0xa8] ss:$20 sps:$4 sm:$0xff]  }
 0x693   : > { %5948 = vmatpush1.bf16.msra.mxu0 %v7894_v38  ;;  %6112 = vmatpush1.bf16.msra.mxu1 %v7895_v39  ;;  %v7908_v17 = vld [vmem:[%s9366_s22 + $0xa4] ss:$20 sps:$4 sm:$0xff]   ;;  %v7910_v18 = vld [vmem:[%s9366_s22 + $0xac] ss:$20 sps:$4 sm:$0xff]   ;;  %v7916_v29 = vld [vmem:[%s9366_s22 + $0xd4] ss:$20 sps:$4 sm:$0xff]  }
 0x694   : > { %5949 = vmatprep.subr.bf16.mxu0 %v7896_v40  ;;  %6113 = vmatprep.subr.bf16.mxu1 %v7898_v42  ;;  %v7914_v26 = vld [vmem:[%s9366_s22 + $0xcc] ss:$20 sps:$4 sm:$0xff]   ;;  %v7918_v31 = vld [vmem:[%s9366_s22 + $0xc8] ss:$20 sps:$4 sm:$0xff]   ;;  %v7919_v32 = vld [vmem:[%s9366_s22 + $0xd0] ss:$20 sps:$4 sm:$0xff]  }
 0x695   : > { %v7920_v48 = vld [vmem:[%s9366_s22 + $0xf4] ss:$20 sps:$4 sm:$0xff]   ;;  %v7922_v54 = vld [vmem:[%s9366_s22 + $0xfc] ss:$20 sps:$4 sm:$0xff]   ;;  %v7925_v57 = vld [vmem:[%s9366_s22 + $0xf8] ss:$20 sps:$4 sm:$0xff]  }
 0x696   : > { %v7924_v55 = vld [vmem:[%s9366_s22 + $0xf0] ss:$20 sps:$4 sm:$0xff]   ;;  %v7930_v33 = vld [vmem:[%s9366_s22 + $0x118] ss:$20 sps:$4 sm:$0xff]   ;;  %v7931_v60 = vld [vmem:[%s9366_s22 + $0x120] ss:$20 sps:$4 sm:$0xff]  }
 0x697   : > { %5950 = vmatpush1.bf16.msra.mxu0 %v7900_v11  ;;  %6114 = vmatpush1.bf16.msra.mxu1 %v7901_v13  ;;  %v7926_v56 = vld [vmem:[%s9366_s22 + $0x11c] ss:$20 sps:$4 sm:$0xff]   ;;  %v7928_v58 = vld [vmem:[%s9366_s22 + $0x124] ss:$20 sps:$4 sm:$0xff]   ;;  %v7934_v35 = vld [vmem:[%s9366_s22 + $0x14c] ss:$20 sps:$4 sm:$0xff]  }
 0x698   : > { %5951 = vmatprep.subr.bf16.mxu0 %v7902_v19  ;;  %6115 = vmatprep.subr.bf16.mxu1 %v7904_v14  ;;  %v7932_v34 = vld [vmem:[%s9366_s22 + $0x144] ss:$20 sps:$4 sm:$0xff]   ;;  %v7936_v36 = vld [vmem:[%s9366_s22 + $0x140] ss:$20 sps:$4 sm:$0xff]   ;;  %v7937_v41 = vld [vmem:[%s9366_s22 + $0x148] ss:$20 sps:$4 sm:$0xff]  }
 0x699   : > { %v7938_v25 = vld [vmem:[%s9366_s22 + $0x16c] ss:$20 sps:$4 sm:$0xff]   ;;  %v7940_v1 = vld [vmem:[%s9366_s22 + $0x174] ss:$20 sps:$4 sm:$0xff]   ;;  %v7943_v2 = vld [vmem:[%s9366_s22 + $0x170] ss:$20 sps:$4 sm:$0xff]  }
 0x69a   : > { %v7942_v43 = vld [vmem:[%s9366_s22 + $0x168] ss:$20 sps:$4 sm:$0xff]   ;;  %v7948_v6 = vld [vmem:[%s9366_s22 + $0x190] ss:$20 sps:$4 sm:$0xff]   ;;  %v7949_v46 = vld [vmem:[%s9366_s22 + $0x198] ss:$20 sps:$4 sm:$0xff]  }
 0x69b   : > { %5952 = vmatpush1.bf16.msra.mxu0 %v7906_v15  ;;  %6116 = vmatpush1.bf16.msra.mxu1 %v7907_v16  ;;  %v7944_v24 = vld [vmem:[%s9366_s22 + $0x194] ss:$20 sps:$4 sm:$0xff]   ;;  %v7946_v44 = vld [vmem:[%s9366_s22 + $0x19c] ss:$20 sps:$4 sm:$0xff]   ;;  %v7952_v49 = vld [vmem:[%s9366_s22 + $0x1c4] ss:$20 sps:$4 sm:$0xff]  }
 0x69c   : > { %5953 = vmatprep.subr.bf16.mxu0 %v7908_v17  ;;  %6117 = vmatprep.subr.bf16.mxu1 %v7910_v18  ;;  %v7950_v47 = vld [vmem:[%s9366_s22 + $0x1bc] ss:$20 sps:$4 sm:$0xff]   ;;  %v3838_v28 = vld [vmem:[#allocation2] sm:$0xff]  ;;  %v7955_v7 = vld [vmem:[%s9366_s22 + $0x1c0] ss:$20 sps:$4 sm:$0xff]   ;;  %s7379_s13 = smul.u32 640, %s8967_s19 }
 0x69d   : > { %v7954_v5 = vld [vmem:[%s9366_s22 + $0x1b8] ss:$20 sps:$4 sm:$0xff]   ;;  %v9642_v50 = vcombine.high %v3838_v28, %v3838_v28  ;;  %v7960_v45 = vld [vmem:[%s9366_s22 + $0x1e0] ss:$20 sps:$4 sm:$0xff]   ;;  %v7961_v52 = vld [vmem:[%s9366_s22 + $0x1e8] ss:$20 sps:$4 sm:$0xff]   ;;  %v9666_v12 = vcombine.low %v3838_v28, %v3838_v28 }
 0x69e   : > { %v7956_v51 = vld [vmem:[%s9366_s22 + $0x1e4] ss:$20 sps:$4 sm:$0xff]   ;;  %v7958_v61 = vld [vmem:[%s9366_s22 + $0x1ec] ss:$20 sps:$4 sm:$0xff]   ;;  %v7964_v27 = vld [vmem:[%s9366_s22 + $0x214] ss:$20 sps:$4 sm:$0xff]  }
 0x69f   : > { %5954 = vmatpush1.bf16.msra.mxu0 %v7912_v22  ;;  %6118 = vmatpush1.bf16.msra.mxu1 %v7913_v23  ;;  %v7962_v62 = vld [vmem:[%s9366_s22 + $0x20c] ss:$20 sps:$4 sm:$0xff]   ;;  %v7966_v53 = vld [vmem:[%s9366_s22 + $0x208] ss:$20 sps:$4 sm:$0xff]   ;;  %v7967_v37 = vld [vmem:[%s9366_s22 + $0x210] ss:$20 sps:$4 sm:$0xff]  }
 0x6a0   : > { %5955 = vmatprep.subr.bf16.mxu0 %v7914_v26  ;;  %6119 = vmatprep.subr.bf16.mxu1 %v7916_v29  ;;  %v7968_v63 = vld [vmem:[%s9366_s22 + $0x234] ss:$20 sps:$4 sm:$0xff]   ;;  %v7970_v20 = vld [vmem:[%s9366_s22 + $0x23c] ss:$20 sps:$4 sm:$0xff]   ;;  %v7973_v30 = vld [vmem:[%s9366_s22 + $0x238] ss:$20 sps:$4 sm:$0xff]  }
 0x6a1   : > { %5977 = vmatprep.mubr.bf16.mxu0 %v9642_v50  ;;  %6141 = vmatprep.mubr.bf16.mxu1 %v9642_v50  ;;  %v7972_v0 = vld [vmem:[%s9366_s22 + $0x230] ss:$20 sps:$4 sm:$0xff]   ;;  %v7978_v21 = vld [vmem:[%s9366_s22 + $0x258] ss:$20 sps:$4 sm:$0xff]   ;;  %v7979_v4 = vld [vmem:[%s9366_s22 + $0x260] ss:$20 sps:$4 sm:$0xff]  }
 0x6a2   : > { %v7974_v3 = vld [vmem:[%s9366_s22 + $0x25c] ss:$20 sps:$4 sm:$0xff]   ;;  %v7976_v59 = vld [vmem:[%s9366_s22 + $0x264] ss:$20 sps:$4 sm:$0xff]   ;;  %v7986_v9 = vld [vmem:[%s9366_s22 + $0x28c] ss:$20 sps:$4 sm:$0xff]  }
 0x6a3   : > { %5956 = vmatpush1.bf16.msra.mxu0 %v7918_v31  ;;  %6120 = vmatpush1.bf16.msra.mxu1 %v7919_v32  ;;  %v7983_v8 = vld [vmem:[%s9366_s22 + $0x284] ss:$20 sps:$4 sm:$0xff]   ;;  %v7981_v10 = vld [vmem:[%s9366_s22 + $0x280] ss:$20 sps:$4 sm:$0xff]   ;;  %v7984_v38 = vld [vmem:[%s9366_s22 + $0x288] ss:$20 sps:$4 sm:$0xff]  }
 0x6a4   : > { %5957 = vmatprep.subr.bf16.mxu0 %v7920_v48  ;;  %6121 = vmatprep.subr.bf16.mxu1 %v7922_v54  ;;  %v7990_v39 = vld [vmem:[%s9366_s22 + $0x2ac] ss:$20 sps:$4 sm:$0xff]   ;;  %v7993_v40 = vld [vmem:[%s9366_s22 + $0x2b4] ss:$20 sps:$4 sm:$0xff]   ;;  %v7991_v11 = vld [vmem:[%s9366_s22 + $0x2b0] ss:$20 sps:$4 sm:$0xff]  }
 0x6a5   : > { %v7988_v42 = vld [vmem:[%s9366_s22 + $0x2a8] ss:$20 sps:$4 sm:$0xff]   ;;  %v7994_v14 = vld [vmem:[%s9366_s22 + $0x2d0] ss:$20 sps:$4 sm:$0xff]   ;;  %v7997_v15 = vld [vmem:[%s9366_s22 + $0x2d8] ss:$20 sps:$4 sm:$0xff]  }
 0x6a6   : > { %v7996_v13 = vld [vmem:[%s9366_s22 + $0x2d4] ss:$20 sps:$4 sm:$0xff]   ;;  %v7999_v19 = vld [vmem:[%s9366_s22 + $0x2dc] ss:$20 sps:$4 sm:$0xff]   ;;  %v8005_v17 = vld [vmem:[%s9366_s22 + $0x304] ss:$20 sps:$4 sm:$0xff]  }
 0x6a7   : > { %5958 = vmatpush1.bf16.msra.mxu0 %v7924_v55  ;;  %6122 = vmatpush1.bf16.msra.mxu1 %v7925_v57  ;;  %v8002_v16 = vld [vmem:[%s9366_s22 + $0x2fc] ss:$20 sps:$4 sm:$0xff]   ;;  %v8000_v18 = vld [vmem:[%s9366_s22 + $0x2f8] ss:$20 sps:$4 sm:$0xff]   ;;  %v8003_v22 = vld [vmem:[%s9366_s22 + $0x300] ss:$20 sps:$4 sm:$0xff]  }
 0x6a8   : > { %5959 = vmatprep.subr.bf16.mxu0 %v7926_v56  ;;  %6123 = vmatprep.subr.bf16.mxu1 %v7928_v58  ;;  %v8008_v23 = vld [vmem:[%s9366_s22 + $0x324] ss:$20 sps:$4 sm:$0xff]   ;;  %v8011_v26 = vld [vmem:[%s9366_s22 + $0x32c] ss:$20 sps:$4 sm:$0xff]   ;;  %v8009_v31 = vld [vmem:[%s9366_s22 + $0x328] ss:$20 sps:$4 sm:$0xff]  }
 0x6a9   : > { %v8006_v29 = vld [vmem:[%s9366_s22 + $0x320] ss:$20 sps:$4 sm:$0xff]   ;;  %v8012_v54 = vld [vmem:[%s9366_s22 + $0x348] ss:$20 sps:$4 sm:$0xff]   ;;  %v8015_v55 = vld [vmem:[%s9366_s22 + $0x350] ss:$20 sps:$4 sm:$0xff]  }
 0x6aa   : > { %v8014_v32 = vld [vmem:[%s9366_s22 + $0x34c] ss:$20 sps:$4 sm:$0xff]   ;;  %v8017_v48 = vld [vmem:[%s9366_s22 + $0x354] ss:$20 sps:$4 sm:$0xff]   ;;  %v8023_v56 = vld [vmem:[%s9366_s22 + $0x37c] ss:$20 sps:$4 sm:$0xff]  }
 0x6ab   : > { %5960 = vmatpush1.bf16.msra.mxu0 %v7930_v33  ;;  %6124 = vmatpush1.bf16.msra.mxu1 %v7931_v60  ;;  %v8020_v57 = vld [vmem:[%s9366_s22 + $0x374] ss:$20 sps:$4 sm:$0xff]   ;;  %v8018_v60 = vld [vmem:[%s9366_s22 + $0x370] ss:$20 sps:$4 sm:$0xff]   ;;  %s6458_s18 = sshll.u32 %s9376_s24, 4  ;;  %s10117_s14 = sld [smem:[#allocation49_spill]]  ;;  %s9985_s18 = int_to_ptr.vmem [resolvable:$true] %s6458_s18 }
 0x6ac   : > { %5961 = vmatprep.subr.bf16.mxu0 %v7932_v34  ;;  %6125 = vmatprep.subr.bf16.mxu1 %v7934_v35  ;;  %v9693_v58 = vld [vmem:[#allocation2 + $0x8] sm:$0xff]  ;;  %s6444_s9 = scalar_lea.sflag [#allocation5], %s9363_s25  ;;  %s8746_s12 = scalar_lea.vmem %s9985_s18, 640 }
 0x6ad   : > { %v9697_v33 = vcombine.high %v9693_v58, %v9693_v58  ;;  %v8021_v34 = vld [vmem:[%s9366_s22 + $0x378] ss:$20 sps:$4 sm:$0xff]   ;;  %v8026_v35 = vld [vmem:[%s9366_s22 + $0x39c] ss:$20 sps:$4 sm:$0xff]   ;;  %p8747_p9 = scmp.ne.s32.totalorder %s9985_s18, %s8746_s12  ;;  %p10118_p1 = scmp.ne.s32.totalorder %s10086_s8, 0 }
 0x6ae   : > { %v8047_v28 = vld [vmem:[%s9366_s22 + $0x41c] ss:$20 sps:$4 sm:$0xff]   ;;  %s8870_s19 = smov [#allocation25]  }
 0x6af   : > { %5962 = vmatpush1.bf16.msra.mxu0 %v7936_v36  ;;  %6126 = vmatpush1.bf16.msra.mxu1 %v7937_v41  ;;  %v8029_v36 = vld [vmem:[%s9366_s22 + $0x3a4] ss:$20 sps:$4 sm:$0xff]   ;;  %p8748_p10 = pnand %p8747_p9, %p10118_p1  ;;  %s8750_s17 = sshll.u32 %s8870_s19, 4  ;;  %s8751_s17 = int_to_ptr.vmem [resolvable:$false] %s8750_s17 }
 0x6b0   : > { %5963 = vmatprep.subr.bf16.mxu0 %v7938_v25  ;;  %6127 = vmatprep.subr.bf16.mxu1 %v7940_v1  ;;  %v8024_v41 = vld [vmem:[%s9366_s22 + $0x398] ss:$20 sps:$4 sm:$0xff]   ;;  %v8027_v25 = vld [vmem:[%s9366_s22 + $0x3a0] ss:$20 sps:$4 sm:$0xff]   ;;  %s8752_s0 = scalar_lea.vmem %s8751_s17, 1280  ;;  %p8753_p12 = scmp.lt.s32.totalorder %s9985_s18, %s8751_s17 }
 0x6b1   : > { %v8032_v1 = vld [vmem:[%s9366_s22 + $0x3c4] ss:$20 sps:$4 sm:$0xff]   ;;  %s9983_s11 = scalar_lea.hbm %s10117_s14, %s7379_s13  ;;  %p8749_p11 = pneg %p8748_p10 }
 0x6b2   : > { %p8754_p13 = scmp.lt.s32.totalorder %s8752_s0, %s8746_s12 }
 0x6b3   : > { %5964 = vmatpush1.bf16.msra.mxu0 %v7942_v43  ;;  %6128 = vmatpush1.bf16.msra.mxu1 %v7943_v2  ;;  %v8035_v43 = vld [vmem:[%s9366_s22 + $0x3cc] ss:$20 sps:$4 sm:$0xff]  }
 0x6b4   : > { %5965 = vmatprep.subr.bf16.mxu0 %v7944_v24  ;;  %6129 = vmatprep.subr.bf16.mxu1 %v7946_v44  ;;  %v8030_v2 = vld [vmem:[%s9366_s22 + $0x3c0] ss:$20 sps:$4 sm:$0xff]   ;;  %v8033_v24 = vld [vmem:[%s9366_s22 + $0x3c8] ss:$20 sps:$4 sm:$0xff]   ;;  %p8755_p8 = por %p8754_p13, %p8753_p12 }
 0x6b5   : > { %v8038_v44 = vld [vmem:[%s9366_s22 + $0x3ec] ss:$20 sps:$4 sm:$0xff]  }
 0x6b6   : > { %p8756_p7 = pnand %p8755_p8, %p8749_p11 }
 0x6b7   : > { %5966 = vmatpush1.bf16.msra.mxu0 %v7948_v6  ;;  %6130 = vmatpush1.bf16.msra.mxu1 %v7949_v46  ;;  %v8041_v6 = vld [vmem:[%s9366_s22 + $0x3f4] ss:$20 sps:$4 sm:$0xff]  }
 0x6b8   : > { %5967 = vmatprep.subr.bf16.mxu0 %v7950_v47  ;;  %6131 = vmatprep.subr.bf16.mxu1 %v7952_v49  ;;  %v8036_v46 = vld [vmem:[%s9366_s22 + $0x3e8] ss:$20 sps:$4 sm:$0xff]   ;;  %v8039_v47 = vld [vmem:[%s9366_s22 + $0x3f0] ss:$20 sps:$4 sm:$0xff]  }
 0x6b9   : > { %v8044_v49 = vld [vmem:[%s9366_s22 + $0x414] ss:$20 sps:$4 sm:$0xff]  }
 0x6bb   : > { %5968 = vmatpush1.bf16.msra.mxu0 %v7954_v5  ;;  %6132 = vmatpush1.bf16.msra.mxu1 %v7955_v7  ;;  %v8042_v5 = vld [vmem:[%s9366_s22 + $0x410] ss:$20 sps:$4 sm:$0xff]   ;;  %v8045_v7 = vld [vmem:[%s9366_s22 + $0x418] ss:$20 sps:$4 sm:$0xff]  }
 0x6bc   : > { %5969 = vmatprep.subr.bf16.mxu0 %v7956_v51  ;;  %6133 = vmatprep.subr.bf16.mxu1 %v7958_v61  ;;  %v8050_v51 = vld [vmem:[%s9366_s22 + $0x43c] ss:$20 sps:$4 sm:$0xff]   ;;  %v8053_v61 = vld [vmem:[%s9366_s22 + $0x444] ss:$20 sps:$4 sm:$0xff]  }
 0x6bf   : > { %5970 = vmatpush1.bf16.msra.mxu0 %v7960_v45  ;;  %6134 = vmatpush1.bf16.msra.mxu1 %v7961_v52  ;;  %v8048_v45 = vld [vmem:[%s9366_s22 + $0x438] ss:$20 sps:$4 sm:$0xff]   ;;  %v8051_v52 = vld [vmem:[%s9366_s22 + $0x440] ss:$20 sps:$4 sm:$0xff]  }
 0x6c0   : > { %5971 = vmatprep.subr.bf16.mxu0 %v7962_v62  ;;  %6135 = vmatprep.subr.bf16.mxu1 %v7964_v27  ;;  %v8056_v62 = vld [vmem:[%s9366_s22 + $0x464] ss:$20 sps:$4 sm:$0xff]   ;;  %v8059_v27 = vld [vmem:[%s9366_s22 + $0x46c] ss:$20 sps:$4 sm:$0xff]  }
 0x6c3   : > { %5972 = vmatpush1.bf16.msra.mxu0 %v7966_v53  ;;  %6136 = vmatpush1.bf16.msra.mxu1 %v7967_v37  ;;  %v8054_v53 = vld [vmem:[%s9366_s22 + $0x460] ss:$20 sps:$4 sm:$0xff]   ;;  %v8057_v37 = vld [vmem:[%s9366_s22 + $0x468] ss:$20 sps:$4 sm:$0xff]  }
 0x6c4   : > { %5973 = vmatprep.subr.bf16.mxu0 %v7968_v63  ;;  %6137 = vmatprep.subr.bf16.mxu1 %v7970_v20  ;;  %v8062_v63 = vld [vmem:[%s9366_s22 + $0x48c] ss:$20 sps:$4 sm:$0xff]   ;;  %v8065_v20 = vld [vmem:[%s9366_s22 + $0x494] ss:$20 sps:$4 sm:$0xff]  }
 0x6c7   : > { %5974 = vmatpush1.bf16.msra.mxu0 %v7972_v0  ;;  %6138 = vmatpush1.bf16.msra.mxu1 %v7973_v30  ;;  %v8060_v0 = vld [vmem:[%s9366_s22 + $0x488] ss:$20 sps:$4 sm:$0xff]   ;;  %v8063_v30 = vld [vmem:[%s9366_s22 + $0x490] ss:$20 sps:$4 sm:$0xff]  }
 0x6c8   : > { %5975 = vmatprep.subr.bf16.mxu0 %v7974_v3  ;;  %6139 = vmatprep.subr.bf16.mxu1 %v7976_v59  ;;  %v8068_v3 = vld [vmem:[%s9366_s22 + $0x4b4] ss:$20 sps:$4 sm:$0xff]   ;;  %v8071_v59 = vld [vmem:[%s9366_s22 + $0x4bc] ss:$20 sps:$4 sm:$0xff]  }
 0x6cb   : > { %5976 = vmatpush1.bf16.msra.mxu0 %v7978_v21  ;;  %6140 = vmatpush1.bf16.msra.mxu1 %v7979_v4  ;;  %v8066_v21 = vld [vmem:[%s9366_s22 + $0x4b0] ss:$20 sps:$4 sm:$0xff]   ;;  %v8069_v4 = vld [vmem:[%s9366_s22 + $0x4b8] ss:$20 sps:$4 sm:$0xff]  }
 0x6cc   : > { %5986 = vmatprep.subr.bf16.mxu0 %v7983_v8  ;;  %6150 = vmatprep.subr.bf16.mxu1 %v7986_v9  ;;  %v8074_v8 = vld [vmem:[%s9366_s22 + $0x4dc] ss:$20 sps:$4 sm:$0xff]   ;;  %v8077_v9 = vld [vmem:[%s9366_s22 + $0x4e4] ss:$20 sps:$4 sm:$0xff]  }
 0x6ce   : > { %5978 = vmatmul.mubr.bf16.vlgmr.msra.gmra.mrb[0].mxu0 %v9666_v12  ;;  %6142 = vmatmul.mubr.bf16.vlgmr.msra.gmra.mrb[0].mxu1 %v9666_v12 }
 0x6cf   : > { %5987 = vmatpush1.bf16.msra.mxu0 %v7981_v10  ;;  %6151 = vmatpush1.bf16.msra.mxu1 %v7984_v38  ;;  %v8072_v10 = vld [vmem:[%s9366_s22 + $0x4d8] ss:$20 sps:$4 sm:$0xff]   ;;  %v8075_v38 = vld [vmem:[%s9366_s22 + $0x4e0] ss:$20 sps:$4 sm:$0xff]  }
 0x6d0   : > { %5988 = vmatprep.subr.bf16.mxu0 %v7990_v39  ;;  %6152 = vmatprep.subr.bf16.mxu1 %v7993_v40  ;;  %v8082_v39 = vld [vmem:[%s9366_s22 + $0x504] ss:$20 sps:$4 sm:$0xff]   ;;  %v8085_v40 = vld [vmem:[%s9366_s22 + $0x50c] ss:$20 sps:$4 sm:$0xff]  }
 0x6d1   : > { %6018 = vmatprep.mubr.bf16.mxu0 %v9697_v33  ;;  %6182 = vmatprep.mubr.bf16.mxu1 %v9697_v33 }
 0x6d3   : > { %5989 = vmatpush1.bf16.msra.mxu0 %v7988_v42  ;;  %6153 = vmatpush1.bf16.msra.mxu1 %v7991_v11  ;;  %v9743_v42 = vcombine.low %v9693_v58, %v9693_v58  ;;  %v8080_v11 = vld [vmem:[%s9366_s22 + $0x500] ss:$20 sps:$4 sm:$0xff]   ;;  %v8107_v58 = vld [vmem:[%s9366_s22 + $0x5a8] ss:$20 sps:$4 sm:$0xff]  }
 0x6d4   : > { %5990 = vmatprep.subr.bf16.mxu0 %v7996_v13  ;;  %6154 = vmatprep.subr.bf16.mxu1 %v7999_v19  ;;  %v8083_v13 = vld [vmem:[%s9366_s22 + $0x508] ss:$20 sps:$4 sm:$0xff]   ;;  %v8088_v19 = vld [vmem:[%s9366_s22 + $0x52c] ss:$20 sps:$4 sm:$0xff]  }
 0x6d7   : > { %5991 = vmatpush1.bf16.msra.mxu0 %v7994_v14  ;;  %6155 = vmatpush1.bf16.msra.mxu1 %v7997_v15  ;;  %v9748_v14 = vld [vmem:[#allocation2 + $0x10] sm:$0xff] }
 0x6d8   : > { %5992 = vmatprep.subr.bf16.mxu0 %v8002_v16  ;;  %6156 = vmatprep.subr.bf16.mxu1 %v8005_v17  ;;  %v8091_v15 = vld [vmem:[%s9366_s22 + $0x534] ss:$20 sps:$4 sm:$0xff]   ;;  %v9753_v16 = vcombine.high %v9748_v14, %v9748_v14 }
 0x6d9   : > { %v8086_v17 = vld [vmem:[%s9366_s22 + $0x528] ss:$20 sps:$4 sm:$0xff]  }
 0x6db   : > { %5993 = vmatpush1.bf16.msra.mxu0 %v8000_v18  ;;  %6157 = vmatpush1.bf16.msra.mxu1 %v8003_v22  ;;  %v8089_v18 = vld [vmem:[%s9366_s22 + $0x530] ss:$20 sps:$4 sm:$0xff]   ;;  %v8094_v22 = vld [vmem:[%s9366_s22 + $0x554] ss:$20 sps:$4 sm:$0xff]  }
 0x6dc   : > { %5994 = vmatprep.subr.bf16.mxu0 %v8008_v23  ;;  %6158 = vmatprep.subr.bf16.mxu1 %v8011_v26  ;;  %v8097_v23 = vld [vmem:[%s9366_s22 + $0x55c] ss:$20 sps:$4 sm:$0xff]  }
 0x6dd   : > { %v8092_v26 = vld [vmem:[%s9366_s22 + $0x550] ss:$20 sps:$4 sm:$0xff]  }
 0x6df   : > { %5995 = vmatpush1.bf16.msra.mxu0 %v8006_v29  ;;  %6159 = vmatpush1.bf16.msra.mxu1 %v8009_v31  ;;  %v8095_v29 = vld [vmem:[%s9366_s22 + $0x558] ss:$20 sps:$4 sm:$0xff]   ;;  %v8100_v31 = vld [vmem:[%s9366_s22 + $0x57c] ss:$20 sps:$4 sm:$0xff]  }
 0x6e0   : > { %5996 = vmatprep.subr.bf16.mxu0 %v8014_v32  ;;  %6160 = vmatprep.subr.bf16.mxu1 %v8017_v48  ;;  %v8103_v32 = vld [vmem:[%s9366_s22 + $0x584] ss:$20 sps:$4 sm:$0xff]  }
 0x6e1   : > { %v8098_v48 = vld [vmem:[%s9366_s22 + $0x578] ss:$20 sps:$4 sm:$0xff]  }
 0x6e3   : > { %5997 = vmatpush1.bf16.msra.mxu0 %v8012_v54  ;;  %6161 = vmatpush1.bf16.msra.mxu1 %v8015_v55  ;;  %v8101_v54 = vld [vmem:[%s9366_s22 + $0x580] ss:$20 sps:$4 sm:$0xff]   ;;  %v8106_v55 = vld [vmem:[%s9366_s22 + $0x5a4] ss:$20 sps:$4 sm:$0xff]  }
 0x6e4   : > { %5998 = vmatprep.subr.bf16.mxu0 %v8020_v57  ;;  %6162 = vmatprep.subr.bf16.mxu1 %v8023_v56  ;;  %v8109_v57 = vld [vmem:[%s9366_s22 + $0x5ac] ss:$20 sps:$4 sm:$0xff]  }
 0x6e5   : > { %v8104_v56 = vld [vmem:[%s9366_s22 + $0x5a0] ss:$20 sps:$4 sm:$0xff]  }
 0x6e7   : > { %5999 = vmatpush1.bf16.msra.mxu0 %v8018_v60  ;;  %6163 = vmatpush1.bf16.msra.mxu1 %v8021_v34  ;;  %v8112_v60 = vld [vmem:[%s9366_s22 + $0x5cc] ss:$20 sps:$4 sm:$0xff]   ;;  %v8115_v34 = vld [vmem:[%s9366_s22 + $0x5d4] ss:$20 sps:$4 sm:$0xff]  }
 0x6e8   : > { %6000 = vmatprep.subr.bf16.mxu0 %v8026_v35  ;;  %6164 = vmatprep.subr.bf16.mxu1 %v8029_v36  ;;  %v8110_v35 = vld [vmem:[%s9366_s22 + $0x5c8] ss:$20 sps:$4 sm:$0xff]   ;;  %v8113_v36 = vld [vmem:[%s9366_s22 + $0x5d0] ss:$20 sps:$4 sm:$0xff]  }
 0x6eb   : > { %6001 = vmatpush1.bf16.msra.mxu0 %v8024_v41  ;;  %6165 = vmatpush1.bf16.msra.mxu1 %v8027_v25  ;;  %v8118_v41 = vld [vmem:[%s9366_s22 + $0x5f4] ss:$20 sps:$4 sm:$0xff]   ;;  %v8121_v25 = vld [vmem:[%s9366_s22 + $0x5fc] ss:$20 sps:$4 sm:$0xff]  }
 0x6ec   : > { %6002 = vmatprep.subr.bf16.mxu0 %v8032_v1  ;;  %6166 = vmatprep.subr.bf16.mxu1 %v8035_v43  ;;  %v8116_v1 = vld [vmem:[%s9366_s22 + $0x5f0] ss:$20 sps:$4 sm:$0xff]   ;;  %v8119_v43 = vld [vmem:[%s9366_s22 + $0x5f8] ss:$20 sps:$4 sm:$0xff]  }
 0x6ef   : > { %6003 = vmatpush1.bf16.msra.mxu0 %v8030_v2  ;;  %6167 = vmatpush1.bf16.msra.mxu1 %v8033_v24  ;;  %v8124_v2 = vld [vmem:[%s9366_s22 + $0x61c] ss:$20 sps:$4 sm:$0xff]   ;;  %v8127_v24 = vld [vmem:[%s9366_s22 + $0x624] ss:$20 sps:$4 sm:$0xff]  }
 0x6f0   : > { %6004 = vmatprep.subr.bf16.mxu0 %v8038_v44  ;;  %6168 = vmatprep.subr.bf16.mxu1 %v8041_v6  ;;  %v8122_v44 = vld [vmem:[%s9366_s22 + $0x618] ss:$20 sps:$4 sm:$0xff]   ;;  %v8125_v6 = vld [vmem:[%s9366_s22 + $0x620] ss:$20 sps:$4 sm:$0xff]  }
 0x6f3   : > { %6005 = vmatpush1.bf16.msra.mxu0 %v8036_v46  ;;  %6169 = vmatpush1.bf16.msra.mxu1 %v8039_v47  ;;  %v8130_v46 = vld [vmem:[%s9366_s22 + $0x644] ss:$20 sps:$4 sm:$0xff]   ;;  %v8133_v47 = vld [vmem:[%s9366_s22 + $0x64c] ss:$20 sps:$4 sm:$0xff]  }
 0x6f4   : > { %6006 = vmatprep.subr.bf16.mxu0 %v8044_v49  ;;  %6170 = vmatprep.subr.bf16.mxu1 %v8047_v28  ;;  %v8128_v49 = vld [vmem:[%s9366_s22 + $0x640] ss:$20 sps:$4 sm:$0xff]   ;;  %v8131_v28 = vld [vmem:[%s9366_s22 + $0x648] ss:$20 sps:$4 sm:$0xff]  }
 0x6f7   : > { %6007 = vmatpush1.bf16.msra.mxu0 %v8042_v5  ;;  %6171 = vmatpush1.bf16.msra.mxu1 %v8045_v7  ;;  %v8136_v5 = vld [vmem:[%s9366_s22 + $0x66c] ss:$20 sps:$4 sm:$0xff]   ;;  %v8139_v7 = vld [vmem:[%s9366_s22 + $0x674] ss:$20 sps:$4 sm:$0xff]  }
 0x6f8   : > { %6008 = vmatprep.subr.bf16.mxu0 %v8050_v51  ;;  %6172 = vmatprep.subr.bf16.mxu1 %v8053_v61  ;;  %v8134_v51 = vld [vmem:[%s9366_s22 + $0x668] ss:$20 sps:$4 sm:$0xff]   ;;  %v8137_v61 = vld [vmem:[%s9366_s22 + $0x670] ss:$20 sps:$4 sm:$0xff]  }
 0x6fb   : > { %6009 = vmatpush1.bf16.msra.mxu0 %v8048_v45  ;;  %6173 = vmatpush1.bf16.msra.mxu1 %v8051_v52  ;;  %v8142_v45 = vld [vmem:[%s9366_s22 + $0x694] ss:$20 sps:$4 sm:$0xff]   ;;  %v8145_v52 = vld [vmem:[%s9366_s22 + $0x69c] ss:$20 sps:$4 sm:$0xff]  }
 0x6fc   : > { %6010 = vmatprep.subr.bf16.mxu0 %v8056_v62  ;;  %6174 = vmatprep.subr.bf16.mxu1 %v8059_v27  ;;  %v8140_v62 = vld [vmem:[%s9366_s22 + $0x690] ss:$20 sps:$4 sm:$0xff]   ;;  %v8143_v27 = vld [vmem:[%s9366_s22 + $0x698] ss:$20 sps:$4 sm:$0xff]  }
 0x6ff   : > { %6011 = vmatpush1.bf16.msra.mxu0 %v8054_v53  ;;  %6175 = vmatpush1.bf16.msra.mxu1 %v8057_v37  ;;  %v8148_v53 = vld [vmem:[%s9366_s22 + $0x6bc] ss:$20 sps:$4 sm:$0xff]   ;;  %v8151_v37 = vld [vmem:[%s9366_s22 + $0x6c4] ss:$20 sps:$4 sm:$0xff]  }
 0x700   : > { %6012 = vmatprep.subr.bf16.mxu0 %v8062_v63  ;;  %6176 = vmatprep.subr.bf16.mxu1 %v8065_v20  ;;  %v8146_v63 = vld [vmem:[%s9366_s22 + $0x6b8] ss:$20 sps:$4 sm:$0xff]   ;;  %v8149_v20 = vld [vmem:[%s9366_s22 + $0x6c0] ss:$20 sps:$4 sm:$0xff]  }
 0x703   : > { %6013 = vmatpush1.bf16.msra.mxu0 %v8060_v0  ;;  %6177 = vmatpush1.bf16.msra.mxu1 %v8063_v30  ;;  %v8154_v0 = vld [vmem:[%s9366_s22 + $0x6e4] ss:$20 sps:$4 sm:$0xff]   ;;  %v8157_v30 = vld [vmem:[%s9366_s22 + $0x6ec] ss:$20 sps:$4 sm:$0xff]  }
 0x704   : > { %6014 = vmatprep.subr.bf16.mxu0 %v8068_v3  ;;  %6178 = vmatprep.subr.bf16.mxu1 %v8071_v59  ;;  %v8152_v3 = vld [vmem:[%s9366_s22 + $0x6e0] ss:$20 sps:$4 sm:$0xff]   ;;  %v8155_v59 = vld [vmem:[%s9366_s22 + $0x6e8] ss:$20 sps:$4 sm:$0xff]  }
 0x707   : > { %6015 = vmatpush1.bf16.msra.mxu0 %v8066_v21  ;;  %6179 = vmatpush1.bf16.msra.mxu1 %v8069_v4  ;;  %v8160_v21 = vld [vmem:[%s9366_s22 + $0x70c] ss:$20 sps:$4 sm:$0xff]   ;;  %v8163_v4 = vld [vmem:[%s9366_s22 + $0x714] ss:$20 sps:$4 sm:$0xff]  }
 0x708   : > { %6016 = vmatprep.subr.bf16.mxu0 %v8074_v8  ;;  %6180 = vmatprep.subr.bf16.mxu1 %v8077_v9  ;;  %v8158_v8 = vld [vmem:[%s9366_s22 + $0x708] ss:$20 sps:$4 sm:$0xff]   ;;  %v8161_v9 = vld [vmem:[%s9366_s22 + $0x710] ss:$20 sps:$4 sm:$0xff]  }
 0x70b   : > { %6017 = vmatpush1.bf16.msra.mxu0 %v8072_v10  ;;  %6181 = vmatpush1.bf16.msra.mxu1 %v8075_v38  ;;  %v8166_v10 = vld [vmem:[%s9366_s22 + $0x734] ss:$20 sps:$4 sm:$0xff]   ;;  %v8169_v38 = vld [vmem:[%s9366_s22 + $0x73c] ss:$20 sps:$4 sm:$0xff]  }
 0x70c   : > { %6027 = vmatprep.subr.bf16.mxu0 %v8082_v39  ;;  %6191 = vmatprep.subr.bf16.mxu1 %v8085_v40  ;;  %v8164_v39 = vld [vmem:[%s9366_s22 + $0x730] ss:$20 sps:$4 sm:$0xff]   ;;  %v8167_v40 = vld [vmem:[%s9366_s22 + $0x738] ss:$20 sps:$4 sm:$0xff]  }
 0x70e   : > { %6019 = vmatmul.mubr.bf16.vlgmr.msra.gmra.mrb[0].mxu0 %v9743_v42  ;;  %6183 = vmatmul.mubr.bf16.vlgmr.msra.gmra.mrb[0].mxu1 %v9743_v42 }
 0x70f   : > { %6028 = vmatpush1.bf16.msra.mxu0 %v8080_v11  ;;  %6192 = vmatpush1.bf16.msra.mxu1 %v8083_v13  ;;  %v8172_v11 = vld [vmem:[%s9366_s22 + $0x75c] ss:$20 sps:$4 sm:$0xff]   ;;  %v8175_v13 = vld [vmem:[%s9366_s22 + $0x764] ss:$20 sps:$4 sm:$0xff]  }
 0x710   : > { %6029 = vmatprep.subr.bf16.mxu0 %v8088_v19  ;;  %6193 = vmatprep.subr.bf16.mxu1 %v8091_v15  ;;  %v8170_v19 = vld [vmem:[%s9366_s22 + $0x758] ss:$20 sps:$4 sm:$0xff]   ;;  %v8173_v15 = vld [vmem:[%s9366_s22 + $0x760] ss:$20 sps:$4 sm:$0xff]  }
 0x711   : > { %6059 = vmatprep.mubr.bf16.mxu0 %v9753_v16  ;;  %6223 = vmatprep.mubr.bf16.mxu1 %v9753_v16 }
 0x713   : > { %6030 = vmatpush1.bf16.msra.mxu0 %v8086_v17  ;;  %6194 = vmatpush1.bf16.msra.mxu1 %v8089_v18  ;;  %v8180_v17 = vld [vmem:[%s9366_s22 + $0x784] ss:$20 sps:$4 sm:$0xff]   ;;  %v8183_v18 = vld [vmem:[%s9366_s22 + $0x78c] ss:$20 sps:$4 sm:$0xff]  }
 0x714   : > { %6031 = vmatprep.subr.bf16.mxu0 %v8094_v22  ;;  %6195 = vmatprep.subr.bf16.mxu1 %v8097_v23  ;;  %v8178_v22 = vld [vmem:[%s9366_s22 + $0x780] ss:$20 sps:$4 sm:$0xff]   ;;  %v8181_v23 = vld [vmem:[%s9366_s22 + $0x788] ss:$20 sps:$4 sm:$0xff]  }
 0x717   : > { %6032 = vmatpush1.bf16.msra.mxu0 %v8092_v26  ;;  %6196 = vmatpush1.bf16.msra.mxu1 %v8095_v29  ;;  %v9823_v26 = vcombine.low %v9748_v14, %v9748_v14  ;;  %v9825_v29 = vld [vmem:[#allocation2 + $0x18] sm:$0xff] }
 0x718   : > { %6033 = vmatprep.subr.bf16.mxu0 %v8100_v31  ;;  %6197 = vmatprep.subr.bf16.mxu1 %v8103_v32  ;;  %v8186_v31 = vld [vmem:[%s9366_s22 + $0x7ac] ss:$20 sps:$4 sm:$0xff]   ;;  %v8189_v32 = vld [vmem:[%s9366_s22 + $0x7b4] ss:$20 sps:$4 sm:$0xff]   ;;  %v8187_v14 = vld [vmem:[%s9366_s22 + $0x7b0] ss:$20 sps:$4 sm:$0xff]  }
 0x71b   : > { %6034 = vmatpush1.bf16.msra.mxu0 %v8098_v48  ;;  %6198 = vmatpush1.bf16.msra.mxu1 %v8101_v54  ;;  %v8184_v48 = vld [vmem:[%s9366_s22 + $0x7a8] ss:$20 sps:$4 sm:$0xff]   ;;  %v9832_v54 = vcombine.high %v9825_v29, %v9825_v29 }
 0x71c   : > { %6035 = vmatprep.subr.bf16.mxu0 %v8106_v55  ;;  %6199 = vmatprep.subr.bf16.mxu1 %v8109_v57  ;;  %v8192_v55 = vld [vmem:[%s9366_s22 + $0x7d4] ss:$20 sps:$4 sm:$0xff]   ;;  %v8195_v57 = vld [vmem:[%s9366_s22 + $0x7dc] ss:$20 sps:$4 sm:$0xff]  }
 0x71f   : > { %6036 = vmatpush1.bf16.msra.mxu0 %v8104_v56  ;;  %6200 = vmatpush1.bf16.msra.mxu1 %v8107_v58  ;;  %v8190_v56 = vld [vmem:[%s9366_s22 + $0x7d0] ss:$20 sps:$4 sm:$0xff]   ;;  %v8193_v58 = vld [vmem:[%s9366_s22 + $0x7d8] ss:$20 sps:$4 sm:$0xff]  }
 0x720   : > { %6037 = vmatprep.subr.bf16.mxu0 %v8112_v60  ;;  %6201 = vmatprep.subr.bf16.mxu1 %v8115_v34  ;;  %v8198_v60 = vld [vmem:[%s9366_s22 + $0x7fc] ss:$20 sps:$4 sm:$0xff]   ;;  %v8201_v34 = vld [vmem:[%s9366_s22 + $0x804] ss:$20 sps:$4 sm:$0xff]  }
 0x723   : > { %6038 = vmatpush1.bf16.msra.mxu0 %v8110_v35  ;;  %6202 = vmatpush1.bf16.msra.mxu1 %v8113_v36  ;;  %v8196_v35 = vld [vmem:[%s9366_s22 + $0x7f8] ss:$20 sps:$4 sm:$0xff]   ;;  %v8199_v36 = vld [vmem:[%s9366_s22 + $0x800] ss:$20 sps:$4 sm:$0xff]  }
 0x724   : > { %6039 = vmatprep.subr.bf16.mxu0 %v8118_v41  ;;  %6203 = vmatprep.subr.bf16.mxu1 %v8121_v25  ;;  %v8204_v41 = vld [vmem:[%s9366_s22 + $0x824] ss:$20 sps:$4 sm:$0xff]   ;;  %v8207_v25 = vld [vmem:[%s9366_s22 + $0x82c] ss:$20 sps:$4 sm:$0xff]  }
 0x727   : > { %6040 = vmatpush1.bf16.msra.mxu0 %v8116_v1  ;;  %6204 = vmatpush1.bf16.msra.mxu1 %v8119_v43  ;;  %v8202_v1 = vld [vmem:[%s9366_s22 + $0x820] ss:$20 sps:$4 sm:$0xff]   ;;  %v8205_v43 = vld [vmem:[%s9366_s22 + $0x828] ss:$20 sps:$4 sm:$0xff]  }
 0x728   : > { %6041 = vmatprep.subr.bf16.mxu0 %v8124_v2  ;;  %6205 = vmatprep.subr.bf16.mxu1 %v8127_v24  ;;  %v8210_v2 = vld [vmem:[%s9366_s22 + $0x84c] ss:$20 sps:$4 sm:$0xff]   ;;  %v8213_v24 = vld [vmem:[%s9366_s22 + $0x854] ss:$20 sps:$4 sm:$0xff]  }
 0x72b   : > { %6042 = vmatpush1.bf16.msra.mxu0 %v8122_v44  ;;  %6206 = vmatpush1.bf16.msra.mxu1 %v8125_v6  ;;  %v8208_v44 = vld [vmem:[%s9366_s22 + $0x848] ss:$20 sps:$4 sm:$0xff]   ;;  %v8211_v6 = vld [vmem:[%s9366_s22 + $0x850] ss:$20 sps:$4 sm:$0xff]  }
 0x72c   : > { %6043 = vmatprep.subr.bf16.mxu0 %v8130_v46  ;;  %6207 = vmatprep.subr.bf16.mxu1 %v8133_v47  ;;  %v8216_v46 = vld [vmem:[%s9366_s22 + $0x874] ss:$20 sps:$4 sm:$0xff]   ;;  %v8219_v47 = vld [vmem:[%s9366_s22 + $0x87c] ss:$20 sps:$4 sm:$0xff]  }
 0x72f   : > { %6044 = vmatpush1.bf16.msra.mxu0 %v8128_v49  ;;  %6208 = vmatpush1.bf16.msra.mxu1 %v8131_v28  ;;  %v8214_v49 = vld [vmem:[%s9366_s22 + $0x870] ss:$20 sps:$4 sm:$0xff]   ;;  %v8217_v28 = vld [vmem:[%s9366_s22 + $0x878] ss:$20 sps:$4 sm:$0xff]  }
 0x730   : > { %6045 = vmatprep.subr.bf16.mxu0 %v8136_v5  ;;  %6209 = vmatprep.subr.bf16.mxu1 %v8139_v7  ;;  %v8222_v5 = vld [vmem:[%s9366_s22 + $0x89c] ss:$20 sps:$4 sm:$0xff]   ;;  %v8225_v7 = vld [vmem:[%s9366_s22 + $0x8a4] ss:$20 sps:$4 sm:$0xff]  }
 0x733   : > { %6046 = vmatpush1.bf16.msra.mxu0 %v8134_v51  ;;  %6210 = vmatpush1.bf16.msra.mxu1 %v8137_v61  ;;  %v8220_v51 = vld [vmem:[%s9366_s22 + $0x898] ss:$20 sps:$4 sm:$0xff]   ;;  %v8223_v61 = vld [vmem:[%s9366_s22 + $0x8a0] ss:$20 sps:$4 sm:$0xff]  }
 0x734   : > { %6047 = vmatprep.subr.bf16.mxu0 %v8142_v45  ;;  %6211 = vmatprep.subr.bf16.mxu1 %v8145_v52  ;;  %v8228_v45 = vld [vmem:[%s9366_s22 + $0x8c4] ss:$20 sps:$4 sm:$0xff]   ;;  %v8231_v52 = vld [vmem:[%s9366_s22 + $0x8cc] ss:$20 sps:$4 sm:$0xff]  }
 0x737   : > { %6048 = vmatpush1.bf16.msra.mxu0 %v8140_v62  ;;  %6212 = vmatpush1.bf16.msra.mxu1 %v8143_v27  ;;  %v8226_v62 = vld [vmem:[%s9366_s22 + $0x8c0] ss:$20 sps:$4 sm:$0xff]   ;;  %v8229_v27 = vld [vmem:[%s9366_s22 + $0x8c8] ss:$20 sps:$4 sm:$0xff]  }
 0x738   : > { %6049 = vmatprep.subr.bf16.mxu0 %v8148_v53  ;;  %6213 = vmatprep.subr.bf16.mxu1 %v8151_v37  ;;  %v8234_v53 = vld [vmem:[%s9366_s22 + $0x8ec] ss:$20 sps:$4 sm:$0xff]   ;;  %v8237_v37 = vld [vmem:[%s9366_s22 + $0x8f4] ss:$20 sps:$4 sm:$0xff]  }
 0x73b   : > { %6050 = vmatpush1.bf16.msra.mxu0 %v8146_v63  ;;  %6214 = vmatpush1.bf16.msra.mxu1 %v8149_v20  ;;  %v8232_v63 = vld [vmem:[%s9366_s22 + $0x8e8] ss:$20 sps:$4 sm:$0xff]   ;;  %v8235_v20 = vld [vmem:[%s9366_s22 + $0x8f0] ss:$20 sps:$4 sm:$0xff]  }
 0x73c   : > { %6051 = vmatprep.subr.bf16.mxu0 %v8154_v0  ;;  %6215 = vmatprep.subr.bf16.mxu1 %v8157_v30  ;;  %v8240_v0 = vld [vmem:[%s9366_s22 + $0x914] ss:$20 sps:$4 sm:$0xff]   ;;  %v8243_v30 = vld [vmem:[%s9366_s22 + $0x91c] ss:$20 sps:$4 sm:$0xff]  }
 0x73f   : > { %6052 = vmatpush1.bf16.msra.mxu0 %v8152_v3  ;;  %6216 = vmatpush1.bf16.msra.mxu1 %v8155_v59  ;;  %v8238_v3 = vld [vmem:[%s9366_s22 + $0x910] ss:$20 sps:$4 sm:$0xff]   ;;  %v8241_v59 = vld [vmem:[%s9366_s22 + $0x918] ss:$20 sps:$4 sm:$0xff]  }
 0x740   : > { %6053 = vmatprep.subr.bf16.mxu0 %v8160_v21  ;;  %6217 = vmatprep.subr.bf16.mxu1 %v8163_v4  ;;  %v8246_v21 = vld [vmem:[%s9366_s22 + $0x93c] ss:$20 sps:$4 sm:$0xff]   ;;  %v8249_v4 = vld [vmem:[%s9366_s22 + $0x944] ss:$20 sps:$4 sm:$0xff]  }
 0x743   : > { %6054 = vmatpush1.bf16.msra.mxu0 %v8158_v8  ;;  %6218 = vmatpush1.bf16.msra.mxu1 %v8161_v9  ;;  %v8244_v8 = vld [vmem:[%s9366_s22 + $0x938] ss:$20 sps:$4 sm:$0xff]   ;;  %v8247_v9 = vld [vmem:[%s9366_s22 + $0x940] ss:$20 sps:$4 sm:$0xff]  }
 0x744   : > { %6055 = vmatprep.subr.bf16.mxu0 %v8166_v10  ;;  %6219 = vmatprep.subr.bf16.mxu1 %v8169_v38  ;;  %v8252_v10 = vld [vmem:[%s9366_s22 + $0x964] ss:$20 sps:$4 sm:$0xff]   ;;  %v8255_v38 = vld [vmem:[%s9366_s22 + $0x96c] ss:$20 sps:$4 sm:$0xff]  }
 0x747   : > { %6056 = vmatpush1.bf16.msra.mxu0 %v8164_v39  ;;  %6220 = vmatpush1.bf16.msra.mxu1 %v8167_v40  ;;  %v8250_v39 = vld [vmem:[%s9366_s22 + $0x960] ss:$20 sps:$4 sm:$0xff]   ;;  %v8253_v40 = vld [vmem:[%s9366_s22 + $0x968] ss:$20 sps:$4 sm:$0xff]  }
 0x748   : > { %6057 = vmatprep.subr.bf16.mxu0 %v8172_v11  ;;  %6221 = vmatprep.subr.bf16.mxu1 %v8175_v13  ;;  %v8258_v11 = vld [vmem:[%s9366_s22 + $0x98c] ss:$20 sps:$4 sm:$0xff]   ;;  %v8261_v13 = vld [vmem:[%s9366_s22 + $0x994] ss:$20 sps:$4 sm:$0xff]  }
 0x74b   : > { %6058 = vmatpush1.bf16.msra.mxu0 %v8170_v19  ;;  %6222 = vmatpush1.bf16.msra.mxu1 %v8173_v15  ;;  %v8256_v19 = vld [vmem:[%s9366_s22 + $0x988] ss:$20 sps:$4 sm:$0xff]   ;;  %v8259_v15 = vld [vmem:[%s9366_s22 + $0x990] ss:$20 sps:$4 sm:$0xff]  }
 0x74c   : > { %6068 = vmatprep.subr.bf16.mxu0 %v8180_v17  ;;  %6232 = vmatprep.subr.bf16.mxu1 %v8183_v18  ;;  %v8264_v17 = vld [vmem:[%s9366_s22 + $0x9b4] ss:$20 sps:$4 sm:$0xff]   ;;  %v8267_v18 = vld [vmem:[%s9366_s22 + $0x9bc] ss:$20 sps:$4 sm:$0xff]  }
 0x74e   : > { %6060 = vmatmul.mubr.bf16.vlgmr.msra.gmra.mrb[0].mxu0 %v9823_v26  ;;  %6224 = vmatmul.mubr.bf16.vlgmr.msra.gmra.mrb[0].mxu1 %v9823_v26 }
 0x74f   : > { %6069 = vmatpush1.bf16.msra.mxu0 %v8178_v22  ;;  %6233 = vmatpush1.bf16.msra.mxu1 %v8181_v23  ;;  %v8262_v22 = vld [vmem:[%s9366_s22 + $0x9b0] ss:$20 sps:$4 sm:$0xff]   ;;  %v8265_v23 = vld [vmem:[%s9366_s22 + $0x9b8] ss:$20 sps:$4 sm:$0xff]  }
 0x750   : > { %6070 = vmatprep.subr.bf16.mxu0 %v8186_v31  ;;  %6234 = vmatprep.subr.bf16.mxu1 %v8189_v32  ;;  %v8270_v31 = vld [vmem:[%s9366_s22 + $0x9dc] ss:$20 sps:$4 sm:$0xff]   ;;  %v8273_v32 = vld [vmem:[%s9366_s22 + $0x9e4] ss:$20 sps:$4 sm:$0xff]  }
 0x751   : > { %6100 = vmatprep.mubr.bf16.mxu0 %v9832_v54  ;;  %6264 = vmatprep.mubr.bf16.mxu1 %v9832_v54 }
 0x753   : > { %6071 = vmatpush1.bf16.msra.mxu0 %v8184_v48  ;;  %6235 = vmatpush1.bf16.msra.mxu1 %v8187_v14  ;;  %v8268_v48 = vld [vmem:[%s9366_s22 + $0x9d8] ss:$20 sps:$4 sm:$0xff]   ;;  %v8271_v14 = vld [vmem:[%s9366_s22 + $0x9e0] ss:$20 sps:$4 sm:$0xff]  }
 0x754   : > { %6072 = vmatprep.subr.bf16.mxu0 %v8192_v55  ;;  %6236 = vmatprep.subr.bf16.mxu1 %v8195_v57  ;;  %v8276_v55 = vld [vmem:[%s9366_s22 + $0x150] ss:$20 sps:$4 sm:$0xff]  }
 0x755   : > { %v8277_v57 = vld [vmem:[%s9366_s22 + $0x3d0] ss:$20 sps:$4 sm:$0xff]  }
 0x757   : > { %6073 = vmatpush1.bf16.msra.mxu0 %v8190_v56  ;;  %6237 = vmatpush1.bf16.msra.mxu1 %v8193_v58  ;;  %v9899_v56 = vcombine.low %v9825_v29, %v9825_v29  ;;  %v8278_v58 = vld [vmem:[%s9366_s22 + $0x10] ss:$20 sps:$4 sm:$0xff]   ;;  %v8282_v29 = vld [vmem:[%s9366_s22 + $0x38] ss:$20 sps:$4 sm:$0xff]  }
 0x758   : > { %6074 = vmatprep.subr.bf16.mxu0 %v8198_v60  ;;  %6238 = vmatprep.subr.bf16.mxu1 %v8201_v34  ;;  %v8279_v60 = vld [vmem:[%s9366_s22 + $0x290] ss:$20 sps:$4 sm:$0xff]   ;;  %v8280_v34 = vld [vmem:[%s9366_s22 + $0x178] ss:$20 sps:$4 sm:$0xff]  }
 0x75b   : > { %6075 = vmatpush1.bf16.msra.mxu0 %v8196_v35  ;;  %6239 = vmatpush1.bf16.msra.mxu1 %v8199_v36  ;;  %v8281_v35 = vld [vmem:[%s9366_s22 + $0x3f8] ss:$20 sps:$4 sm:$0xff]  }
 0x75c   : > { %6076 = vmatprep.subr.bf16.mxu0 %v8204_v41  ;;  %6240 = vmatprep.subr.bf16.mxu1 %v8207_v25  ;;  %v8283_v36 = vld [vmem:[%s9366_s22 + $0x2b8] ss:$20 sps:$4 sm:$0xff]   ;;  %v8284_v41 = vld [vmem:[%s9366_s22 + $0x1a0] ss:$20 sps:$4 sm:$0xff]  }
 0x75d   : > { %v8285_v25 = vld [vmem:[%s9366_s22 + $0x420] ss:$20 sps:$4 sm:$0xff]  }
 0x75f   : > { %6077 = vmatpush1.bf16.msra.mxu0 %v8202_v1  ;;  %6241 = vmatpush1.bf16.msra.mxu1 %v8205_v43  ;;  %v8286_v1 = vld [vmem:[%s9366_s22 + $0x60] ss:$20 sps:$4 sm:$0xff]  }
 0x760   : > { %6078 = vmatprep.subr.bf16.mxu0 %v8210_v2  ;;  %6242 = vmatprep.subr.bf16.mxu1 %v8213_v24  ;;  %v8287_v43 = vld [vmem:[%s9366_s22 + $0x2e0] ss:$20 sps:$4 sm:$0xff]   ;;  %v8288_v2 = vld [vmem:[%s9366_s22 + $0x1c8] ss:$20 sps:$4 sm:$0xff]  }
 0x761   : > { %v8289_v24 = vld [vmem:[%s9366_s22 + $0x448] ss:$20 sps:$4 sm:$0xff]  }
 0x763   : > { %6079 = vmatpush1.bf16.msra.mxu0 %v8208_v44  ;;  %6243 = vmatpush1.bf16.msra.mxu1 %v8211_v6  ;;  %v8290_v44 = vld [vmem:[%s9366_s22 + $0x88] ss:$20 sps:$4 sm:$0xff]   ;;  %v8293_v6 = vld [vmem:[%s9366_s22 + $0x470] ss:$20 sps:$4 sm:$0xff]  }
 0x764   : > { %6080 = vmatprep.subr.bf16.mxu0 %v8216_v46  ;;  %6244 = vmatprep.subr.bf16.mxu1 %v8219_v47  ;;  %v8294_v46 = vld [vmem:[%s9366_s22 + $0xb0] ss:$20 sps:$4 sm:$0xff]  }
 0x765   : > { %v8295_v47 = vld [vmem:[%s9366_s22 + $0x330] ss:$20 sps:$4 sm:$0xff]  }
 0x767   : > { %6081 = vmatpush1.bf16.msra.mxu0 %v8214_v49  ;;  %6245 = vmatpush1.bf16.msra.mxu1 %v8217_v28  ;;  %v8296_v49 = vld [vmem:[%s9366_s22 + $0x218] ss:$20 sps:$4 sm:$0xff]  }
 0x768   : > { %6082 = vmatprep.subr.bf16.mxu0 %v8222_v5  ;;  %6246 = vmatprep.subr.bf16.mxu1 %v8225_v7  ;;  %v8297_v28 = vld [vmem:[%s9366_s22 + $0x498] ss:$20 sps:$4 sm:$0xff]  }
 0x769   : > { %v8298_v5 = vld [vmem:[%s9366_s22 + $0xd8] ss:$20 sps:$4 sm:$0xff]  }
 0x76a   : > { %v8299_v7 = vld [vmem:[%s9366_s22 + $0x358] ss:$20 sps:$4 sm:$0xff]  }
 0x76b   : > { %6083 = vmatpush1.bf16.msra.mxu0 %v8220_v51  ;;  %6247 = vmatpush1.bf16.msra.mxu1 %v8223_v61  ;;  %v8300_v51 = vld [vmem:[%s9366_s22 + $0x240] ss:$20 sps:$4 sm:$0xff]  }
 0x76c   : > { %6084 = vmatprep.subr.bf16.mxu0 %v8228_v45  ;;  %6248 = vmatprep.subr.bf16.mxu1 %v8231_v52  ;;  %v8301_v61 = vld [vmem:[%s9366_s22 + $0x4c0] ss:$20 sps:$4 sm:$0xff]  }
 0x76d   : > { %v8302_v45 = vld [vmem:[%s9366_s22 + $0x100] ss:$20 sps:$4 sm:$0xff]  }
 0x76e   : > { %v8303_v52 = vld [vmem:[%s9366_s22 + $0x380] ss:$20 sps:$4 sm:$0xff]  }
 0x76f   : > { %6085 = vmatpush1.bf16.msra.mxu0 %v8226_v62  ;;  %6249 = vmatpush1.bf16.msra.mxu1 %v8229_v27  ;;  %v8304_v62 = vld [vmem:[%s9366_s22 + $0x268] ss:$20 sps:$4 sm:$0xff]  }
 0x770   : > { %6086 = vmatprep.subr.bf16.mxu0 %v8234_v53  ;;  %6250 = vmatprep.subr.bf16.mxu1 %v8237_v37  ;;  %v8305_v27 = vld [vmem:[%s9366_s22 + $0x4e8] ss:$20 sps:$4 sm:$0xff]  }
 0x771   : > { %v8306_v53 = vld [vmem:[%s9366_s22 + $0x128] ss:$20 sps:$4 sm:$0xff]  }
 0x772   : > { %v8307_v37 = vld [vmem:[%s9366_s22 + $0x3a8] ss:$20 sps:$4 sm:$0xff]  }
 0x773   : > { %6087 = vmatpush1.bf16.msra.mxu0 %v8232_v63  ;;  %6251 = vmatpush1.bf16.msra.mxu1 %v8235_v20  ;;  %v8308_v63 = vld [vmem:[%s9366_s22 + $0x650] ss:$20 sps:$4 sm:$0xff]  }
 0x774   : > { %6088 = vmatprep.subr.bf16.mxu0 %v8240_v0  ;;  %6252 = vmatprep.subr.bf16.mxu1 %v8243_v30  ;;  %v8309_v20 = vld [vmem:[%s9366_s22 + $0x8d0] ss:$20 sps:$4 sm:$0xff]  }
 0x775   : > { %v8310_v0 = vld [vmem:[%s9366_s22 + $0x510] ss:$20 sps:$4 sm:$0xff]  }
 0x776   : > { %v8311_v30 = vld [vmem:[%s9366_s22 + $0x790] ss:$20 sps:$4 sm:$0xff]  }
 0x777   : > { %6089 = vmatpush1.bf16.msra.mxu0 %v8238_v3  ;;  %6253 = vmatpush1.bf16.msra.mxu1 %v8241_v59  ;;  %v8312_v3 = vld [vmem:[%s9366_s22 + $0x678] ss:$20 sps:$4 sm:$0xff]  }
 0x778   : > { %6090 = vmatprep.subr.bf16.mxu0 %v8246_v21  ;;  %6254 = vmatprep.subr.bf16.mxu1 %v8249_v4  ;;  %v8313_v59 = vld [vmem:[%s9366_s22 + $0x8f8] ss:$20 sps:$4 sm:$0xff]  }
 0x779   : > { %v8314_v21 = vld [vmem:[%s9366_s22 + $0x538] ss:$20 sps:$4 sm:$0xff]  }
 0x77a   : > { %v8315_v4 = vld [vmem:[%s9366_s22 + $0x7b8] ss:$20 sps:$4 sm:$0xff]  }
 0x77b   : > { %6091 = vmatpush1.bf16.msra.mxu0 %v8244_v8  ;;  %6255 = vmatpush1.bf16.msra.mxu1 %v8247_v9  ;;  %v8316_v8 = vld [vmem:[%s9366_s22 + $0x6a0] ss:$20 sps:$4 sm:$0xff]  }
 0x77c   : > { %6092 = vmatprep.subr.bf16.mxu0 %v8252_v10  ;;  %6256 = vmatprep.subr.bf16.mxu1 %v8255_v38  ;;  %v8317_v9 = vld [vmem:[%s9366_s22 + $0x920] ss:$20 sps:$4 sm:$0xff]   ;;  %v8320_v10 = vld [vmem:[%s9366_s22 + $0x6c8] ss:$20 sps:$4 sm:$0xff]  }
 0x77d   : > { %v8321_v38 = vld [vmem:[%s9366_s22 + $0x948] ss:$20 sps:$4 sm:$0xff]  }
 0x77f   : > { %6093 = vmatpush1.bf16.msra.mxu0 %v8250_v39  ;;  %6257 = vmatpush1.bf16.msra.mxu1 %v8253_v40  ;;  %v8322_v39 = vld [vmem:[%s9366_s22 + $0x588] ss:$20 sps:$4 sm:$0xff]   ;;  %v8325_v40 = vld [vmem:[%s9366_s22 + $0x970] ss:$20 sps:$4 sm:$0xff]  }
 0x780   : > { %6094 = vmatprep.subr.bf16.mxu0 %v8258_v11  ;;  %6258 = vmatprep.subr.bf16.mxu1 %v8261_v13  ;;  %v8326_v11 = vld [vmem:[%s9366_s22 + $0x5b0] ss:$20 sps:$4 sm:$0xff]  }
 0x781   : > { %v8327_v13 = vld [vmem:[%s9366_s22 + $0x830] ss:$20 sps:$4 sm:$0xff]  }
 0x783   : > { %6095 = vmatpush1.bf16.msra.mxu0 %v8256_v19  ;;  %6259 = vmatpush1.bf16.msra.mxu1 %v8259_v15  ;;  %v8328_v19 = vld [vmem:[%s9366_s22 + $0x718] ss:$20 sps:$4 sm:$0xff]  }
 0x784   : > { %6096 = vmatprep.subr.bf16.mxu0 %v8264_v17  ;;  %6260 = vmatprep.subr.bf16.mxu1 %v8267_v18  ;;  %v8329_v15 = vld [vmem:[%s9366_s22 + $0x998] ss:$20 sps:$4 sm:$0xff]  }
 0x785   : > { %v8330_v17 = vld [vmem:[%s9366_s22 + $0x5d8] ss:$20 sps:$4 sm:$0xff]  }
 0x786   : > { %v8331_v18 = vld [vmem:[%s9366_s22 + $0x858] ss:$20 sps:$4 sm:$0xff]  }
 0x787   : > { %6097 = vmatpush1.bf16.msra.mxu0 %v8262_v22  ;;  %6261 = vmatpush1.bf16.msra.mxu1 %v8265_v23  ;;  %v8332_v22 = vld [vmem:[%s9366_s22 + $0x740] ss:$20 sps:$4 sm:$0xff]  }
 0x788   : > { %6098 = vmatprep.subr.bf16.mxu0 %v8270_v31  ;;  %6262 = vmatprep.subr.bf16.mxu1 %v8273_v32  ;;  %v8333_v23 = vld [vmem:[%s9366_s22 + $0x9c0] ss:$20 sps:$4 sm:$0xff]  }
 0x789   : > { %v8334_v31 = vld [vmem:[%s9366_s22 + $0x600] ss:$20 sps:$4 sm:$0xff]  }
 0x78a   : > { %v8335_v32 = vld [vmem:[%s9366_s22 + $0x880] ss:$20 sps:$4 sm:$0xff]  }
 0x78b   : > { %6099 = vmatpush1.bf16.msra.mxu0 %v8268_v48  ;;  %6263 = vmatpush1.bf16.msra.mxu1 %v8271_v14  ;;  %v8336_v48 = vld [vmem:[%s9366_s22 + $0x768] ss:$20 sps:$4 sm:$0xff]  }
 0x78c   : > { %7388 = vmatprep.subr.bf16.mxu0 %v8276_v55  ;;  %7410 = vmatprep.subr.bf16.mxu1 %v8277_v57  ;;  %v8337_v14 = vld [vmem:[%s9366_s22 + $0x9e8] ss:$20 sps:$4 sm:$0xff]  }
 0x78d   : > { %v8338_v55 = vld [vmem:[%s9366_s22 + $0x628] ss:$20 sps:$4 sm:$0xff]  }
 0x78e   : > { %6101 = vmatmul.mubr.bf16.vlgmr.msra.gmra.mrb[0].mxu0 %v9899_v56  ;;  %6265 = vmatmul.mubr.bf16.vlgmr.msra.gmra.mrb[0].mxu1 %v9899_v56  ;;  %v8339_v57 = vld [vmem:[%s9366_s22 + $0x8a8] ss:$20 sps:$4 sm:$0xff]  }
 0x78f   : > { %7389 = vmatpush3.bf16.msra.mxu0 %v8278_v58  ;;  %7411 = vmatpush3.bf16.msra.mxu1 %v8279_v60  ;;  %v4228_v58 = vlaneseq }
 0x790   : > { %7390 = vmatprep.subr.bf16.mxu0 %v8280_v34  ;;  %7412 = vmatprep.subr.bf16.mxu1 %v8281_v35 }
 0x791   : > { %6305 = vmatprep.mubr.bf16.mxu0 %v9642_v50  ;;  %6345 = vmatprep.mubr.bf16.mxu1 %v9697_v33  ;;  %v8291_v50 = vld [vmem:[%s9366_s22 + $0x308] ss:$20 sps:$4 sm:$0xff]   ;;  %v8292_v33 = vld [vmem:[%s9366_s22 + $0x1f0] ss:$20 sps:$4 sm:$0xff]   ;;  %v4229_v60 = vshrl.u32 %v4228_v58, 7 }
 0x793   : > { %7391 = vmatpush3.bf16.msra.mxu0 %v8282_v29  ;;  %7413 = vmatpush3.bf16.msra.mxu1 %v8283_v36  ;;  %v4230_v34 = vsub.s32 0, %v4229_v60  ;;  %v4238_v35 = vsub.s32 2, %v4229_v60  ;;  %v4226_v29 = vld [vmem:[%s9374_s20] sm:$0x1f]  ;;  %v4234_v36 = vsub.s32 1, %v4229_v60 }
 0x794   : > { %7392 = vmatprep.subr.bf16.mxu0 %v8284_v41  ;;  %7414 = vmatprep.subr.bf16.mxu1 %v8285_v25  ;;  %v4242_v41 = vsub.s32 3, %v4229_v60 }
 0x795   : > { %v4231_v25 = vrot.slane %v4226_v29, %v4230_v34 }
 0x797   : > { %7393 = vmatpush3.bf16.msra.mxu0 %v8286_v1  ;;  %7415 = vmatpush3.bf16.msra.mxu1 %v8287_v43  ;;  %v4239_v1 = vrot.slane %v4226_v29, %v4238_v35  ;;  %v4235_v43 = vrot.slane %v4226_v29, %v4234_v36 }
 0x798   : > { %7394 = vmatprep.subr.bf16.mxu0 %v8288_v2  ;;  %7416 = vmatprep.subr.bf16.mxu1 %v8289_v24  ;;  %v4243_v2 = vrot.slane %v4226_v29, %v4242_v41 }
 0x79b   : > { %7395 = vmatpush3.bf16.msra.mxu0 %v8290_v44  ;;  %7417 = vmatpush3.bf16.msra.mxu1 %v8291_v50 }
 0x79c   : > { %7396 = vmatprep.subr.bf16.mxu0 %v8292_v33  ;;  %7418 = vmatprep.subr.bf16.mxu1 %v8293_v6 }
 0x79f   : > { %7397 = vmatpush3.bf16.msra.mxu0 %v8294_v46  ;;  %7419 = vmatpush3.bf16.msra.mxu1 %v8295_v47 }
 0x7a0   : > { %7398 = vmatprep.subr.bf16.mxu0 %v8296_v49  ;;  %7420 = vmatprep.subr.bf16.mxu1 %v8297_v28 }
 0x7a3   : > { %7399 = vmatpush3.bf16.msra.mxu0 %v8298_v5  ;;  %7421 = vmatpush3.bf16.msra.mxu1 %v8299_v7 }
 0x7a4   : > { %7400 = vmatprep.subr.bf16.mxu0 %v8300_v51  ;;  %7422 = vmatprep.subr.bf16.mxu1 %v8301_v61 }
 0x7a7   : > { %7401 = vmatpush3.bf16.msra.mxu0 %v8302_v45  ;;  %7423 = vmatpush3.bf16.msra.mxu1 %v8303_v52  ;;  %v4246_v52 = vsub.s32 4, %v4229_v60 }
 0x7a8   : > { %7402 = vmatprep.subr.bf16.mxu0 %v8304_v62  ;;  %7424 = vmatprep.subr.bf16.mxu1 %v8305_v27 }
 0x7ab   : > { %7403 = vmatpush3.bf16.msra.mxu0 %v8306_v53  ;;  %7425 = vmatpush3.bf16.msra.mxu1 %v8307_v37  ;;  %v4247_v53 = vrot.slane %v4226_v29, %v4246_v52 }
 0x7ac   : > { %7432 = vmatprep.subr.bf16.mxu0 %v8308_v63  ;;  %7454 = vmatprep.subr.bf16.mxu1 %v8309_v20 }
 0x7ae   : > { %6306 = vmatmul.mubr.bf16.vlgmr.msra.gmra.mrb[4].mxu0 %v9666_v12  ;;  %6346 = vmatmul.mubr.bf16.vlgmr.msra.gmra.mrb[4].mxu1 %v9743_v42  ;;  %v8318_v12 = vld [vmem:[%s9366_s22 + $0x560] ss:$20 sps:$4 sm:$0xff]  }
 0x7af   : > { %7433 = vmatpush3.bf16.msra.mxu0 %v8310_v0  ;;  %7455 = vmatpush3.bf16.msra.mxu1 %v8311_v30  ;;  %v8319_v42 = vld [vmem:[%s9366_s22 + $0x7e0] ss:$20 sps:$4 sm:$0xff]  }
 0x7b0   : > { %7434 = vmatprep.subr.bf16.mxu0 %v8312_v3  ;;  %7456 = vmatprep.subr.bf16.mxu1 %v8313_v59 }
 0x7b1   : > { %6385 = vmatprep.mubr.bf16.mxu0 %v9753_v16  ;;  %6425 = vmatprep.mubr.bf16.mxu1 %v9832_v54  ;;  %v8323_v16 = vld [vmem:[%s9366_s22 + $0x808] ss:$20 sps:$4 sm:$0xff]   ;;  %v8324_v54 = vld [vmem:[%s9366_s22 + $0x6f0] ss:$20 sps:$4 sm:$0xff]  }
 0x7b3   : > { %7435 = vmatpush3.bf16.msra.mxu0 %v8314_v21  ;;  %7457 = vmatpush3.bf16.msra.mxu1 %v8315_v4 }
 0x7b4   : > { %7436 = vmatprep.subr.bf16.mxu0 %v8316_v8  ;;  %7458 = vmatprep.subr.bf16.mxu1 %v8317_v9 }
 0x7b7   : > { %7437 = vmatpush3.bf16.msra.mxu0 %v8318_v12  ;;  %7459 = vmatpush3.bf16.msra.mxu1 %v8319_v42 }
 0x7b8   : > { %7438 = vmatprep.subr.bf16.mxu0 %v8320_v10  ;;  %7460 = vmatprep.subr.bf16.mxu1 %v8321_v38 }
 0x7bb   : > { %7439 = vmatpush3.bf16.msra.mxu0 %v8322_v39  ;;  %7461 = vmatpush3.bf16.msra.mxu1 %v8323_v16 }
 0x7bc   : > { %7440 = vmatprep.subr.bf16.mxu0 %v8324_v54  ;;  %7462 = vmatprep.subr.bf16.mxu1 %v8325_v40 }
 0x7bf   : > { %7441 = vmatpush3.bf16.msra.mxu0 %v8326_v11  ;;  %7463 = vmatpush3.bf16.msra.mxu1 %v8327_v13 }
 0x7c0   : > { %7442 = vmatprep.subr.bf16.mxu0 %v8328_v19  ;;  %7464 = vmatprep.subr.bf16.mxu1 %v8329_v15 }
 0x7c3   : > { %7443 = vmatpush3.bf16.msra.mxu0 %v8330_v17  ;;  %7465 = vmatpush3.bf16.msra.mxu1 %v8331_v18 }
 0x7c4   : > { %7444 = vmatprep.subr.bf16.mxu0 %v8332_v22  ;;  %7466 = vmatprep.subr.bf16.mxu1 %v8333_v23 }
 0x7c7   : > { %7445 = vmatpush3.bf16.msra.mxu0 %v8334_v31  ;;  %7467 = vmatpush3.bf16.msra.mxu1 %v8335_v32 }
 0x7c8   : > { %7446 = vmatprep.subr.bf16.mxu0 %v8336_v48  ;;  %7468 = vmatprep.subr.bf16.mxu1 %v8337_v14 }
 0x7cb   : > { %7447 = vmatpush3.bf16.msra.mxu0 %v8338_v55  ;;  %7469 = vmatpush3.bf16.msra.mxu1 %v8339_v57 }
 0x7ce   : > { %6386 = vmatmul.mubr.bf16.vlgmr.msra.gmra.mrb[8].mxu0 %v9823_v26  ;;  %6426 = vmatmul.mubr.bf16.vlgmr.msra.gmra.mrb[8].mxu1 %v9899_v56 }
 0x861   : > { %v6102_v24 = vpop.f32.mrb[0].mxu0  ;;  %v6266_v44 = vpop.f32.mrb[0].mxu1 }
 0x862   : > { %v7510_v50 = vadd.f32 %v6102_v24, %v4231_v25  ;;  %v7512_v33 = vadd.f32 %v6266_v44, %v4239_v1  ;;  %v6104_v6 = vpop.f32.mrb[1].mxu0  ;;  %v6268_v26 = vpop.f32.mrb[1].mxu1 }
 0x863   : > { %v7511_v56 = vadd.f32 %v6104_v6, %v4235_v43  ;;  %v7513_v46 = vadd.f32 %v6268_v26, %v4243_v2  ;;  %v6106_v47 = vpop.f32.mrb[2].mxu0  ;;  %v6270_v49 = vpop.f32.mrb[2].mxu1 }
 0x864   : > { %8340 = vtanh.f32 %v7510_v50  ;;  %v6107_v28 = vpop.f32.mrb[3].mxu0  ;;  %v6271_v5 = vpop.f32.mrb[3].mxu1 }
 0x865   : > { %8342 = vtanh.f32 %v7512_v33 }
 0x866   : > { %8344 = vtanh.f32 %v7511_v56 }
 0x867   : > { %8346 = vtanh.f32 %v7513_v46 }
 0x86e   : > { %v8341_v7 = vpop.eup %8340 }
 0x86f   : > { %v8343_v51 = vpop.eup %8342  ;;  %6438 = vst [vmem:[%s9376_s24] sm:$0xff] %v8341_v7 }
 0x870   : > { %v8345_v61 = vpop.eup %8344  ;;  %6440 = vst [vmem:[%s9376_s24 + $0x10] sm:$0xff] %v8343_v51 }
 0x871   : > { %v8347_v45 = vpop.eup %8346  ;;  %6439 = vst [vmem:[%s9376_s24 + $0x8] sm:$0xff] %v8345_v61 }
 0x872   : > { %6441 = vst [vmem:[%s9376_s24 + $0x18] sm:$0xff] %v8347_v45 }
 0x881   : > { %v7404_v62 = vpop.f32.mrb[4].mxu0  ;;  %v7426_v27 = vpop.f32.mrb[4].mxu1 }
 0x882   : > { %v7405_v37 = vpop.f32.mrb[5].mxu0  ;;  %v7427_v63 = vpop.f32.mrb[5].mxu1 }
 0x883   : > { %v7406_v20 = vadd.f32 %v7405_v37, %v7404_v62  ;;  %v7428_v0 = vadd.f32 %v7427_v63, %v7426_v27  ;;  %v7407_v30 = vpop.f32.mrb[6].mxu0  ;;  %v7429_v3 = vpop.f32.mrb[6].mxu1 }
 0x884   : > { %v7408_v59 = vpop.f32.mrb[7].mxu0  ;;  %v7430_v21 = vpop.f32.mrb[7].mxu1 }
 0x885   : > { %v6308_v4 = vadd.f32 %v7406_v20, %v4247_v53 }
 0x887   : > { %v6348_v8 = vadd.f32 %v7428_v0, %v6308_v4 }
 0x8a1   : > { %v7448_v9 = vpop.f32.mrb[8].mxu0  ;;  %v7470_v12 = vpop.f32.mrb[8].mxu1 }
 0x8a2   : > { %v7449_v42 = vpop.f32.mrb[9].mxu0  ;;  %v7471_v10 = vpop.f32.mrb[9].mxu1 }
 0x8a3   : > { %v7450_v38 = vadd.f32 %v7449_v42, %v7448_v9  ;;  %v7472_v39 = vadd.f32 %v7471_v10, %v7470_v12  ;;  %v7451_v16 = vpop.f32.mrb[10].mxu0  ;;  %v7473_v54 = vpop.f32.mrb[10].mxu1 }
 0x8a4   : > { %v7452_v40 = vpop.f32.mrb[11].mxu0  ;;  %v7474_v11 = vpop.f32.mrb[11].mxu1 }
 0x8a5   : > { %v6388_v13 = vadd.f32 %v7450_v38, %v6348_v8 }
 0x8a7   : > { %v6428_v19 = vadd.f32 %v7472_v39, %v6388_v13 }
 0x8a9   : > { %8348 = vtanh.f32 %v6428_v19 }
 0x8b3   : > { %v8349_v15 = vpop.eup %8348 }
 0x8b4   : > { %6442 = vst [vmem:[%s9376_s24 + $0x20] sm:$0xff] %v8349_v15 }
 0x8b5   : > { %8759 = shalt.err (!%p8756_p7)
}
 0x8b6   : > { %s8760_s25 = scalar_lea.hbm %s9983_s11, 640  ;;  %s8764_s7 = scalar_lea.hbm %s10117_s14, 1920 }
 0x8b7   : > { %p8761_p2 = scmp.ne.s32.totalorder %s9983_s11, %s8760_s25  ;;  %p8765_p5 = scmp.lt.u32.totalorder %s9983_s11, %s10117_s14 }
 0x8b8   : > { %p8766_p4 = scmp.lt.u32.totalorder %s8764_s7, %s8760_s25  ;;  %p8768_p9 = scmp.lt.u32.totalorder %s8760_s25, %s9983_s11 }
 0x8b9   : > { %p8762_p3 = pnand %p8761_p2, %p10118_p1 }
 0x8ba   : > { %p8767_p0 = por %p8766_p4, %p8765_p5 }
 0x8bb   : > { %p8763_p6 = pneg %p8762_p3 }
 0x8bc   : > { %p8769_p10 = por %p8768_p9, %p8767_p0 }
 0x8be   : > { %p8770_p11 = pnand %p8769_p10, %p8763_p6 }
 0x8c0   : > { %8773 = shalt.err (!%p8770_p11)
}
 0x8c1   : > { %7595 = dma.vmem_to_hbm [thread:$0]  (%p10118_p1), %s9985_s18, 640, %s9983_s11, %s6444_s9  }
 0x8c2 PF: > { %p7670_p12 = scmp.ge.s32.totalorder %s8840_s16, 2  ;;  %s6470_s24 = sand.u32 1, %s8828_s29  }
 0x8c3   : > { %p10119_p13 = scmp.ne.s32.totalorder %s10087_s10, 0  ;;  %s6471_s13 = scalar_lea.sflag [#allocation5], %s6470_s24 }
 0x8c5   : > { %p7642_p8 = pnand %p7670_p12, %p10119_p13 }
 0x8c7   : > { %8823 = dma.done.wait (!%p7642_p8), %s6471_s13, 640  }
 0x8c8   : > { %8825 = vsyncadd (!%p7642_p8), %s6471_s13, 4294966656  ;;  %s10120_s16 = sld [smem:[#allocation36_spill]]  ;;  %s10121_s28 = sld [smem:[#allocation37_spill]] }
 0x8c9   : > { %s10122_s29 = smov %s8832_s30  ;;  %s10123_s30 = smov %s8836_s15 }
 0x8ce   : > { %p31_p7 = scmp.ge.s32.totalorder %s10120_s16, 5   ;;  %s10124_s15 = smov %s10121_s28 }
 0x8d0   :  { %33 = sbr.rel (!%p31_p7) target bundleno = 23 (0x17), region = 183 }
 0x8d7   :  { %6476 = vsyncpa [#allocation4], 1 }
 0x8d8   :  { %6478 = vsyncpa [#allocation4 + $0x1], 1 }
 0x8d9   :  { %6479 = vsyncpa [#allocation7], 1 }
 0x8da   :  { %6480 = vsyncpa [#allocation10], 1 }
 0x8db   :  { %6481 = vsyncpa [#allocation13], 1 }
 0x8dc   :  { %6482 = vsyncpa [#allocation16], 1 }
 0x8dd   :  { %6483 = vsyncpa [#allocation19], 1 }
 0x8de   :  { %6484 = vsyncpa [#allocation22], 1 }
 0x8df   :  { %6485 = vsyncpa [#allocation5], 1 }
 0x8e0   :  { %6487 = vsyncpa [#allocation5 + $0x1], 1 }

</bundles_post_ra>
